<compile_context>
chip_gen: v7x
topology: tpu7x:2x2x1
jax: 0.10.0
libtpu: 0.0.40
codegen_flags: <defaults>
</compile_context>

<pallas_src>
import math
from functools import partial

import jax
import jax.numpy as jnp
from jax.experimental import pallas as pl
from jax.experimental.pallas import tpu as pltpu

# ----------------------------- configuration --------------------------------
IN_CHANNELS = 3
OUT_CHANNELS = 3
TIME_EMB_DIM = 32
FEATURES = [8, 16]          # small version of [64, 128, 256, 512]
TIMESTEPS = 50
BETA_START = 1e-4
BETA_END = 0.02
BN_EPS = 1e-5               # nn.BatchNorm2d default; training-mode (batch) stats
# conditioning_dim=None  -> drop_condition is identity, conditioning_fn unused
# predict_unscaled_noise=True -> target noise returned unscaled


# ----------------------------- Pallas kernels --------------------------------
def _bn(y, g, bt, eps):
    """BatchNorm (batch stats over the pixel/lane axis), single pass, f32."""
    m = y.shape[1]
    mean = jnp.sum(y, axis=1, keepdims=True) * (1.0 / m)
    var = jnp.sum(y * y, axis=1, keepdims=True) * (1.0 / m) - mean * mean
    return (y - mean) * jax.lax.rsqrt(var + eps) * g + bt


def _conv_bn_time_relu_kernel(p_ref, w_ref, b_ref, g_ref, bt_ref,
                              tw_ref, tb_ref, cond_ref, sel_ref, o_ref, *, eps):
    # conv as (Cout, K) @ (K, M); pixels (M = N*H*W) live on lanes -> dense vst.
    y = jnp.dot(w_ref[...], p_ref[...],
                preferred_element_type=jnp.float32) + b_ref[...]
    # fused time MLP: (Cout, Tdim) @ (Tdim, N) per-image bias, broadcast to
    # pixels via the (N, M) one-hot selector (free MXU filler, K = N).
    t_img = jnp.dot(tw_ref[...], cond_ref[...],
                    preferred_element_type=jnp.float32) + tb_ref[...]
    t_pix = jnp.dot(t_img, sel_ref[...], preferred_element_type=jnp.float32)
    o_ref[...] = jnp.maximum(_bn(y, g_ref[...], bt_ref[...], eps) + t_pix,
                             0.0).astype(o_ref.dtype)


def _conv_bn_relu_kernel(p_ref, w_ref, b_ref, g_ref, bt_ref, o_ref, *, eps):
    y = jnp.dot(w_ref[...], p_ref[...],
                preferred_element_type=jnp.float32) + b_ref[...]
    o_ref[...] = jnp.maximum(_bn(y, g_ref[...], bt_ref[...], eps),
                             0.0).astype(o_ref.dtype)


def _conv_bn_relu_final_kernel(p_ref, w_ref, b_ref, g_ref, bt_ref,
                               fw_ref, fb_ref, o_ref, *, eps):
    # last decoder conv2 + fused final 1x1 conv epilogue -> (OUT_CHANNELS, M)
    y = jnp.dot(w_ref[...], p_ref[...],
                preferred_element_type=jnp.float32) + b_ref[...]
    h = jnp.maximum(_bn(y, g_ref[...], bt_ref[...], eps), 0.0)
    o_ref[...] = jnp.dot(fw_ref[...], h,
                         preferred_element_type=jnp.float32) + fb_ref[...]


def _matmul_bias_t_kernel(w_ref, x_ref, b_ref, o_ref):
    o_ref[...] = (jnp.dot(w_ref[...], x_ref[...],
                          preferred_element_type=jnp.float32)
                  + b_ref[...]).astype(o_ref.dtype)


# ----------------------------- Pallas wrappers --------------------------------
def conv_bn_time_relu(patches, w, b, g, bt, tw, tb, cond_t, sel):
    """relu(BN(conv(x)) + time_mlp(t))  ->  (Cout, M) bf16."""
    K, M = patches.shape
    Cout = w.shape[0]
    Tdim, N = cond_t.shape
    return pl.pallas_call(
        partial(_conv_bn_time_relu_kernel, eps=BN_EPS),
        out_shape=jax.ShapeDtypeStruct((Cout, M), jnp.bfloat16),
        grid=(1,),
        in_specs=[
            pl.BlockSpec((K, M), lambda i: (0, 0)),
            pl.BlockSpec((Cout, K), lambda i: (0, 0)),
            pl.BlockSpec((Cout, 1), lambda i: (0, 0)),
            pl.BlockSpec((Cout, 1), lambda i: (0, 0)),
            pl.BlockSpec((Cout, 1), lambda i: (0, 0)),
            pl.BlockSpec((Cout, Tdim), lambda i: (0, 0)),
            pl.BlockSpec((Cout, 1), lambda i: (0, 0)),
            pl.BlockSpec((Tdim, N), lambda i: (0, 0)),
            pl.BlockSpec((N, M), lambda i: (0, 0)),
        ],
        out_specs=pl.BlockSpec((Cout, M), lambda i: (0, 0)),
        compiler_params=pltpu.CompilerParams(dimension_semantics=("arbitrary",)),
    )(patches, w, b.reshape(Cout, 1), g.reshape(Cout, 1), bt.reshape(Cout, 1),
      tw, tb.reshape(Cout, 1), cond_t, sel)


def conv_bn_relu(patches, w, b, g, bt):
    """relu(BN(conv(x)))  ->  (Cout, M) bf16."""
    K, M = patches.shape
    Cout = w.shape[0]
    return pl.pallas_call(
        partial(_conv_bn_relu_kernel, eps=BN_EPS),
        out_shape=jax.ShapeDtypeStruct((Cout, M), jnp.bfloat16),
        grid=(1,),
        in_specs=[
            pl.BlockSpec((K, M), lambda i: (0, 0)),
            pl.BlockSpec((Cout, K), lambda i: (0, 0)),
            pl.BlockSpec((Cout, 1), lambda i: (0, 0)),
            pl.BlockSpec((Cout, 1), lambda i: (0, 0)),
            pl.BlockSpec((Cout, 1), lambda i: (0, 0)),
        ],
        out_specs=pl.BlockSpec((Cout, M), lambda i: (0, 0)),
        compiler_params=pltpu.CompilerParams(dimension_semantics=("arbitrary",)),
    )(patches, w, b.reshape(Cout, 1), g.reshape(Cout, 1), bt.reshape(Cout, 1))


def conv_bn_relu_final(patches, w, b, g, bt, fw, fb):
    """final_conv(relu(BN(conv(x))))  ->  (OUT_CHANNELS, M) f32."""
    K, M = patches.shape
    Cout = w.shape[0]
    Co = fw.shape[0]
    return pl.pallas_call(
        partial(_conv_bn_relu_final_kernel, eps=BN_EPS),
        out_shape=jax.ShapeDtypeStruct((Co, M), jnp.float32),
        grid=(1,),
        in_specs=[
            pl.BlockSpec((K, M), lambda i: (0, 0)),
            pl.BlockSpec((Cout, K), lambda i: (0, 0)),
            pl.BlockSpec((Cout, 1), lambda i: (0, 0)),
            pl.BlockSpec((Cout, 1), lambda i: (0, 0)),
            pl.BlockSpec((Cout, 1), lambda i: (0, 0)),
            pl.BlockSpec((Co, Cout), lambda i: (0, 0)),
            pl.BlockSpec((Co, 1), lambda i: (0, 0)),
        ],
        out_specs=pl.BlockSpec((Co, M), lambda i: (0, 0)),
        compiler_params=pltpu.CompilerParams(dimension_semantics=("arbitrary",)),
    )(patches, w, b.reshape(Cout, 1), g.reshape(Cout, 1), bt.reshape(Cout, 1),
      fw, fb.reshape(Co, 1))


def matmul_bias_t(w, x, b):
    """(R, K) @ (K, M) + b, pixels on lanes, tiled/parallel over M."""
    R, K = w.shape
    M = x.shape[1]
    TM = 256 if M % 256 == 0 else (128 if M % 128 == 0 else M)
    return pl.pallas_call(
        _matmul_bias_t_kernel,
        out_shape=jax.ShapeDtypeStruct((R, M), jnp.bfloat16),
        grid=(M // TM,),
        in_specs=[
            pl.BlockSpec((R, K), lambda i: (0, 0)),
            pl.BlockSpec((K, TM), lambda i: (0, i)),
            pl.BlockSpec((R, 1), lambda i: (0, 0)),
        ],
        out_specs=pl.BlockSpec((R, TM), lambda i: (0, i)),
        compiler_params=pltpu.CompilerParams(dimension_semantics=("parallel",)),
    )(w, x, b.reshape(R, 1))


# ----------------------------- JAX glue --------------------------------------
def im2col3x3_cm(x):
    """x: (C, N, H, W) channel-major -> (9*C, N*H*W), rows ordered (kh, kw, cin)
    to match weights stored as transpose(W_pt, (0, 2, 3, 1)).reshape(Cout, 9*Cin)."""
    C, N, H, W = x.shape
    xp = jnp.pad(x, ((0, 0), (0, 0), (1, 1), (1, 1)))
    cols = [xp[:, :, i:i + H, j:j + W] for i in range(3) for j in range(3)]
    return jnp.concatenate(cols, axis=0).reshape(9 * C, N * H * W)


def sinusoidal_emb(t, dim):
    half = dim // 2
    scale = math.log(10000.0) / (half - 1)
    freqs = jnp.exp(jnp.arange(half, dtype=jnp.float32) * -scale)
    args = t.astype(jnp.float32)[:, None] * freqs[None, :]
    return jnp.concatenate([jnp.sin(args), jnp.cos(args)], axis=-1)


def maxpool2_cm(x):  # (C, N, H, W) -> (C, N, H/2, W/2)
    C, N, H, W = x.shape
    return jnp.max(x.reshape(C, N, H // 2, 2, W // 2, 2), axis=(3, 5))


def _pixel_selector(N, HW):
    """(N, N*HW) one-hot: sel[n, p] = 1 iff pixel p belongs to image n."""
    return jnp.repeat(jnp.eye(N, dtype=jnp.float32), HW, axis=1)


def double_conv(p, x, cond_t):
    """relu(BN(conv1(x)) + t_emb) -> relu(BN(conv2(.)))  (time MLP fused in kernel)."""
    Cin, N, H, W = x.shape
    Cout = p["w1"].shape[0]
    sel = _pixel_selector(N, H * W)
    h1 = conv_bn_time_relu(im2col3x3_cm(x), p["w1"], p["b1"], p["g1"], p["be1"],
                           p["time_w"], p["time_b"], cond_t, sel)
    h1 = h1.reshape(Cout, N, H, W)
    h2 = conv_bn_relu(im2col3x3_cm(h1), p["w2"], p["b2"], p["g2"], p["be2"])
    return h2.reshape(Cout, N, H, W)


def double_conv_final(p, x, cond_t, fw, fb):
    """Last decoder DoubleConv with the final 1x1 conv fused into conv2's kernel."""
    Cin, N, H, W = x.shape
    Cout = p["w1"].shape[0]
    sel = _pixel_selector(N, H * W)
    h1 = conv_bn_time_relu(im2col3x3_cm(x), p["w1"], p["b1"], p["g1"], p["be1"],
                           p["time_w"], p["time_b"], cond_t, sel)
    h1 = h1.reshape(Cout, N, H, W)
    out = conv_bn_relu_final(im2col3x3_cm(h1), p["w2"], p["b2"], p["g2"], p["be2"],
                             fw, fb)
    return out.reshape(-1, N, H, W)


def conv_transpose2x2_cm(x, w_t, bias4):
    """nn.ConvTranspose2d(k=2, s=2) in channel-major layout.
    w_t: (4*Cout, Cin) bf16 rows ordered (kh, kw, co); bias4: (4*Cout,) f32."""
    Cin, N, H, W = x.shape
    Cout = w_t.shape[0] // 4
    r = matmul_bias_t(w_t, x.reshape(Cin, N * H * W), bias4)   # (4*Cout, N*H*W)
    r = r.reshape(2, 2, Cout, N, H, W)
    # TODO(synk): write the upsampled layout directly inside the kernel to skip
    # this XLA relayout at production resolutions.
    r = jnp.transpose(r, (2, 3, 4, 0, 5, 1))                   # (Cout, N, H, 2, W, 2)
    return r.reshape(Cout, N, 2 * H, 2 * W)


def unet_forward(params, x_cm, t):
    """x_cm: (Cin, N, H, W) channel-major, t: (N,) float timestep."""
    N = x_cm.shape[1]
    sinemb = sinusoidal_emb(t, TIME_EMB_DIM)                    # (N, Tdim)
    # tiny (N, Tdim) MLP: plain JAX (a Pallas launch is pure overhead here)
    cond = jnp.maximum(sinemb @ params["time_w"] + params["time_b"], 0.0)
    cond_t = cond.T.astype(jnp.float32)                         # (Tdim, N)

    x = x_cm.astype(jnp.bfloat16)
    skips = []
    for enc in params["encoder"]:
        x = double_conv(enc, x, cond_t)
        skips.append(x)
        x = maxpool2_cm(x)
    x = double_conv(params["bottleneck"], x, cond_t)

    skips = skips[::-1]
    n_dec = len(params["decoder"])
    for i, (up, dec) in enumerate(zip(params["ups"], params["decoder"])):
        x = conv_transpose2x2_cm(x, up["w"], up["b4"])
        x = jnp.concatenate([skips[i], x], axis=0)              # torch.cat dim=1
        if i < n_dec - 1:
            x = double_conv(dec, x, cond_t)
        else:
            x = double_conv_final(dec, x, cond_t,
                                  params["final_w"], params["final_b"])
    return x                                                    # (OUT_CHANNELS, N, H, W) f32


def diffusion_forward(params, x0_nchw, y, key):
    """Full DiffusionModel.forward((x_0, y)) -> (predicted_noise, noise)."""
    del y  # conditioning_dim=None -> identity drop_condition, conditioning unused
    N = x0_nchw.shape[0]
    kt, kn = jax.random.split(key)
    t = jax.random.randint(kt, (N,), 1, TIMESTEPS)              # sample_time
    noise = jax.random.normal(kn, x0_nchw.shape, dtype=jnp.float32)

    ab = params["alpha_bars"][t]
    sa = jnp.sqrt(ab).reshape(N, 1, 1, 1)
    sb = jnp.sqrt(1.0 - ab).reshape(N, 1, 1, 1)
    # tiny elementwise corruption: plain JAX (XLA fuses; Pallas adds only launch cost)
    x_t = sa * x0_nchw + sb * noise

    x_cm = jnp.transpose(x_t, (1, 0, 2, 3))                     # NCHW -> (C, N, H, W)
    pred_cm = unet_forward(params, x_cm, t.astype(jnp.float32))
    pred_nchw = jnp.transpose(pred_cm, (1, 0, 2, 3))            # back to NCHW
    return pred_nchw, noise                                     # unscaled noise


# ----------------------------- parameter init --------------------------------
def _init_double_conv(key, cin, cout, tdim):
    ks = jax.random.split(key, 6)
    w1 = jax.random.normal(ks[0], (cout, cin, 3, 3), jnp.float32) / math.sqrt(9 * cin)
    w2 = jax.random.normal(ks[1], (cout, cout, 3, 3), jnp.float32) / math.sqrt(9 * cout)
    return {
        # (Cout, Tdim): torch nn.Linear weight layout, used directly on the MXU
        "time_w": jax.random.normal(ks[2], (cout, tdim), jnp.float32) / math.sqrt(tdim),
        "time_b": 0.01 * jax.random.normal(ks[3], (cout,), jnp.float32),
        # conv weights stored (Cout, 9*Cin) ordered (kh, kw, cin), bf16 for MXU
        "w1": jnp.transpose(w1, (0, 2, 3, 1)).reshape(cout, 9 * cin).astype(jnp.bfloat16),
        "b1": 0.01 * jax.random.normal(ks[4], (cout,), jnp.float32),
        "g1": jnp.ones((cout,), jnp.float32), "be1": jnp.zeros((cout,), jnp.float32),
        "w2": jnp.transpose(w2, (0, 2, 3, 1)).reshape(cout, 9 * cout).astype(jnp.bfloat16),
        "b2": 0.01 * jax.random.normal(ks[5], (cout,), jnp.float32),
        "g2": jnp.ones((cout,), jnp.float32), "be2": jnp.zeros((cout,), jnp.float32),
    }


def init_params(key):
    keys = jax.random.split(key, 16)
    ki = iter(keys)
    params = {
        "time_w": jax.random.normal(next(ki), (TIME_EMB_DIM, TIME_EMB_DIM), jnp.float32)
        / math.sqrt(TIME_EMB_DIM),
        "time_b": 0.01 * jax.random.normal(next(ki), (TIME_EMB_DIM,), jnp.float32),
    }
    encoder, cin = [], IN_CHANNELS
    for f in FEATURES:
        encoder.append(_init_double_conv(next(ki), cin, f, TIME_EMB_DIM))
        cin = f
    params["encoder"] = encoder
    params["bottleneck"] = _init_double_conv(next(ki), FEATURES[-1], FEATURES[-1] * 2,
                                             TIME_EMB_DIM)

    ups, decoder = [], []
    for f in reversed(FEATURES):
        ku = next(ki)
        w_pt = jax.random.normal(ku, (f * 2, f, 2, 2), jnp.float32) / math.sqrt(4 * f * 2)
        b = 0.01 * jax.random.normal(next(ki), (f,), jnp.float32)
        ups.append({
            # rows ordered (kh, kw, co): transpose(W_pt,(2,3,1,0)).reshape(4*Cout, Cin)
            "w": jnp.transpose(w_pt, (2, 3, 1, 0)).reshape(4 * f, 2 * f).astype(jnp.bfloat16),
            "b4": jnp.tile(b, 4),
        })
        decoder.append(_init_double_conv(next(ki), f * 2, f, TIME_EMB_DIM))
    params["ups"] = ups
    params["decoder"] = decoder

    params["final_w"] = jax.random.normal(next(ki), (OUT_CHANNELS, FEATURES[0]),
                                          jnp.float32) / math.sqrt(FEATURES[0])
    params["final_b"] = 0.01 * jax.random.normal(next(ki), (OUT_CHANNELS,), jnp.float32)

    betas = jnp.linspace(BETA_START, BETA_END, TIMESTEPS)
    params["alpha_bars"] = jnp.cumprod(1.0 - betas)
    return params


# ----------------------------- main -------------------------------------------
if __name__ == "__main__":
    key = jax.random.PRNGKey(0)
    kp, kx, kf = jax.random.split(key, 3)
    params = init_params(kp)

    batch, H, W = 2, 16, 16
    x0 = jax.random.normal(kx, (batch, IN_CHANNELS, H, W), jnp.float32)   # clean image, NCHW
    y = jnp.zeros((batch, 1), jnp.float32)                                # unused conditioning

    fwd = jax.jit(diffusion_forward)
    pred_noise, target_noise = fwd(params, x0, y, kf)
    jax.block_until_ready((pred_noise, target_noise))

    assert pred_noise.shape == (batch, OUT_CHANNELS, H, W)
    assert target_noise.shape == x0.shape
    assert jnp.all(jnp.isfinite(pred_noise)) and jnp.all(jnp.isfinite(target_noise))
    print("KERNEL_OK")
</pallas_src>

<mosaic_0001>
module attributes {stable_mosaic.version = 11 : i64} {
  func.func @_conv_bn_time_relu_kernel(%arg0: i32, %arg1: memref<27x512xbf16, #tpu.memory_space<vmem>>, %arg2: memref<8x27xbf16, #tpu.memory_space<vmem>>, %arg3: memref<8x1xf32, #tpu.memory_space<vmem>>, %arg4: memref<8x1xf32, #tpu.memory_space<vmem>>, %arg5: memref<8x1xf32, #tpu.memory_space<vmem>>, %arg6: memref<8x32xf32, #tpu.memory_space<vmem>>, %arg7: memref<8x1xf32, #tpu.memory_space<vmem>>, %arg8: memref<32x2xf32, #tpu.memory_space<vmem>>, %arg9: memref<2x512xf32, #tpu.memory_space<vmem>>, %arg10: memref<8x512xbf16, #tpu.memory_space<vmem>>) attributes {dimension_semantics = [#tpu.dimension_semantics<arbitrary>], iteration_bounds = array<i64: 1>, scalar_prefetch = 0 : i64, scratch_operands = 0 : i64, tpu.core_type = #tpu.core_type<tc>, window_params = [{pipeline_mode = #tpu.pipeline_mode<synchronous>, transform_indices = @transform_0, window_bounds = array<i64: 27, 512>}, {pipeline_mode = #tpu.pipeline_mode<synchronous>, transform_indices = @transform_1, window_bounds = array<i64: 8, 27>}, {pipeline_mode = #tpu.pipeline_mode<synchronous>, transform_indices = @transform_2, window_bounds = array<i64: 8, 1>}, {pipeline_mode = #tpu.pipeline_mode<synchronous>, transform_indices = @transform_3, window_bounds = array<i64: 8, 1>}, {pipeline_mode = #tpu.pipeline_mode<synchronous>, transform_indices = @transform_4, window_bounds = array<i64: 8, 1>}, {pipeline_mode = #tpu.pipeline_mode<synchronous>, transform_indices = @transform_5, window_bounds = array<i64: 8, 32>}, {pipeline_mode = #tpu.pipeline_mode<synchronous>, transform_indices = @transform_6, window_bounds = array<i64: 8, 1>}, {pipeline_mode = #tpu.pipeline_mode<synchronous>, transform_indices = @transform_7, window_bounds = array<i64: 32, 2>}, {pipeline_mode = #tpu.pipeline_mode<synchronous>, transform_indices = @transform_8, window_bounds = array<i64: 2, 512>}, {pipeline_mode = #tpu.pipeline_mode<synchronous>, transform_indices = @transform_9, window_bounds = array<i64: 8, 512>}]} {
    %c0 = arith.constant 0 : index
    %c0_0 = arith.constant 0 : index
    %0 = vector.load %arg2[%c0, %c0_0] : memref<8x27xbf16, #tpu.memory_space<vmem>>, vector<8x27xbf16>
    %c0_1 = arith.constant 0 : index
    %c0_2 = arith.constant 0 : index
    %1 = vector.load %arg1[%c0_1, %c0_2] : memref<27x512xbf16, #tpu.memory_space<vmem>>, vector<27x512xbf16>
    %cst = arith.constant dense<0.000000e+00> : vector<8x512xf32>
    %2 = tpu.matmul %0, %1, %cst {dimension_numbers = #tpu.dot_dimension_numbers<[1], [0], [0], [1], [0, 0, 1, 1], [], []>} : vector<8x27xbf16>, vector<27x512xbf16>, vector<8x512xf32> -> vector<8x512xf32>
    %c0_3 = arith.constant 0 : index
    %c0_4 = arith.constant 0 : index
    %3 = vector.load %arg3[%c0_3, %c0_4] : memref<8x1xf32, #tpu.memory_space<vmem>>, vector<8x1xf32>
    %4 = vector.broadcast %3 : vector<8x1xf32> to vector<8x512xf32>
    %5 = arith.addf %2, %4 : vector<8x512xf32>
    %c0_5 = arith.constant 0 : index
    %c0_6 = arith.constant 0 : index
    %6 = vector.load %arg6[%c0_5, %c0_6] : memref<8x32xf32, #tpu.memory_space<vmem>>, vector<8x32xf32>
    %c0_7 = arith.constant 0 : index
    %c0_8 = arith.constant 0 : index
    %7 = vector.load %arg8[%c0_7, %c0_8] : memref<32x2xf32, #tpu.memory_space<vmem>>, vector<32x2xf32>
    %cst_9 = arith.constant dense<0.000000e+00> : vector<8x2xf32>
    %8 = tpu.matmul %6, %7, %cst_9 {dimension_numbers = #tpu.dot_dimension_numbers<[1], [0], [0], [1], [0, 0, 1, 1], [], []>} : vector<8x32xf32>, vector<32x2xf32>, vector<8x2xf32> -> vector<8x2xf32>
    %c0_10 = arith.constant 0 : index
    %c0_11 = arith.constant 0 : index
    %9 = vector.load %arg7[%c0_10, %c0_11] : memref<8x1xf32, #tpu.memory_space<vmem>>, vector<8x1xf32>
    %10 = vector.broadcast %9 : vector<8x1xf32> to vector<8x2xf32>
    %11 = arith.addf %8, %10 : vector<8x2xf32>
    %c0_12 = arith.constant 0 : index
    %c0_13 = arith.constant 0 : index
    %12 = vector.load %arg9[%c0_12, %c0_13] : memref<2x512xf32, #tpu.memory_space<vmem>>, vector<2x512xf32>
    %cst_14 = arith.constant dense<0.000000e+00> : vector<8x512xf32>
    %13 = tpu.matmul %11, %12, %cst_14 {dimension_numbers = #tpu.dot_dimension_numbers<[1], [0], [0], [1], [0, 0, 1, 1], [], []>} : vector<8x2xf32>, vector<2x512xf32>, vector<8x512xf32> -> vector<8x512xf32>
    %c0_15 = arith.constant 0 : index
    %c0_16 = arith.constant 0 : index
    %14 = vector.load %arg4[%c0_15, %c0_16] : memref<8x1xf32, #tpu.memory_space<vmem>>, vector<8x1xf32>
    %c0_17 = arith.constant 0 : index
    %c0_18 = arith.constant 0 : index
    %15 = vector.load %arg5[%c0_17, %c0_18] : memref<8x1xf32, #tpu.memory_space<vmem>>, vector<8x1xf32>
    %cst_19 = arith.constant dense<0.000000e+00> : vector<8xf32>
    %16 = vector.multi_reduction <add>, %5, %cst_19 [1] : vector<8x512xf32> to vector<8xf32>
    %17 = vector.shape_cast %16 : vector<8xf32> to vector<8x1xf32>
    %cst_20 = arith.constant 0.001953125 : f32
    %18 = vector.broadcast %cst_20 : f32 to vector<8x1xf32>
    %19 = arith.mulf %17, %18 : vector<8x1xf32>
    %20 = arith.mulf %5, %5 : vector<8x512xf32>
    %cst_21 = arith.constant dense<0.000000e+00> : vector<8xf32>
    %21 = vector.multi_reduction <add>, %20, %cst_21 [1] : vector<8x512xf32> to vector<8xf32>
    %22 = vector.shape_cast %21 : vector<8xf32> to vector<8x1xf32>
    %cst_22 = arith.constant 0.001953125 : f32
    %23 = vector.broadcast %cst_22 : f32 to vector<8x1xf32>
    %24 = arith.mulf %22, %23 : vector<8x1xf32>
    %25 = arith.mulf %19, %19 : vector<8x1xf32>
    %26 = arith.subf %24, %25 : vector<8x1xf32>
    %27 = vector.broadcast %19 : vector<8x1xf32> to vector<8x512xf32>
    %28 = arith.subf %5, %27 : vector<8x512xf32>
    %cst_23 = arith.constant 9.99999974E-6 : f32
    %29 = vector.broadcast %cst_23 : f32 to vector<8x1xf32>
    %30 = arith.addf %26, %29 : vector<8x1xf32>
    %31 = math.rsqrt %30 : vector<8x1xf32>
    %32 = vector.broadcast %31 : vector<8x1xf32> to vector<8x512xf32>
    %33 = arith.mulf %28, %32 : vector<8x512xf32>
    %34 = vector.broadcast %14 : vector<8x1xf32> to vector<8x512xf32>
    %35 = arith.mulf %33, %34 : vector<8x512xf32>
    %36 = vector.broadcast %15 : vector<8x1xf32> to vector<8x512xf32>
    %37 = arith.addf %35, %36 : vector<8x512xf32>
    %38 = arith.addf %37, %13 : vector<8x512xf32>
    %cst_24 = arith.constant 0.000000e+00 : f32
    %39 = vector.broadcast %cst_24 : f32 to vector<8x512xf32>
    %40 = arith.maximumf %38, %39 : vector<8x512xf32>
    %41 = arith.truncf %40 : vector<8x512xf32> to vector<8x512xbf16>
    %c0_25 = arith.constant 0 : index
    %c0_26 = arith.constant 0 : index
    %42 = vector.load %arg10[%c0_25, %c0_26] : memref<8x512xbf16, #tpu.memory_space<vmem>>, vector<8x512xbf16>
    tpu.vector_store %arg10[%c0_25, %c0_26], %41 {strides = array<i32>} : memref<8x512xbf16, #tpu.memory_space<vmem>>, vector<8x512xbf16>,
    return
  }
  func.func @transform_0(%arg0: i32) -> (i32, i32) {
    %c0_i32 = arith.constant 0 : i32
    %c0_i32_0 = arith.constant 0 : i32
    %c0_i32_1 = arith.constant 0 : i32
    return %c0_i32, %c0_i32_0 : i32, i32
  }
  func.func @transform_1(%arg0: i32) -> (i32, i32) {
    %c0_i32 = arith.constant 0 : i32
    %c0_i32_0 = arith.constant 0 : i32
    %c0_i32_1 = arith.constant 0 : i32
    return %c0_i32, %c0_i32_0 : i32, i32
  }
  func.func @transform_2(%arg0: i32) -> (i32, i32) {
    %c0_i32 = arith.constant 0 : i32
    %c0_i32_0 = arith.constant 0 : i32
    %c0_i32_1 = arith.constant 0 : i32
    return %c0_i32, %c0_i32_0 : i32, i32
  }
  func.func @transform_3(%arg0: i32) -> (i32, i32) {
    %c0_i32 = arith.constant 0 : i32
    %c0_i32_0 = arith.constant 0 : i32
    %c0_i32_1 = arith.constant 0 : i32
    return %c0_i32, %c0_i32_0 : i32, i32
  }
  func.func @transform_4(%arg0: i32) -> (i32, i32) {
    %c0_i32 = arith.constant 0 : i32
    %c0_i32_0 = arith.constant 0 : i32
    %c0_i32_1 = arith.constant 0 : i32
    return %c0_i32, %c0_i32_0 : i32, i32
  }
  func.func @transform_5(%arg0: i32) -> (i32, i32) {
    %c0_i32 = arith.constant 0 : i32
    %c0_i32_0 = arith.constant 0 : i32
    %c0_i32_1 = arith.constant 0 : i32
    return %c0_i32, %c0_i32_0 : i32, i32
  }
  func.func @transform_6(%arg0: i32) -> (i32, i32) {
    %c0_i32 = arith.constant 0 : i32
    %c0_i32_0 = arith.constant 0 : i32
    %c0_i32_1 = arith.constant 0 : i32
    return %c0_i32, %c0_i32_0 : i32, i32
  }
  func.func @transform_7(%arg0: i32) -> (i32, i32) {
    %c0_i32 = arith.constant 0 : i32
    %c0_i32_0 = arith.constant 0 : i32
    %c0_i32_1 = arith.constant 0 : i32
    return %c0_i32, %c0_i32_0 : i32, i32
  }
  func.func @transform_8(%arg0: i32) -> (i32, i32) {
    %c0_i32 = arith.constant 0 : i32
    %c0_i32_0 = arith.constant 0 : i32
    %c0_i32_1 = arith.constant 0 : i32
    return %c0_i32, %c0_i32_0 : i32, i32
  }
  func.func @transform_9(%arg0: i32) -> (i32, i32) {
    %c0_i32 = arith.constant 0 : i32
    %c0_i32_0 = arith.constant 0 : i32
    %c0_i32_1 = arith.constant 0 : i32
    return %c0_i32, %c0_i32_0 : i32, i32
  }
}

module attributes {stable_mosaic.version = 11 : i64} {
  func.func @_conv_bn_relu_kernel(%arg0: i32, %arg1: memref<72x512xbf16, #tpu.memory_space<vmem>>, %arg2: memref<8x72xbf16, #tpu.memory_space<vmem>>, %arg3: memref<8x1xf32, #tpu.memory_space<vmem>>, %arg4: memref<8x1xf32, #tpu.memory_space<vmem>>, %arg5: memref<8x1xf32, #tpu.memory_space<vmem>>, %arg6: memref<8x512xbf16, #tpu.memory_space<vmem>>) attributes {dimension_semantics = [#tpu.dimension_semantics<arbitrary>], iteration_bounds = array<i64: 1>, scalar_prefetch = 0 : i64, scratch_operands = 0 : i64, tpu.core_type = #tpu.core_type<tc>, window_params = [{pipeline_mode = #tpu.pipeline_mode<synchronous>, transform_indices = @transform_0, window_bounds = array<i64: 72, 512>}, {pipeline_mode = #tpu.pipeline_mode<synchronous>, transform_indices = @transform_1, window_bounds = array<i64: 8, 72>}, {pipeline_mode = #tpu.pipeline_mode<synchronous>, transform_indices = @transform_2, window_bounds = array<i64: 8, 1>}, {pipeline_mode = #tpu.pipeline_mode<synchronous>, transform_indices = @transform_3, window_bounds = array<i64: 8, 1>}, {pipeline_mode = #tpu.pipeline_mode<synchronous>, transform_indices = @transform_4, window_bounds = array<i64: 8, 1>}, {pipeline_mode = #tpu.pipeline_mode<synchronous>, transform_indices = @transform_5, window_bounds = array<i64: 8, 512>}]} {
    %c0 = arith.constant 0 : index
    %c0_0 = arith.constant 0 : index
    %0 = vector.load %arg2[%c0, %c0_0] : memref<8x72xbf16, #tpu.memory_space<vmem>>, vector<8x72xbf16>
    %c0_1 = arith.constant 0 : index
    %c0_2 = arith.constant 0 : index
    %1 = vector.load %arg1[%c0_1, %c0_2] : memref<72x512xbf16, #tpu.memory_space<vmem>>, vector<72x512xbf16>
    %cst = arith.constant dense<0.000000e+00> : vector<8x512xf32>
    %2 = tpu.matmul %0, %1, %cst {dimension_numbers = #tpu.dot_dimension_numbers<[1], [0], [0], [1], [0, 0, 1, 1], [], []>} : vector<8x72xbf16>, vector<72x512xbf16>, vector<8x512xf32> -> vector<8x512xf32>
    %c0_3 = arith.constant 0 : index
    %c0_4 = arith.constant 0 : index
    %3 = vector.load %arg3[%c0_3, %c0_4] : memref<8x1xf32, #tpu.memory_space<vmem>>, vector<8x1xf32>
    %4 = vector.broadcast %3 : vector<8x1xf32> to vector<8x512xf32>
    %5 = arith.addf %2, %4 : vector<8x512xf32>
    %c0_5 = arith.constant 0 : index
    %c0_6 = arith.constant 0 : index
    %6 = vector.load %arg4[%c0_5, %c0_6] : memref<8x1xf32, #tpu.memory_space<vmem>>, vector<8x1xf32>
    %c0_7 = arith.constant 0 : index
    %c0_8 = arith.constant 0 : index
    %7 = vector.load %arg5[%c0_7, %c0_8] : memref<8x1xf32, #tpu.memory_space<vmem>>, vector<8x1xf32>
    %cst_9 = arith.constant dense<0.000000e+00> : vector<8xf32>
    %8 = vector.multi_reduction <add>, %5, %cst_9 [1] : vector<8x512xf32> to vector<8xf32>
    %9 = vector.shape_cast %8 : vector<8xf32> to vector<8x1xf32>
    %cst_10 = arith.constant 0.001953125 : f32
    %10 = vector.broadcast %cst_10 : f32 to vector<8x1xf32>
    %11 = arith.mulf %9, %10 : vector<8x1xf32>
    %12 = arith.mulf %5, %5 : vector<8x512xf32>
    %cst_11 = arith.constant dense<0.000000e+00> : vector<8xf32>
    %13 = vector.multi_reduction <add>, %12, %cst_11 [1] : vector<8x512xf32> to vector<8xf32>
    %14 = vector.shape_cast %13 : vector<8xf32> to vector<8x1xf32>
    %cst_12 = arith.constant 0.001953125 : f32
    %15 = vector.broadcast %cst_12 : f32 to vector<8x1xf32>
    %16 = arith.mulf %14, %15 : vector<8x1xf32>
    %17 = arith.mulf %11, %11 : vector<8x1xf32>
    %18 = arith.subf %16, %17 : vector<8x1xf32>
    %19 = vector.broadcast %11 : vector<8x1xf32> to vector<8x512xf32>
    %20 = arith.subf %5, %19 : vector<8x512xf32>
    %cst_13 = arith.constant 9.99999974E-6 : f32
    %21 = vector.broadcast %cst_13 : f32 to vector<8x1xf32>
    %22 = arith.addf %18, %21 : vector<8x1xf32>
    %23 = math.rsqrt %22 : vector<8x1xf32>
    %24 = vector.broadcast %23 : vector<8x1xf32> to vector<8x512xf32>
    %25 = arith.mulf %20, %24 : vector<8x512xf32>
    %26 = vector.broadcast %6 : vector<8x1xf32> to vector<8x512xf32>
    %27 = arith.mulf %25, %26 : vector<8x512xf32>
    %28 = vector.broadcast %7 : vector<8x1xf32> to vector<8x512xf32>
    %29 = arith.addf %27, %28 : vector<8x512xf32>
    %cst_14 = arith.constant 0.000000e+00 : f32
    %30 = vector.broadcast %cst_14 : f32 to vector<8x512xf32>
    %31 = arith.maximumf %29, %30 : vector<8x512xf32>
    %32 = arith.truncf %31 : vector<8x512xf32> to vector<8x512xbf16>
    %c0_15 = arith.constant 0 : index
    %c0_16 = arith.constant 0 : index
    %33 = vector.load %arg6[%c0_15, %c0_16] : memref<8x512xbf16, #tpu.memory_space<vmem>>, vector<8x512xbf16>
    tpu.vector_store %arg6[%c0_15, %c0_16], %32 {strides = array<i32>} : memref<8x512xbf16, #tpu.memory_space<vmem>>, vector<8x512xbf16>,
    return
  }
  func.func @transform_0(%arg0: i32) -> (i32, i32) {
    %c0_i32 = arith.constant 0 : i32
    %c0_i32_0 = arith.constant 0 : i32
    %c0_i32_1 = arith.constant 0 : i32
    return %c0_i32, %c0_i32_0 : i32, i32
  }
  func.func @transform_1(%arg0: i32) -> (i32, i32) {
    %c0_i32 = arith.constant 0 : i32
    %c0_i32_0 = arith.constant 0 : i32
    %c0_i32_1 = arith.constant 0 : i32
    return %c0_i32, %c0_i32_0 : i32, i32
  }
  func.func @transform_2(%arg0: i32) -> (i32, i32) {
    %c0_i32 = arith.constant 0 : i32
    %c0_i32_0 = arith.constant 0 : i32
    %c0_i32_1 = arith.constant 0 : i32
    return %c0_i32, %c0_i32_0 : i32, i32
  }
  func.func @transform_3(%arg0: i32) -> (i32, i32) {
    %c0_i32 = arith.constant 0 : i32
    %c0_i32_0 = arith.constant 0 : i32
    %c0_i32_1 = arith.constant 0 : i32
    return %c0_i32, %c0_i32_0 : i32, i32
  }
  func.func @transform_4(%arg0: i32) -> (i32, i32) {
    %c0_i32 = arith.constant 0 : i32
    %c0_i32_0 = arith.constant 0 : i32
    %c0_i32_1 = arith.constant 0 : i32
    return %c0_i32, %c0_i32_0 : i32, i32
  }
  func.func @transform_5(%arg0: i32) -> (i32, i32) {
    %c0_i32 = arith.constant 0 : i32
    %c0_i32_0 = arith.constant 0 : i32
    %c0_i32_1 = arith.constant 0 : i32
    return %c0_i32, %c0_i32_0 : i32, i32
  }
}

module attributes {stable_mosaic.version = 11 : i64} {
  func.func @_conv_bn_time_relu_kernel(%arg0: i32, %arg1: memref<72x128xbf16, #tpu.memory_space<vmem>>, %arg2: memref<16x72xbf16, #tpu.memory_space<vmem>>, %arg3: memref<16x1xf32, #tpu.memory_space<vmem>>, %arg4: memref<16x1xf32, #tpu.memory_space<vmem>>, %arg5: memref<16x1xf32, #tpu.memory_space<vmem>>, %arg6: memref<16x32xf32, #tpu.memory_space<vmem>>, %arg7: memref<16x1xf32, #tpu.memory_space<vmem>>, %arg8: memref<32x2xf32, #tpu.memory_space<vmem>>, %arg9: memref<2x128xf32, #tpu.memory_space<vmem>>, %arg10: memref<16x128xbf16, #tpu.memory_space<vmem>>) attributes {dimension_semantics = [#tpu.dimension_semantics<arbitrary>], iteration_bounds = array<i64: 1>, scalar_prefetch = 0 : i64, scratch_operands = 0 : i64, tpu.core_type = #tpu.core_type<tc>, window_params = [{pipeline_mode = #tpu.pipeline_mode<synchronous>, transform_indices = @transform_0, window_bounds = array<i64: 72, 128>}, {pipeline_mode = #tpu.pipeline_mode<synchronous>, transform_indices = @transform_1, window_bounds = array<i64: 16, 72>}, {pipeline_mode = #tpu.pipeline_mode<synchronous>, transform_indices = @transform_2, window_bounds = array<i64: 16, 1>}, {pipeline_mode = #tpu.pipeline_mode<synchronous>, transform_indices = @transform_3, window_bounds = array<i64: 16, 1>}, {pipeline_mode = #tpu.pipeline_mode<synchronous>, transform_indices = @transform_4, window_bounds = array<i64: 16, 1>}, {pipeline_mode = #tpu.pipeline_mode<synchronous>, transform_indices = @transform_5, window_bounds = array<i64: 16, 32>}, {pipeline_mode = #tpu.pipeline_mode<synchronous>, transform_indices = @transform_6, window_bounds = array<i64: 16, 1>}, {pipeline_mode = #tpu.pipeline_mode<synchronous>, transform_indices = @transform_7, window_bounds = array<i64: 32, 2>}, {pipeline_mode = #tpu.pipeline_mode<synchronous>, transform_indices = @transform_8, window_bounds = array<i64: 2, 128>}, {pipeline_mode = #tpu.pipeline_mode<synchronous>, transform_indices = @transform_9, window_bounds = array<i64: 16, 128>}]} {
    %c0 = arith.constant 0 : index
    %c0_0 = arith.constant 0 : index
    %0 = vector.load %arg2[%c0, %c0_0] : memref<16x72xbf16, #tpu.memory_space<vmem>>, vector<16x72xbf16>
    %c0_1 = arith.constant 0 : index
    %c0_2 = arith.constant 0 : index
    %1 = vector.load %arg1[%c0_1, %c0_2] : memref<72x128xbf16, #tpu.memory_space<vmem>>, vector<72x128xbf16>
    %cst = arith.constant dense<0.000000e+00> : vector<16x128xf32>
    %2 = tpu.matmul %0, %1, %cst {dimension_numbers = #tpu.dot_dimension_numbers<[1], [0], [0], [1], [0, 0, 1, 1], [], []>} : vector<16x72xbf16>, vector<72x128xbf16>, vector<16x128xf32> -> vector<16x128xf32>
    %c0_3 = arith.constant 0 : index
    %c0_4 = arith.constant 0 : index
    %3 = vector.load %arg3[%c0_3, %c0_4] : memref<16x1xf32, #tpu.memory_space<vmem>>, vector<16x1xf32>
    %4 = vector.broadcast %3 : vector<16x1xf32> to vector<16x128xf32>
    %5 = arith.addf %2, %4 : vector<16x128xf32>
    %c0_5 = arith.constant 0 : index
    %c0_6 = arith.constant 0 : index
    %6 = vector.load %arg6[%c0_5, %c0_6] : memref<16x32xf32, #tpu.memory_space<vmem>>, vector<16x32xf32>
    %c0_7 = arith.constant 0 : index
    %c0_8 = arith.constant 0 : index
    %7 = vector.load %arg8[%c0_7, %c0_8] : memref<32x2xf32, #tpu.memory_space<vmem>>, vector<32x2xf32>
    %cst_9 = arith.constant dense<0.000000e+00> : vector<16x2xf32>
    %8 = tpu.matmul %6, %7, %cst_9 {dimension_numbers = #tpu.dot_dimension_numbers<[1], [0], [0], [1], [0, 0, 1, 1], [], []>} : vector<16x32xf32>, vector<32x2xf32>, vector<16x2xf32> -> vector<16x2xf32>
    %c0_10 = arith.constant 0 : index
    %c0_11 = arith.constant 0 : index
    %9 = vector.load %arg7[%c0_10, %c0_11] : memref<16x1xf32, #tpu.memory_space<vmem>>, vector<16x1xf32>
    %10 = vector.broadcast %9 : vector<16x1xf32> to vector<16x2xf32>
    %11 = arith.addf %8, %10 : vector<16x2xf32>
    %c0_12 = arith.constant 0 : index
    %c0_13 = arith.constant 0 : index
    %12 = vector.load %arg9[%c0_12, %c0_13] : memref<2x128xf32, #tpu.memory_space<vmem>>, vector<2x128xf32>
    %cst_14 = arith.constant dense<0.000000e+00> : vector<16x128xf32>
    %13 = tpu.matmul %11, %12, %cst_14 {dimension_numbers = #tpu.dot_dimension_numbers<[1], [0], [0], [1], [0, 0, 1, 1], [], []>} : vector<16x2xf32>, vector<2x128xf32>, vector<16x128xf32> -> vector<16x128xf32>
    %c0_15 = arith.constant 0 : index
    %c0_16 = arith.constant 0 : index
    %14 = vector.load %arg4[%c0_15, %c0_16] : memref<16x1xf32, #tpu.memory_space<vmem>>, vector<16x1xf32>
    %c0_17 = arith.constant 0 : index
    %c0_18 = arith.constant 0 : index
    %15 = vector.load %arg5[%c0_17, %c0_18] : memref<16x1xf32, #tpu.memory_space<vmem>>, vector<16x1xf32>
    %cst_19 = arith.constant dense<0.000000e+00> : vector<16xf32>
    %16 = vector.multi_reduction <add>, %5, %cst_19 [1] : vector<16x128xf32> to vector<16xf32>
    %17 = vector.shape_cast %16 : vector<16xf32> to vector<16x1xf32>
    %cst_20 = arith.constant 7.812500e-03 : f32
    %18 = vector.broadcast %cst_20 : f32 to vector<16x1xf32>
    %19 = arith.mulf %17, %18 : vector<16x1xf32>
    %20 = arith.mulf %5, %5 : vector<16x128xf32>
    %cst_21 = arith.constant dense<0.000000e+00> : vector<16xf32>
    %21 = vector.multi_reduction <add>, %20, %cst_21 [1] : vector<16x128xf32> to vector<16xf32>
    %22 = vector.shape_cast %21 : vector<16xf32> to vector<16x1xf32>
    %cst_22 = arith.constant 7.812500e-03 : f32
    %23 = vector.broadcast %cst_22 : f32 to vector<16x1xf32>
    %24 = arith.mulf %22, %23 : vector<16x1xf32>
    %25 = arith.mulf %19, %19 : vector<16x1xf32>
    %26 = arith.subf %24, %25 : vector<16x1xf32>
    %27 = vector.broadcast %19 : vector<16x1xf32> to vector<16x128xf32>
    %28 = arith.subf %5, %27 : vector<16x128xf32>
    %cst_23 = arith.constant 9.99999974E-6 : f32
    %29 = vector.broadcast %cst_23 : f32 to vector<16x1xf32>
    %30 = arith.addf %26, %29 : vector<16x1xf32>
    %31 = math.rsqrt %30 : vector<16x1xf32>
    %32 = vector.broadcast %31 : vector<16x1xf32> to vector<16x128xf32>
    %33 = arith.mulf %28, %32 : vector<16x128xf32>
    %34 = vector.broadcast %14 : vector<16x1xf32> to vector<16x128xf32>
    %35 = arith.mulf %33, %34 : vector<16x128xf32>
    %36 = vector.broadcast %15 : vector<16x1xf32> to vector<16x128xf32>
    %37 = arith.addf %35, %36 : vector<16x128xf32>
    %38 = arith.addf %37, %13 : vector<16x128xf32>
    %cst_24 = arith.constant 0.000000e+00 : f32
    %39 = vector.broadcast %cst_24 : f32 to vector<16x128xf32>
    %40 = arith.maximumf %38, %39 : vector<16x128xf32>
    %41 = arith.truncf %40 : vector<16x128xf32> to vector<16x128xbf16>
    %c0_25 = arith.constant 0 : index
    %c0_26 = arith.constant 0 : index
    %42 = vector.load %arg10[%c0_25, %c0_26] : memref<16x128xbf16, #tpu.memory_space<vmem>>, vector<16x128xbf16>
    tpu.vector_store %arg10[%c0_25, %c0_26], %41 {strides = array<i32>} : memref<16x128xbf16, #tpu.memory_space<vmem>>, vector<16x128xbf16>,
    return
  }
  func.func @transform_0(%arg0: i32) -> (i32, i32) {
    %c0_i32 = arith.constant 0 : i32
    %c0_i32_0 = arith.constant 0 : i32
    %c0_i32_1 = arith.constant 0 : i32
    return %c0_i32, %c0_i32_0 : i32, i32
  }
  func.func @transform_1(%arg0: i32) -> (i32, i32) {
    %c0_i32 = arith.constant 0 : i32
    %c0_i32_0 = arith.constant 0 : i32
    %c0_i32_1 = arith.constant 0 : i32
    return %c0_i32, %c0_i32_0 : i32, i32
  }
  func.func @transform_2(%arg0: i32) -> (i32, i32) {
    %c0_i32 = arith.constant 0 : i32
    %c0_i32_0 = arith.constant 0 : i32
    %c0_i32_1 = arith.constant 0 : i32
    return %c0_i32, %c0_i32_0 : i32, i32
  }
  func.func @transform_3(%arg0: i32) -> (i32, i32) {
    %c0_i32 = arith.constant 0 : i32
    %c0_i32_0 = arith.constant 0 : i32
    %c0_i32_1 = arith.constant 0 : i32
    return %c0_i32, %c0_i32_0 : i32, i32
  }
  func.func @transform_4(%arg0: i32) -> (i32, i32) {
    %c0_i32 = arith.constant 0 : i32
    %c0_i32_0 = arith.constant 0 : i32
    %c0_i32_1 = arith.constant 0 : i32
    return %c0_i32, %c0_i32_0 : i32, i32
  }
  func.func @transform_5(%arg0: i32) -> (i32, i32) {
    %c0_i32 = arith.constant 0 : i32
    %c0_i32_0 = arith.constant 0 : i32
    %c0_i32_1 = arith.constant 0 : i32
    return %c0_i32, %c0_i32_0 : i32, i32
  }
  func.func @transform_6(%arg0: i32) -> (i32, i32) {
    %c0_i32 = arith.constant 0 : i32
    %c0_i32_0 = arith.constant 0 : i32
    %c0_i32_1 = arith.constant 0 : i32
    return %c0_i32, %c0_i32_0 : i32, i32
  }
  func.func @transform_7(%arg0: i32) -> (i32, i32) {
    %c0_i32 = arith.constant 0 : i32
    %c0_i32_0 = arith.constant 0 : i32
    %c0_i32_1 = arith.constant 0 : i32
    return %c0_i32, %c0_i32_0 : i32, i32
  }
  func.func @transform_8(%arg0: i32) -> (i32, i32) {
    %c0_i32 = arith.constant 0 : i32
    %c0_i32_0 = arith.constant 0 : i32
    %c0_i32_1 = arith.constant 0 : i32
    return %c0_i32, %c0_i32_0 : i32, i32
  }
  func.func @transform_9(%arg0: i32) -> (i32, i32) {
    %c0_i32 = arith.constant 0 : i32
    %c0_i32_0 = arith.constant 0 : i32
    %c0_i32_1 = arith.constant 0 : i32
    return %c0_i32, %c0_i32_0 : i32, i32
  }
}

module attributes {stable_mosaic.version = 11 : i64} {
  func.func @_conv_bn_relu_kernel(%arg0: i32, %arg1: memref<144x128xbf16, #tpu.memory_space<vmem>>, %arg2: memref<16x144xbf16, #tpu.memory_space<vmem>>, %arg3: memref<16x1xf32, #tpu.memory_space<vmem>>, %arg4: memref<16x1xf32, #tpu.memory_space<vmem>>, %arg5: memref<16x1xf32, #tpu.memory_space<vmem>>, %arg6: memref<16x128xbf16, #tpu.memory_space<vmem>>) attributes {dimension_semantics = [#tpu.dimension_semantics<arbitrary>], iteration_bounds = array<i64: 1>, scalar_prefetch = 0 : i64, scratch_operands = 0 : i64, tpu.core_type = #tpu.core_type<tc>, window_params = [{pipeline_mode = #tpu.pipeline_mode<synchronous>, transform_indices = @transform_0, window_bounds = array<i64: 144, 128>}, {pipeline_mode = #tpu.pipeline_mode<synchronous>, transform_indices = @transform_1, window_bounds = array<i64: 16, 144>}, {pipeline_mode = #tpu.pipeline_mode<synchronous>, transform_indices = @transform_2, window_bounds = array<i64: 16, 1>}, {pipeline_mode = #tpu.pipeline_mode<synchronous>, transform_indices = @transform_3, window_bounds = array<i64: 16, 1>}, {pipeline_mode = #tpu.pipeline_mode<synchronous>, transform_indices = @transform_4, window_bounds = array<i64: 16, 1>}, {pipeline_mode = #tpu.pipeline_mode<synchronous>, transform_indices = @transform_5, window_bounds = array<i64: 16, 128>}]} {
    %c0 = arith.constant 0 : index
    %c0_0 = arith.constant 0 : index
    %0 = vector.load %arg2[%c0, %c0_0] : memref<16x144xbf16, #tpu.memory_space<vmem>>, vector<16x144xbf16>
    %c0_1 = arith.constant 0 : index
    %c0_2 = arith.constant 0 : index
    %1 = vector.load %arg1[%c0_1, %c0_2] : memref<144x128xbf16, #tpu.memory_space<vmem>>, vector<144x128xbf16>
    %cst = arith.constant dense<0.000000e+00> : vector<16x128xf32>
    %2 = tpu.matmul %0, %1, %cst {dimension_numbers = #tpu.dot_dimension_numbers<[1], [0], [0], [1], [0, 0, 1, 1], [], []>} : vector<16x144xbf16>, vector<144x128xbf16>, vector<16x128xf32> -> vector<16x128xf32>
    %c0_3 = arith.constant 0 : index
    %c0_4 = arith.constant 0 : index
    %3 = vector.load %arg3[%c0_3, %c0_4] : memref<16x1xf32, #tpu.memory_space<vmem>>, vector<16x1xf32>
    %4 = vector.broadcast %3 : vector<16x1xf32> to vector<16x128xf32>
    %5 = arith.addf %2, %4 : vector<16x128xf32>
    %c0_5 = arith.constant 0 : index
    %c0_6 = arith.constant 0 : index
    %6 = vector.load %arg4[%c0_5, %c0_6] : memref<16x1xf32, #tpu.memory_space<vmem>>, vector<16x1xf32>
    %c0_7 = arith.constant 0 : index
    %c0_8 = arith.constant 0 : index
    %7 = vector.load %arg5[%c0_7, %c0_8] : memref<16x1xf32, #tpu.memory_space<vmem>>, vector<16x1xf32>
    %cst_9 = arith.constant dense<0.000000e+00> : vector<16xf32>
    %8 = vector.multi_reduction <add>, %5, %cst_9 [1] : vector<16x128xf32> to vector<16xf32>
    %9 = vector.shape_cast %8 : vector<16xf32> to vector<16x1xf32>
    %cst_10 = arith.constant 7.812500e-03 : f32
    %10 = vector.broadcast %cst_10 : f32 to vector<16x1xf32>
    %11 = arith.mulf %9, %10 : vector<16x1xf32>
    %12 = arith.mulf %5, %5 : vector<16x128xf32>
    %cst_11 = arith.constant dense<0.000000e+00> : vector<16xf32>
    %13 = vector.multi_reduction <add>, %12, %cst_11 [1] : vector<16x128xf32> to vector<16xf32>
    %14 = vector.shape_cast %13 : vector<16xf32> to vector<16x1xf32>
    %cst_12 = arith.constant 7.812500e-03 : f32
    %15 = vector.broadcast %cst_12 : f32 to vector<16x1xf32>
    %16 = arith.mulf %14, %15 : vector<16x1xf32>
    %17 = arith.mulf %11, %11 : vector<16x1xf32>
    %18 = arith.subf %16, %17 : vector<16x1xf32>
    %19 = vector.broadcast %11 : vector<16x1xf32> to vector<16x128xf32>
    %20 = arith.subf %5, %19 : vector<16x128xf32>
    %cst_13 = arith.constant 9.99999974E-6 : f32
    %21 = vector.broadcast %cst_13 : f32 to vector<16x1xf32>
    %22 = arith.addf %18, %21 : vector<16x1xf32>
    %23 = math.rsqrt %22 : vector<16x1xf32>
    %24 = vector.broadcast %23 : vector<16x1xf32> to vector<16x128xf32>
    %25 = arith.mulf %20, %24 : vector<16x128xf32>
    %26 = vector.broadcast %6 : vector<16x1xf32> to vector<16x128xf32>
    %27 = arith.mulf %25, %26 : vector<16x128xf32>
    %28 = vector.broadcast %7 : vector<16x1xf32> to vector<16x128xf32>
    %29 = arith.addf %27, %28 : vector<16x128xf32>
    %cst_14 = arith.constant 0.000000e+00 : f32
    %30 = vector.broadcast %cst_14 : f32 to vector<16x128xf32>
    %31 = arith.maximumf %29, %30 : vector<16x128xf32>
    %32 = arith.truncf %31 : vector<16x128xf32> to vector<16x128xbf16>
    %c0_15 = arith.constant 0 : index
    %c0_16 = arith.constant 0 : index
    %33 = vector.load %arg6[%c0_15, %c0_16] : memref<16x128xbf16, #tpu.memory_space<vmem>>, vector<16x128xbf16>
    tpu.vector_store %arg6[%c0_15, %c0_16], %32 {strides = array<i32>} : memref<16x128xbf16, #tpu.memory_space<vmem>>, vector<16x128xbf16>,
    return
  }
  func.func @transform_0(%arg0: i32) -> (i32, i32) {
    %c0_i32 = arith.constant 0 : i32
    %c0_i32_0 = arith.constant 0 : i32
    %c0_i32_1 = arith.constant 0 : i32
    return %c0_i32, %c0_i32_0 : i32, i32
  }
  func.func @transform_1(%arg0: i32) -> (i32, i32) {
    %c0_i32 = arith.constant 0 : i32
    %c0_i32_0 = arith.constant 0 : i32
    %c0_i32_1 = arith.constant 0 : i32
    return %c0_i32, %c0_i32_0 : i32, i32
  }
  func.func @transform_2(%arg0: i32) -> (i32, i32) {
    %c0_i32 = arith.constant 0 : i32
    %c0_i32_0 = arith.constant 0 : i32
    %c0_i32_1 = arith.constant 0 : i32
    return %c0_i32, %c0_i32_0 : i32, i32
  }
  func.func @transform_3(%arg0: i32) -> (i32, i32) {
    %c0_i32 = arith.constant 0 : i32
    %c0_i32_0 = arith.constant 0 : i32
    %c0_i32_1 = arith.constant 0 : i32
    return %c0_i32, %c0_i32_0 : i32, i32
  }
  func.func @transform_4(%arg0: i32) -> (i32, i32) {
    %c0_i32 = arith.constant 0 : i32
    %c0_i32_0 = arith.constant 0 : i32
    %c0_i32_1 = arith.constant 0 : i32
    return %c0_i32, %c0_i32_0 : i32, i32
  }
  func.func @transform_5(%arg0: i32) -> (i32, i32) {
    %c0_i32 = arith.constant 0 : i32
    %c0_i32_0 = arith.constant 0 : i32
    %c0_i32_1 = arith.constant 0 : i32
    return %c0_i32, %c0_i32_0 : i32, i32
  }
}

module attributes {stable_mosaic.version = 11 : i64} {
  func.func @_conv_bn_time_relu_kernel(%arg0: i32, %arg1: memref<144x32xbf16, #tpu.memory_space<vmem>>, %arg2: memref<32x144xbf16, #tpu.memory_space<vmem>>, %arg3: memref<32x1xf32, #tpu.memory_space<vmem>>, %arg4: memref<32x1xf32, #tpu.memory_space<vmem>>, %arg5: memref<32x1xf32, #tpu.memory_space<vmem>>, %arg6: memref<32x32xf32, #tpu.memory_space<vmem>>, %arg7: memref<32x1xf32, #tpu.memory_space<vmem>>, %arg8: memref<32x2xf32, #tpu.memory_space<vmem>>, %arg9: memref<2x32xf32, #tpu.memory_space<vmem>>, %arg10: memref<32x32xbf16, #tpu.memory_space<vmem>>) attributes {dimension_semantics = [#tpu.dimension_semantics<arbitrary>], iteration_bounds = array<i64: 1>, scalar_prefetch = 0 : i64, scratch_operands = 0 : i64, tpu.core_type = #tpu.core_type<tc>, window_params = [{pipeline_mode = #tpu.pipeline_mode<synchronous>, transform_indices = @transform_0, window_bounds = array<i64: 144, 32>}, {pipeline_mode = #tpu.pipeline_mode<synchronous>, transform_indices = @transform_1, window_bounds = array<i64: 32, 144>}, {pipeline_mode = #tpu.pipeline_mode<synchronous>, transform_indices = @transform_2, window_bounds = array<i64: 32, 1>}, {pipeline_mode = #tpu.pipeline_mode<synchronous>, transform_indices = @transform_3, window_bounds = array<i64: 32, 1>}, {pipeline_mode = #tpu.pipeline_mode<synchronous>, transform_indices = @transform_4, window_bounds = array<i64: 32, 1>}, {pipeline_mode = #tpu.pipeline_mode<synchronous>, transform_indices = @transform_5, window_bounds = array<i64: 32, 32>}, {pipeline_mode = #tpu.pipeline_mode<synchronous>, transform_indices = @transform_6, window_bounds = array<i64: 32, 1>}, {pipeline_mode = #tpu.pipeline_mode<synchronous>, transform_indices = @transform_7, window_bounds = array<i64: 32, 2>}, {pipeline_mode = #tpu.pipeline_mode<synchronous>, transform_indices = @transform_8, window_bounds = array<i64: 2, 32>}, {pipeline_mode = #tpu.pipeline_mode<synchronous>, transform_indices = @transform_9, window_bounds = array<i64: 32, 32>}]} {
    %c0 = arith.constant 0 : index
    %c0_0 = arith.constant 0 : index
    %0 = vector.load %arg2[%c0, %c0_0] : memref<32x144xbf16, #tpu.memory_space<vmem>>, vector<32x144xbf16>
    %c0_1 = arith.constant 0 : index
    %c0_2 = arith.constant 0 : index
    %1 = vector.load %arg1[%c0_1, %c0_2] : memref<144x32xbf16, #tpu.memory_space<vmem>>, vector<144x32xbf16>
    %cst = arith.constant dense<0.000000e+00> : vector<32x32xf32>
    %2 = tpu.matmul %0, %1, %cst {dimension_numbers = #tpu.dot_dimension_numbers<[1], [0], [0], [1], [0, 0, 1, 1], [], []>} : vector<32x144xbf16>, vector<144x32xbf16>, vector<32x32xf32> -> vector<32x32xf32>
    %c0_3 = arith.constant 0 : index
    %c0_4 = arith.constant 0 : index
    %3 = vector.load %arg3[%c0_3, %c0_4] : memref<32x1xf32, #tpu.memory_space<vmem>>, vector<32x1xf32>
    %4 = vector.broadcast %3 : vector<32x1xf32> to vector<32x32xf32>
    %5 = arith.addf %2, %4 : vector<32x32xf32>
    %c0_5 = arith.constant 0 : index
    %c0_6 = arith.constant 0 : index
    %6 = vector.load %arg6[%c0_5, %c0_6] : memref<32x32xf32, #tpu.memory_space<vmem>>, vector<32x32xf32>
    %c0_7 = arith.constant 0 : index
    %c0_8 = arith.constant 0 : index
    %7 = vector.load %arg8[%c0_7, %c0_8] : memref<32x2xf32, #tpu.memory_space<vmem>>, vector<32x2xf32>
    %cst_9 = arith.constant dense<0.000000e+00> : vector<32x2xf32>
    %8 = tpu.matmul %6, %7, %cst_9 {dimension_numbers = #tpu.dot_dimension_numbers<[1], [0], [0], [1], [0, 0, 1, 1], [], []>} : vector<32x32xf32>, vector<32x2xf32>, vector<32x2xf32> -> vector<32x2xf32>
    %c0_10 = arith.constant 0 : index
    %c0_11 = arith.constant 0 : index
    %9 = vector.load %arg7[%c0_10, %c0_11] : memref<32x1xf32, #tpu.memory_space<vmem>>, vector<32x1xf32>
    %10 = vector.broadcast %9 : vector<32x1xf32> to vector<32x2xf32>
    %11 = arith.addf %8, %10 : vector<32x2xf32>
    %c0_12 = arith.constant 0 : index
    %c0_13 = arith.constant 0 : index
    %12 = vector.load %arg9[%c0_12, %c0_13] : memref<2x32xf32, #tpu.memory_space<vmem>>, vector<2x32xf32>
    %cst_14 = arith.constant dense<0.000000e+00> : vector<32x32xf32>
    %13 = tpu.matmul %11, %12, %cst_14 {dimension_numbers = #tpu.dot_dimension_numbers<[1], [0], [0], [1], [0, 0, 1, 1], [], []>} : vector<32x2xf32>, vector<2x32xf32>, vector<32x32xf32> -> vector<32x32xf32>
    %c0_15 = arith.constant 0 : index
    %c0_16 = arith.constant 0 : index
    %14 = vector.load %arg4[%c0_15, %c0_16] : memref<32x1xf32, #tpu.memory_space<vmem>>, vector<32x1xf32>
    %c0_17 = arith.constant 0 : index
    %c0_18 = arith.constant 0 : index
    %15 = vector.load %arg5[%c0_17, %c0_18] : memref<32x1xf32, #tpu.memory_space<vmem>>, vector<32x1xf32>
    %cst_19 = arith.constant dense<0.000000e+00> : vector<32xf32>
    %16 = vector.multi_reduction <add>, %5, %cst_19 [1] : vector<32x32xf32> to vector<32xf32>
    %17 = vector.shape_cast %16 : vector<32xf32> to vector<32x1xf32>
    %cst_20 = arith.constant 3.125000e-02 : f32
    %18 = vector.broadcast %cst_20 : f32 to vector<32x1xf32>
    %19 = arith.mulf %17, %18 : vector<32x1xf32>
    %20 = arith.mulf %5, %5 : vector<32x32xf32>
    %cst_21 = arith.constant dense<0.000000e+00> : vector<32xf32>
    %21 = vector.multi_reduction <add>, %20, %cst_21 [1] : vector<32x32xf32> to vector<32xf32>
    %22 = vector.shape_cast %21 : vector<32xf32> to vector<32x1xf32>
    %cst_22 = arith.constant 3.125000e-02 : f32
    %23 = vector.broadcast %cst_22 : f32 to vector<32x1xf32>
    %24 = arith.mulf %22, %23 : vector<32x1xf32>
    %25 = arith.mulf %19, %19 : vector<32x1xf32>
    %26 = arith.subf %24, %25 : vector<32x1xf32>
    %27 = vector.broadcast %19 : vector<32x1xf32> to vector<32x32xf32>
    %28 = arith.subf %5, %27 : vector<32x32xf32>
    %cst_23 = arith.constant 9.99999974E-6 : f32
    %29 = vector.broadcast %cst_23 : f32 to vector<32x1xf32>
    %30 = arith.addf %26, %29 : vector<32x1xf32>
    %31 = math.rsqrt %30 : vector<32x1xf32>
    %32 = vector.broadcast %31 : vector<32x1xf32> to vector<32x32xf32>
    %33 = arith.mulf %28, %32 : vector<32x32xf32>
    %34 = vector.broadcast %14 : vector<32x1xf32> to vector<32x32xf32>
    %35 = arith.mulf %33, %34 : vector<32x32xf32>
    %36 = vector.broadcast %15 : vector<32x1xf32> to vector<32x32xf32>
    %37 = arith.addf %35, %36 : vector<32x32xf32>
    %38 = arith.addf %37, %13 : vector<32x32xf32>
    %cst_24 = arith.constant 0.000000e+00 : f32
    %39 = vector.broadcast %cst_24 : f32 to vector<32x32xf32>
    %40 = arith.maximumf %38, %39 : vector<32x32xf32>
    %41 = arith.truncf %40 : vector<32x32xf32> to vector<32x32xbf16>
    %c0_25 = arith.constant 0 : index
    %c0_26 = arith.constant 0 : index
    %42 = vector.load %arg10[%c0_25, %c0_26] : memref<32x32xbf16, #tpu.memory_space<vmem>>, vector<32x32xbf16>
    tpu.vector_store %arg10[%c0_25, %c0_26], %41 {strides = array<i32>} : memref<32x32xbf16, #tpu.memory_space<vmem>>, vector<32x32xbf16>,
    return
  }
  func.func @transform_0(%arg0: i32) -> (i32, i32) {
    %c0_i32 = arith.constant 0 : i32
    %c0_i32_0 = arith.constant 0 : i32
    %c0_i32_1 = arith.constant 0 : i32
    return %c0_i32, %c0_i32_0 : i32, i32
  }
  func.func @transform_1(%arg0: i32) -> (i32, i32) {
    %c0_i32 = arith.constant 0 : i32
    %c0_i32_0 = arith.constant 0 : i32
    %c0_i32_1 = arith.constant 0 : i32
    return %c0_i32, %c0_i32_0 : i32, i32
  }
  func.func @transform_2(%arg0: i32) -> (i32, i32) {
    %c0_i32 = arith.constant 0 : i32
    %c0_i32_0 = arith.constant 0 : i32
    %c0_i32_1 = arith.constant 0 : i32
    return %c0_i32, %c0_i32_0 : i32, i32
  }
  func.func @transform_3(%arg0: i32) -> (i32, i32) {
    %c0_i32 = arith.constant 0 : i32
    %c0_i32_0 = arith.constant 0 : i32
    %c0_i32_1 = arith.constant 0 : i32
    return %c0_i32, %c0_i32_0 : i32, i32
  }
  func.func @transform_4(%arg0: i32) -> (i32, i32) {
    %c0_i32 = arith.constant 0 : i32
    %c0_i32_0 = arith.constant 0 : i32
    %c0_i32_1 = arith.constant 0 : i32
    return %c0_i32, %c0_i32_0 : i32, i32
  }
  func.func @transform_5(%arg0: i32) -> (i32, i32) {
    %c0_i32 = arith.constant 0 : i32
    %c0_i32_0 = arith.constant 0 : i32
    %c0_i32_1 = arith.constant 0 : i32
    return %c0_i32, %c0_i32_0 : i32, i32
  }
  func.func @transform_6(%arg0: i32) -> (i32, i32) {
    %c0_i32 = arith.constant 0 : i32
    %c0_i32_0 = arith.constant 0 : i32
    %c0_i32_1 = arith.constant 0 : i32
    return %c0_i32, %c0_i32_0 : i32, i32
  }
  func.func @transform_7(%arg0: i32) -> (i32, i32) {
    %c0_i32 = arith.constant 0 : i32
    %c0_i32_0 = arith.constant 0 : i32
    %c0_i32_1 = arith.constant 0 : i32
    return %c0_i32, %c0_i32_0 : i32, i32
  }
  func.func @transform_8(%arg0: i32) -> (i32, i32) {
    %c0_i32 = arith.constant 0 : i32
    %c0_i32_0 = arith.constant 0 : i32
    %c0_i32_1 = arith.constant 0 : i32
    return %c0_i32, %c0_i32_0 : i32, i32
  }
  func.func @transform_9(%arg0: i32) -> (i32, i32) {
    %c0_i32 = arith.constant 0 : i32
    %c0_i32_0 = arith.constant 0 : i32
    %c0_i32_1 = arith.constant 0 : i32
    return %c0_i32, %c0_i32_0 : i32, i32
  }
}

module attributes {stable_mosaic.version = 11 : i64} {
  func.func @_matmul_bias_t_kernel(%arg0: i32, %arg1: memref<64x32xbf16, #tpu.memory_space<vmem>>, %arg2: memref<32x32xbf16, #tpu.memory_space<vmem>>, %arg3: memref<64x1xf32, #tpu.memory_space<vmem>>, %arg4: memref<64x32xbf16, #tpu.memory_space<vmem>>) attributes {dimension_semantics = [#tpu.dimension_semantics<parallel>], iteration_bounds = array<i64: 1>, scalar_prefetch = 0 : i64, scratch_operands = 0 : i64, tpu.core_type = #tpu.core_type<tc>, window_params = [{pipeline_mode = #tpu.pipeline_mode<synchronous>, transform_indices = @transform_0, window_bounds = array<i64: 64, 32>}, {transform_indices = @transform_1, window_bounds = array<i64: 32, 32>}, {pipeline_mode = #tpu.pipeline_mode<synchronous>, transform_indices = @transform_2, window_bounds = array<i64: 64, 1>}, {transform_indices = @transform_3, window_bounds = array<i64: 64, 32>}]} {
    %c0 = arith.constant 0 : index
    %c0_0 = arith.constant 0 : index
    %0 = vector.load %arg1[%c0, %c0_0] : memref<64x32xbf16, #tpu.memory_space<vmem>>, vector<64x32xbf16>
    %c0_1 = arith.constant 0 : index
    %c0_2 = arith.constant 0 : index
    %1 = vector.load %arg2[%c0_1, %c0_2] : memref<32x32xbf16, #tpu.memory_space<vmem>>, vector<32x32xbf16>
    %cst = arith.constant dense<0.000000e+00> : vector<64x32xf32>
    %2 = tpu.matmul %0, %1, %cst {dimension_numbers = #tpu.dot_dimension_numbers<[1], [0], [0], [1], [0, 0, 1, 1], [], []>} : vector<64x32xbf16>, vector<32x32xbf16>, vector<64x32xf32> -> vector<64x32xf32>
    %c0_3 = arith.constant 0 : index
    %c0_4 = arith.constant 0 : index
    %3 = vector.load %arg3[%c0_3, %c0_4] : memref<64x1xf32, #tpu.memory_space<vmem>>, vector<64x1xf32>
    %4 = vector.broadcast %3 : vector<64x1xf32> to vector<64x32xf32>
    %5 = arith.addf %2, %4 : vector<64x32xf32>
    %6 = arith.truncf %5 : vector<64x32xf32> to vector<64x32xbf16>
    %c0_5 = arith.constant 0 : index
    %c0_6 = arith.constant 0 : index
    %7 = vector.load %arg4[%c0_5, %c0_6] : memref<64x32xbf16, #tpu.memory_space<vmem>>, vector<64x32xbf16>
    tpu.vector_store %arg4[%c0_5, %c0_6], %6 {strides = array<i32>} : memref<64x32xbf16, #tpu.memory_space<vmem>>, vector<64x32xbf16>,
    return
  }
  func.func @transform_0(%arg0: i32) -> (i32, i32) {
    %c0_i32 = arith.constant 0 : i32
    %c0_i32_0 = arith.constant 0 : i32
    %c0_i32_1 = arith.constant 0 : i32
    return %c0_i32, %c0_i32_0 : i32, i32
  }
  func.func @transform_1(%arg0: i32) -> (i32, i32) {
    %c0_i32 = arith.constant 0 : i32
    %c0_i32_0 = arith.constant 0 : i32
    return %c0_i32, %arg0 : i32, i32
  }
  func.func @transform_2(%arg0: i32) -> (i32, i32) {
    %c0_i32 = arith.constant 0 : i32
    %c0_i32_0 = arith.constant 0 : i32
    %c0_i32_1 = arith.constant 0 : i32
    return %c0_i32, %c0_i32_0 : i32, i32
  }
  func.func @transform_3(%arg0: i32) -> (i32, i32) {
    %c0_i32 = arith.constant 0 : i32
    %c0_i32_0 = arith.constant 0 : i32
    return %c0_i32, %arg0 : i32, i32
  }
}

module attributes {stable_mosaic.version = 11 : i64} {
  func.func @_conv_bn_relu_kernel(%arg0: i32, %arg1: memref<288x32xbf16, #tpu.memory_space<vmem>>, %arg2: memref<32x288xbf16, #tpu.memory_space<vmem>>, %arg3: memref<32x1xf32, #tpu.memory_space<vmem>>, %arg4: memref<32x1xf32, #tpu.memory_space<vmem>>, %arg5: memref<32x1xf32, #tpu.memory_space<vmem>>, %arg6: memref<32x32xbf16, #tpu.memory_space<vmem>>) attributes {dimension_semantics = [#tpu.dimension_semantics<arbitrary>], iteration_bounds = array<i64: 1>, scalar_prefetch = 0 : i64, scratch_operands = 0 : i64, tpu.core_type = #tpu.core_type<tc>, window_params = [{pipeline_mode = #tpu.pipeline_mode<synchronous>, transform_indices = @transform_0, window_bounds = array<i64: 288, 32>}, {pipeline_mode = #tpu.pipeline_mode<synchronous>, transform_indices = @transform_1, window_bounds = array<i64: 32, 288>}, {pipeline_mode = #tpu.pipeline_mode<synchronous>, transform_indices = @transform_2, window_bounds = array<i64: 32, 1>}, {pipeline_mode = #tpu.pipeline_mode<synchronous>, transform_indices = @transform_3, window_bounds = array<i64: 32, 1>}, {pipeline_mode = #tpu.pipeline_mode<synchronous>, transform_indices = @transform_4, window_bounds = array<i64: 32, 1>}, {pipeline_mode = #tpu.pipeline_mode<synchronous>, transform_indices = @transform_5, window_bounds = array<i64: 32, 32>}]} {
    %c0 = arith.constant 0 : index
    %c0_0 = arith.constant 0 : index
    %0 = vector.load %arg2[%c0, %c0_0] : memref<32x288xbf16, #tpu.memory_space<vmem>>, vector<32x288xbf16>
    %c0_1 = arith.constant 0 : index
    %c0_2 = arith.constant 0 : index
    %1 = vector.load %arg1[%c0_1, %c0_2] : memref<288x32xbf16, #tpu.memory_space<vmem>>, vector<288x32xbf16>
    %cst = arith.constant dense<0.000000e+00> : vector<32x32xf32>
    %2 = tpu.matmul %0, %1, %cst {dimension_numbers = #tpu.dot_dimension_numbers<[1], [0], [0], [1], [0, 0, 1, 1], [], []>} : vector<32x288xbf16>, vector<288x32xbf16>, vector<32x32xf32> -> vector<32x32xf32>
    %c0_3 = arith.constant 0 : index
    %c0_4 = arith.constant 0 : index
    %3 = vector.load %arg3[%c0_3, %c0_4] : memref<32x1xf32, #tpu.memory_space<vmem>>, vector<32x1xf32>
    %4 = vector.broadcast %3 : vector<32x1xf32> to vector<32x32xf32>
    %5 = arith.addf %2, %4 : vector<32x32xf32>
    %c0_5 = arith.constant 0 : index
    %c0_6 = arith.constant 0 : index
    %6 = vector.load %arg4[%c0_5, %c0_6] : memref<32x1xf32, #tpu.memory_space<vmem>>, vector<32x1xf32>
    %c0_7 = arith.constant 0 : index
    %c0_8 = arith.constant 0 : index
    %7 = vector.load %arg5[%c0_7, %c0_8] : memref<32x1xf32, #tpu.memory_space<vmem>>, vector<32x1xf32>
    %cst_9 = arith.constant dense<0.000000e+00> : vector<32xf32>
    %8 = vector.multi_reduction <add>, %5, %cst_9 [1] : vector<32x32xf32> to vector<32xf32>
    %9 = vector.shape_cast %8 : vector<32xf32> to vector<32x1xf32>
    %cst_10 = arith.constant 3.125000e-02 : f32
    %10 = vector.broadcast %cst_10 : f32 to vector<32x1xf32>
    %11 = arith.mulf %9, %10 : vector<32x1xf32>
    %12 = arith.mulf %5, %5 : vector<32x32xf32>
    %cst_11 = arith.constant dense<0.000000e+00> : vector<32xf32>
    %13 = vector.multi_reduction <add>, %12, %cst_11 [1] : vector<32x32xf32> to vector<32xf32>
    %14 = vector.shape_cast %13 : vector<32xf32> to vector<32x1xf32>
    %cst_12 = arith.constant 3.125000e-02 : f32
    %15 = vector.broadcast %cst_12 : f32 to vector<32x1xf32>
    %16 = arith.mulf %14, %15 : vector<32x1xf32>
    %17 = arith.mulf %11, %11 : vector<32x1xf32>
    %18 = arith.subf %16, %17 : vector<32x1xf32>
    %19 = vector.broadcast %11 : vector<32x1xf32> to vector<32x32xf32>
    %20 = arith.subf %5, %19 : vector<32x32xf32>
    %cst_13 = arith.constant 9.99999974E-6 : f32
    %21 = vector.broadcast %cst_13 : f32 to vector<32x1xf32>
    %22 = arith.addf %18, %21 : vector<32x1xf32>
    %23 = math.rsqrt %22 : vector<32x1xf32>
    %24 = vector.broadcast %23 : vector<32x1xf32> to vector<32x32xf32>
    %25 = arith.mulf %20, %24 : vector<32x32xf32>
    %26 = vector.broadcast %6 : vector<32x1xf32> to vector<32x32xf32>
    %27 = arith.mulf %25, %26 : vector<32x32xf32>
    %28 = vector.broadcast %7 : vector<32x1xf32> to vector<32x32xf32>
    %29 = arith.addf %27, %28 : vector<32x32xf32>
    %cst_14 = arith.constant 0.000000e+00 : f32
    %30 = vector.broadcast %cst_14 : f32 to vector<32x32xf32>
    %31 = arith.maximumf %29, %30 : vector<32x32xf32>
    %32 = arith.truncf %31 : vector<32x32xf32> to vector<32x32xbf16>
    %c0_15 = arith.constant 0 : index
    %c0_16 = arith.constant 0 : index
    %33 = vector.load %arg6[%c0_15, %c0_16] : memref<32x32xbf16, #tpu.memory_space<vmem>>, vector<32x32xbf16>
    tpu.vector_store %arg6[%c0_15, %c0_16], %32 {strides = array<i32>} : memref<32x32xbf16, #tpu.memory_space<vmem>>, vector<32x32xbf16>,
    return
  }
  func.func @transform_0(%arg0: i32) -> (i32, i32) {
    %c0_i32 = arith.constant 0 : i32
    %c0_i32_0 = arith.constant 0 : i32
    %c0_i32_1 = arith.constant 0 : i32
    return %c0_i32, %c0_i32_0 : i32, i32
  }
  func.func @transform_1(%arg0: i32) -> (i32, i32) {
    %c0_i32 = arith.constant 0 : i32
    %c0_i32_0 = arith.constant 0 : i32
    %c0_i32_1 = arith.constant 0 : i32
    return %c0_i32, %c0_i32_0 : i32, i32
  }
  func.func @transform_2(%arg0: i32) -> (i32, i32) {
    %c0_i32 = arith.constant 0 : i32
    %c0_i32_0 = arith.constant 0 : i32
    %c0_i32_1 = arith.constant 0 : i32
    return %c0_i32, %c0_i32_0 : i32, i32
  }
  func.func @transform_3(%arg0: i32) -> (i32, i32) {
    %c0_i32 = arith.constant 0 : i32
    %c0_i32_0 = arith.constant 0 : i32
    %c0_i32_1 = arith.constant 0 : i32
    return %c0_i32, %c0_i32_0 : i32, i32
  }
  func.func @transform_4(%arg0: i32) -> (i32, i32) {
    %c0_i32 = arith.constant 0 : i32
    %c0_i32_0 = arith.constant 0 : i32
    %c0_i32_1 = arith.constant 0 : i32
    return %c0_i32, %c0_i32_0 : i32, i32
  }
  func.func @transform_5(%arg0: i32) -> (i32, i32) {
    %c0_i32 = arith.constant 0 : i32
    %c0_i32_0 = arith.constant 0 : i32
    %c0_i32_1 = arith.constant 0 : i32
    return %c0_i32, %c0_i32_0 : i32, i32
  }
}

module attributes {stable_mosaic.version = 11 : i64} {
  func.func @_matmul_bias_t_kernel(%arg0: i32, %arg1: memref<32x16xbf16, #tpu.memory_space<vmem>>, %arg2: memref<16x128xbf16, #tpu.memory_space<vmem>>, %arg3: memref<32x1xf32, #tpu.memory_space<vmem>>, %arg4: memref<32x128xbf16, #tpu.memory_space<vmem>>) attributes {dimension_semantics = [#tpu.dimension_semantics<parallel>], iteration_bounds = array<i64: 1>, scalar_prefetch = 0 : i64, scratch_operands = 0 : i64, tpu.core_type = #tpu.core_type<tc>, window_params = [{pipeline_mode = #tpu.pipeline_mode<synchronous>, transform_indices = @transform_0, window_bounds = array<i64: 32, 16>}, {transform_indices = @transform_1, window_bounds = array<i64: 16, 128>}, {pipeline_mode = #tpu.pipeline_mode<synchronous>, transform_indices = @transform_2, window_bounds = array<i64: 32, 1>}, {transform_indices = @transform_3, window_bounds = array<i64: 32, 128>}]} {
    %c0 = arith.constant 0 : index
    %c0_0 = arith.constant 0 : index
    %0 = vector.load %arg1[%c0, %c0_0] : memref<32x16xbf16, #tpu.memory_space<vmem>>, vector<32x16xbf16>
    %c0_1 = arith.constant 0 : index
    %c0_2 = arith.constant 0 : index
    %1 = vector.load %arg2[%c0_1, %c0_2] : memref<16x128xbf16, #tpu.memory_space<vmem>>, vector<16x128xbf16>
    %cst = arith.constant dense<0.000000e+00> : vector<32x128xf32>
    %2 = tpu.matmul %0, %1, %cst {dimension_numbers = #tpu.dot_dimension_numbers<[1], [0], [0], [1], [0, 0, 1, 1], [], []>} : vector<32x16xbf16>, vector<16x128xbf16>, vector<32x128xf32> -> vector<32x128xf32>
    %c0_3 = arith.constant 0 : index
    %c0_4 = arith.constant 0 : index
    %3 = vector.load %arg3[%c0_3, %c0_4] : memref<32x1xf32, #tpu.memory_space<vmem>>, vector<32x1xf32>
    %4 = vector.broadcast %3 : vector<32x1xf32> to vector<32x128xf32>
    %5 = arith.addf %2, %4 : vector<32x128xf32>
    %6 = arith.truncf %5 : vector<32x128xf32> to vector<32x128xbf16>
    %c0_5 = arith.constant 0 : index
    %c0_6 = arith.constant 0 : index
    %7 = vector.load %arg4[%c0_5, %c0_6] : memref<32x128xbf16, #tpu.memory_space<vmem>>, vector<32x128xbf16>
    tpu.vector_store %arg4[%c0_5, %c0_6], %6 {strides = array<i32>} : memref<32x128xbf16, #tpu.memory_space<vmem>>, vector<32x128xbf16>,
    return
  }
  func.func @transform_0(%arg0: i32) -> (i32, i32) {
    %c0_i32 = arith.constant 0 : i32
    %c0_i32_0 = arith.constant 0 : i32
    %c0_i32_1 = arith.constant 0 : i32
    return %c0_i32, %c0_i32_0 : i32, i32
  }
  func.func @transform_1(%arg0: i32) -> (i32, i32) {
    %c0_i32 = arith.constant 0 : i32
    %c0_i32_0 = arith.constant 0 : i32
    return %c0_i32, %arg0 : i32, i32
  }
  func.func @transform_2(%arg0: i32) -> (i32, i32) {
    %c0_i32 = arith.constant 0 : i32
    %c0_i32_0 = arith.constant 0 : i32
    %c0_i32_1 = arith.constant 0 : i32
    return %c0_i32, %c0_i32_0 : i32, i32
  }
  func.func @transform_3(%arg0: i32) -> (i32, i32) {
    %c0_i32 = arith.constant 0 : i32
    %c0_i32_0 = arith.constant 0 : i32
    return %c0_i32, %arg0 : i32, i32
  }
}

module attributes {stable_mosaic.version = 11 : i64} {
  func.func @_conv_bn_time_relu_kernel(%arg0: i32, %arg1: memref<288x128xbf16, #tpu.memory_space<vmem>>, %arg2: memref<16x288xbf16, #tpu.memory_space<vmem>>, %arg3: memref<16x1xf32, #tpu.memory_space<vmem>>, %arg4: memref<16x1xf32, #tpu.memory_space<vmem>>, %arg5: memref<16x1xf32, #tpu.memory_space<vmem>>, %arg6: memref<16x32xf32, #tpu.memory_space<vmem>>, %arg7: memref<16x1xf32, #tpu.memory_space<vmem>>, %arg8: memref<32x2xf32, #tpu.memory_space<vmem>>, %arg9: memref<2x128xf32, #tpu.memory_space<vmem>>, %arg10: memref<16x128xbf16, #tpu.memory_space<vmem>>) attributes {dimension_semantics = [#tpu.dimension_semantics<arbitrary>], iteration_bounds = array<i64: 1>, scalar_prefetch = 0 : i64, scratch_operands = 0 : i64, tpu.core_type = #tpu.core_type<tc>, window_params = [{pipeline_mode = #tpu.pipeline_mode<synchronous>, transform_indices = @transform_0, window_bounds = array<i64: 288, 128>}, {pipeline_mode = #tpu.pipeline_mode<synchronous>, transform_indices = @transform_1, window_bounds = array<i64: 16, 288>}, {pipeline_mode = #tpu.pipeline_mode<synchronous>, transform_indices = @transform_2, window_bounds = array<i64: 16, 1>}, {pipeline_mode = #tpu.pipeline_mode<synchronous>, transform_indices = @transform_3, window_bounds = array<i64: 16, 1>}, {pipeline_mode = #tpu.pipeline_mode<synchronous>, transform_indices = @transform_4, window_bounds = array<i64: 16, 1>}, {pipeline_mode = #tpu.pipeline_mode<synchronous>, transform_indices = @transform_5, window_bounds = array<i64: 16, 32>}, {pipeline_mode = #tpu.pipeline_mode<synchronous>, transform_indices = @transform_6, window_bounds = array<i64: 16, 1>}, {pipeline_mode = #tpu.pipeline_mode<synchronous>, transform_indices = @transform_7, window_bounds = array<i64: 32, 2>}, {pipeline_mode = #tpu.pipeline_mode<synchronous>, transform_indices = @transform_8, window_bounds = array<i64: 2, 128>}, {pipeline_mode = #tpu.pipeline_mode<synchronous>, transform_indices = @transform_9, window_bounds = array<i64: 16, 128>}]} {
    %c0 = arith.constant 0 : index
    %c0_0 = arith.constant 0 : index
    %0 = vector.load %arg2[%c0, %c0_0] : memref<16x288xbf16, #tpu.memory_space<vmem>>, vector<16x288xbf16>
    %c0_1 = arith.constant 0 : index
    %c0_2 = arith.constant 0 : index
    %1 = vector.load %arg1[%c0_1, %c0_2] : memref<288x128xbf16, #tpu.memory_space<vmem>>, vector<288x128xbf16>
    %cst = arith.constant dense<0.000000e+00> : vector<16x128xf32>
    %2 = tpu.matmul %0, %1, %cst {dimension_numbers = #tpu.dot_dimension_numbers<[1], [0], [0], [1], [0, 0, 1, 1], [], []>} : vector<16x288xbf16>, vector<288x128xbf16>, vector<16x128xf32> -> vector<16x128xf32>
    %c0_3 = arith.constant 0 : index
    %c0_4 = arith.constant 0 : index
    %3 = vector.load %arg3[%c0_3, %c0_4] : memref<16x1xf32, #tpu.memory_space<vmem>>, vector<16x1xf32>
    %4 = vector.broadcast %3 : vector<16x1xf32> to vector<16x128xf32>
    %5 = arith.addf %2, %4 : vector<16x128xf32>
    %c0_5 = arith.constant 0 : index
    %c0_6 = arith.constant 0 : index
    %6 = vector.load %arg6[%c0_5, %c0_6] : memref<16x32xf32, #tpu.memory_space<vmem>>, vector<16x32xf32>
    %c0_7 = arith.constant 0 : index
    %c0_8 = arith.constant 0 : index
    %7 = vector.load %arg8[%c0_7, %c0_8] : memref<32x2xf32, #tpu.memory_space<vmem>>, vector<32x2xf32>
    %cst_9 = arith.constant dense<0.000000e+00> : vector<16x2xf32>
    %8 = tpu.matmul %6, %7, %cst_9 {dimension_numbers = #tpu.dot_dimension_numbers<[1], [0], [0], [1], [0, 0, 1, 1], [], []>} : vector<16x32xf32>, vector<32x2xf32>, vector<16x2xf32> -> vector<16x2xf32>
    %c0_10 = arith.constant 0 : index
    %c0_11 = arith.constant 0 : index
    %9 = vector.load %arg7[%c0_10, %c0_11] : memref<16x1xf32, #tpu.memory_space<vmem>>, vector<16x1xf32>
    %10 = vector.broadcast %9 : vector<16x1xf32> to vector<16x2xf32>
    %11 = arith.addf %8, %10 : vector<16x2xf32>
    %c0_12 = arith.constant 0 : index
    %c0_13 = arith.constant 0 : index
    %12 = vector.load %arg9[%c0_12, %c0_13] : memref<2x128xf32, #tpu.memory_space<vmem>>, vector<2x128xf32>
    %cst_14 = arith.constant dense<0.000000e+00> : vector<16x128xf32>
    %13 = tpu.matmul %11, %12, %cst_14 {dimension_numbers = #tpu.dot_dimension_numbers<[1], [0], [0], [1], [0, 0, 1, 1], [], []>} : vector<16x2xf32>, vector<2x128xf32>, vector<16x128xf32> -> vector<16x128xf32>
    %c0_15 = arith.constant 0 : index
    %c0_16 = arith.constant 0 : index
    %14 = vector.load %arg4[%c0_15, %c0_16] : memref<16x1xf32, #tpu.memory_space<vmem>>, vector<16x1xf32>
    %c0_17 = arith.constant 0 : index
    %c0_18 = arith.constant 0 : index
    %15 = vector.load %arg5[%c0_17, %c0_18] : memref<16x1xf32, #tpu.memory_space<vmem>>, vector<16x1xf32>
    %cst_19 = arith.constant dense<0.000000e+00> : vector<16xf32>
    %16 = vector.multi_reduction <add>, %5, %cst_19 [1] : vector<16x128xf32> to vector<16xf32>
    %17 = vector.shape_cast %16 : vector<16xf32> to vector<16x1xf32>
    %cst_20 = arith.constant 7.812500e-03 : f32
    %18 = vector.broadcast %cst_20 : f32 to vector<16x1xf32>
    %19 = arith.mulf %17, %18 : vector<16x1xf32>
    %20 = arith.mulf %5, %5 : vector<16x128xf32>
    %cst_21 = arith.constant dense<0.000000e+00> : vector<16xf32>
    %21 = vector.multi_reduction <add>, %20, %cst_21 [1] : vector<16x128xf32> to vector<16xf32>
    %22 = vector.shape_cast %21 : vector<16xf32> to vector<16x1xf32>
    %cst_22 = arith.constant 7.812500e-03 : f32
    %23 = vector.broadcast %cst_22 : f32 to vector<16x1xf32>
    %24 = arith.mulf %22, %23 : vector<16x1xf32>
    %25 = arith.mulf %19, %19 : vector<16x1xf32>
    %26 = arith.subf %24, %25 : vector<16x1xf32>
    %27 = vector.broadcast %19 : vector<16x1xf32> to vector<16x128xf32>
    %28 = arith.subf %5, %27 : vector<16x128xf32>
    %cst_23 = arith.constant 9.99999974E-6 : f32
    %29 = vector.broadcast %cst_23 : f32 to vector<16x1xf32>
    %30 = arith.addf %26, %29 : vector<16x1xf32>
    %31 = math.rsqrt %30 : vector<16x1xf32>
    %32 = vector.broadcast %31 : vector<16x1xf32> to vector<16x128xf32>
    %33 = arith.mulf %28, %32 : vector<16x128xf32>
    %34 = vector.broadcast %14 : vector<16x1xf32> to vector<16x128xf32>
    %35 = arith.mulf %33, %34 : vector<16x128xf32>
    %36 = vector.broadcast %15 : vector<16x1xf32> to vector<16x128xf32>
    %37 = arith.addf %35, %36 : vector<16x128xf32>
    %38 = arith.addf %37, %13 : vector<16x128xf32>
    %cst_24 = arith.constant 0.000000e+00 : f32
    %39 = vector.broadcast %cst_24 : f32 to vector<16x128xf32>
    %40 = arith.maximumf %38, %39 : vector<16x128xf32>
    %41 = arith.truncf %40 : vector<16x128xf32> to vector<16x128xbf16>
    %c0_25 = arith.constant 0 : index
    %c0_26 = arith.constant 0 : index
    %42 = vector.load %arg10[%c0_25, %c0_26] : memref<16x128xbf16, #tpu.memory_space<vmem>>, vector<16x128xbf16>
    tpu.vector_store %arg10[%c0_25, %c0_26], %41 {strides = array<i32>} : memref<16x128xbf16, #tpu.memory_space<vmem>>, vector<16x128xbf16>,
    return
  }
  func.func @transform_0(%arg0: i32) -> (i32, i32) {
    %c0_i32 = arith.constant 0 : i32
    %c0_i32_0 = arith.constant 0 : i32
    %c0_i32_1 = arith.constant 0 : i32
    return %c0_i32, %c0_i32_0 : i32, i32
  }
  func.func @transform_1(%arg0: i32) -> (i32, i32) {
    %c0_i32 = arith.constant 0 : i32
    %c0_i32_0 = arith.constant 0 : i32
    %c0_i32_1 = arith.constant 0 : i32
    return %c0_i32, %c0_i32_0 : i32, i32
  }
  func.func @transform_2(%arg0: i32) -> (i32, i32) {
    %c0_i32 = arith.constant 0 : i32
    %c0_i32_0 = arith.constant 0 : i32
    %c0_i32_1 = arith.constant 0 : i32
    return %c0_i32, %c0_i32_0 : i32, i32
  }
  func.func @transform_3(%arg0: i32) -> (i32, i32) {
    %c0_i32 = arith.constant 0 : i32
    %c0_i32_0 = arith.constant 0 : i32
    %c0_i32_1 = arith.constant 0 : i32
    return %c0_i32, %c0_i32_0 : i32, i32
  }
  func.func @transform_4(%arg0: i32) -> (i32, i32) {
    %c0_i32 = arith.constant 0 : i32
    %c0_i32_0 = arith.constant 0 : i32
    %c0_i32_1 = arith.constant 0 : i32
    return %c0_i32, %c0_i32_0 : i32, i32
  }
  func.func @transform_5(%arg0: i32) -> (i32, i32) {
    %c0_i32 = arith.constant 0 : i32
    %c0_i32_0 = arith.constant 0 : i32
    %c0_i32_1 = arith.constant 0 : i32
    return %c0_i32, %c0_i32_0 : i32, i32
  }
  func.func @transform_6(%arg0: i32) -> (i32, i32) {
    %c0_i32 = arith.constant 0 : i32
    %c0_i32_0 = arith.constant 0 : i32
    %c0_i32_1 = arith.constant 0 : i32
    return %c0_i32, %c0_i32_0 : i32, i32
  }
  func.func @transform_7(%arg0: i32) -> (i32, i32) {
    %c0_i32 = arith.constant 0 : i32
    %c0_i32_0 = arith.constant 0 : i32
    %c0_i32_1 = arith.constant 0 : i32
    return %c0_i32, %c0_i32_0 : i32, i32
  }
  func.func @transform_8(%arg0: i32) -> (i32, i32) {
    %c0_i32 = arith.constant 0 : i32
    %c0_i32_0 = arith.constant 0 : i32
    %c0_i32_1 = arith.constant 0 : i32
    return %c0_i32, %c0_i32_0 : i32, i32
  }
  func.func @transform_9(%arg0: i32) -> (i32, i32) {
    %c0_i32 = arith.constant 0 : i32
    %c0_i32_0 = arith.constant 0 : i32
    %c0_i32_1 = arith.constant 0 : i32
    return %c0_i32, %c0_i32_0 : i32, i32
  }
}

module attributes {stable_mosaic.version = 11 : i64} {
  func.func @_conv_bn_time_relu_kernel(%arg0: i32, %arg1: memref<144x512xbf16, #tpu.memory_space<vmem>>, %arg2: memref<8x144xbf16, #tpu.memory_space<vmem>>, %arg3: memref<8x1xf32, #tpu.memory_space<vmem>>, %arg4: memref<8x1xf32, #tpu.memory_space<vmem>>, %arg5: memref<8x1xf32, #tpu.memory_space<vmem>>, %arg6: memref<8x32xf32, #tpu.memory_space<vmem>>, %arg7: memref<8x1xf32, #tpu.memory_space<vmem>>, %arg8: memref<32x2xf32, #tpu.memory_space<vmem>>, %arg9: memref<2x512xf32, #tpu.memory_space<vmem>>, %arg10: memref<8x512xbf16, #tpu.memory_space<vmem>>) attributes {dimension_semantics = [#tpu.dimension_semantics<arbitrary>], iteration_bounds = array<i64: 1>, scalar_prefetch = 0 : i64, scratch_operands = 0 : i64, tpu.core_type = #tpu.core_type<tc>, window_params = [{pipeline_mode = #tpu.pipeline_mode<synchronous>, transform_indices = @transform_0, window_bounds = array<i64: 144, 512>}, {pipeline_mode = #tpu.pipeline_mode<synchronous>, transform_indices = @transform_1, window_bounds = array<i64: 8, 144>}, {pipeline_mode = #tpu.pipeline_mode<synchronous>, transform_indices = @transform_2, window_bounds = array<i64: 8, 1>}, {pipeline_mode = #tpu.pipeline_mode<synchronous>, transform_indices = @transform_3, window_bounds = array<i64: 8, 1>}, {pipeline_mode = #tpu.pipeline_mode<synchronous>, transform_indices = @transform_4, window_bounds = array<i64: 8, 1>}, {pipeline_mode = #tpu.pipeline_mode<synchronous>, transform_indices = @transform_5, window_bounds = array<i64: 8, 32>}, {pipeline_mode = #tpu.pipeline_mode<synchronous>, transform_indices = @transform_6, window_bounds = array<i64: 8, 1>}, {pipeline_mode = #tpu.pipeline_mode<synchronous>, transform_indices = @transform_7, window_bounds = array<i64: 32, 2>}, {pipeline_mode = #tpu.pipeline_mode<synchronous>, transform_indices = @transform_8, window_bounds = array<i64: 2, 512>}, {pipeline_mode = #tpu.pipeline_mode<synchronous>, transform_indices = @transform_9, window_bounds = array<i64: 8, 512>}]} {
    %c0 = arith.constant 0 : index
    %c0_0 = arith.constant 0 : index
    %0 = vector.load %arg2[%c0, %c0_0] : memref<8x144xbf16, #tpu.memory_space<vmem>>, vector<8x144xbf16>
    %c0_1 = arith.constant 0 : index
    %c0_2 = arith.constant 0 : index
    %1 = vector.load %arg1[%c0_1, %c0_2] : memref<144x512xbf16, #tpu.memory_space<vmem>>, vector<144x512xbf16>
    %cst = arith.constant dense<0.000000e+00> : vector<8x512xf32>
    %2 = tpu.matmul %0, %1, %cst {dimension_numbers = #tpu.dot_dimension_numbers<[1], [0], [0], [1], [0, 0, 1, 1], [], []>} : vector<8x144xbf16>, vector<144x512xbf16>, vector<8x512xf32> -> vector<8x512xf32>
    %c0_3 = arith.constant 0 : index
    %c0_4 = arith.constant 0 : index
    %3 = vector.load %arg3[%c0_3, %c0_4] : memref<8x1xf32, #tpu.memory_space<vmem>>, vector<8x1xf32>
    %4 = vector.broadcast %3 : vector<8x1xf32> to vector<8x512xf32>
    %5 = arith.addf %2, %4 : vector<8x512xf32>
    %c0_5 = arith.constant 0 : index
    %c0_6 = arith.constant 0 : index
    %6 = vector.load %arg6[%c0_5, %c0_6] : memref<8x32xf32, #tpu.memory_space<vmem>>, vector<8x32xf32>
    %c0_7 = arith.constant 0 : index
    %c0_8 = arith.constant 0 : index
    %7 = vector.load %arg8[%c0_7, %c0_8] : memref<32x2xf32, #tpu.memory_space<vmem>>, vector<32x2xf32>
    %cst_9 = arith.constant dense<0.000000e+00> : vector<8x2xf32>
    %8 = tpu.matmul %6, %7, %cst_9 {dimension_numbers = #tpu.dot_dimension_numbers<[1], [0], [0], [1], [0, 0, 1, 1], [], []>} : vector<8x32xf32>, vector<32x2xf32>, vector<8x2xf32> -> vector<8x2xf32>
    %c0_10 = arith.constant 0 : index
    %c0_11 = arith.constant 0 : index
    %9 = vector.load %arg7[%c0_10, %c0_11] : memref<8x1xf32, #tpu.memory_space<vmem>>, vector<8x1xf32>
    %10 = vector.broadcast %9 : vector<8x1xf32> to vector<8x2xf32>
    %11 = arith.addf %8, %10 : vector<8x2xf32>
    %c0_12 = arith.constant 0 : index
    %c0_13 = arith.constant 0 : index
    %12 = vector.load %arg9[%c0_12, %c0_13] : memref<2x512xf32, #tpu.memory_space<vmem>>, vector<2x512xf32>
    %cst_14 = arith.constant dense<0.000000e+00> : vector<8x512xf32>
    %13 = tpu.matmul %11, %12, %cst_14 {dimension_numbers = #tpu.dot_dimension_numbers<[1], [0], [0], [1], [0, 0, 1, 1], [], []>} : vector<8x2xf32>, vector<2x512xf32>, vector<8x512xf32> -> vector<8x512xf32>
    %c0_15 = arith.constant 0 : index
    %c0_16 = arith.constant 0 : index
    %14 = vector.load %arg4[%c0_15, %c0_16] : memref<8x1xf32, #tpu.memory_space<vmem>>, vector<8x1xf32>
    %c0_17 = arith.constant 0 : index
    %c0_18 = arith.constant 0 : index
    %15 = vector.load %arg5[%c0_17, %c0_18] : memref<8x1xf32, #tpu.memory_space<vmem>>, vector<8x1xf32>
    %cst_19 = arith.constant dense<0.000000e+00> : vector<8xf32>
    %16 = vector.multi_reduction <add>, %5, %cst_19 [1] : vector<8x512xf32> to vector<8xf32>
    %17 = vector.shape_cast %16 : vector<8xf32> to vector<8x1xf32>
    %cst_20 = arith.constant 0.001953125 : f32
    %18 = vector.broadcast %cst_20 : f32 to vector<8x1xf32>
    %19 = arith.mulf %17, %18 : vector<8x1xf32>
    %20 = arith.mulf %5, %5 : vector<8x512xf32>
    %cst_21 = arith.constant dense<0.000000e+00> : vector<8xf32>
    %21 = vector.multi_reduction <add>, %20, %cst_21 [1] : vector<8x512xf32> to vector<8xf32>
    %22 = vector.shape_cast %21 : vector<8xf32> to vector<8x1xf32>
    %cst_22 = arith.constant 0.001953125 : f32
    %23 = vector.broadcast %cst_22 : f32 to vector<8x1xf32>
    %24 = arith.mulf %22, %23 : vector<8x1xf32>
    %25 = arith.mulf %19, %19 : vector<8x1xf32>
    %26 = arith.subf %24, %25 : vector<8x1xf32>
    %27 = vector.broadcast %19 : vector<8x1xf32> to vector<8x512xf32>
    %28 = arith.subf %5, %27 : vector<8x512xf32>
    %cst_23 = arith.constant 9.99999974E-6 : f32
    %29 = vector.broadcast %cst_23 : f32 to vector<8x1xf32>
    %30 = arith.addf %26, %29 : vector<8x1xf32>
    %31 = math.rsqrt %30 : vector<8x1xf32>
    %32 = vector.broadcast %31 : vector<8x1xf32> to vector<8x512xf32>
    %33 = arith.mulf %28, %32 : vector<8x512xf32>
    %34 = vector.broadcast %14 : vector<8x1xf32> to vector<8x512xf32>
    %35 = arith.mulf %33, %34 : vector<8x512xf32>
    %36 = vector.broadcast %15 : vector<8x1xf32> to vector<8x512xf32>
    %37 = arith.addf %35, %36 : vector<8x512xf32>
    %38 = arith.addf %37, %13 : vector<8x512xf32>
    %cst_24 = arith.constant 0.000000e+00 : f32
    %39 = vector.broadcast %cst_24 : f32 to vector<8x512xf32>
    %40 = arith.maximumf %38, %39 : vector<8x512xf32>
    %41 = arith.truncf %40 : vector<8x512xf32> to vector<8x512xbf16>
    %c0_25 = arith.constant 0 : index
    %c0_26 = arith.constant 0 : index
    %42 = vector.load %arg10[%c0_25, %c0_26] : memref<8x512xbf16, #tpu.memory_space<vmem>>, vector<8x512xbf16>
    tpu.vector_store %arg10[%c0_25, %c0_26], %41 {strides = array<i32>} : memref<8x512xbf16, #tpu.memory_space<vmem>>, vector<8x512xbf16>,
    return
  }
  func.func @transform_0(%arg0: i32) -> (i32, i32) {
    %c0_i32 = arith.constant 0 : i32
    %c0_i32_0 = arith.constant 0 : i32
    %c0_i32_1 = arith.constant 0 : i32
    return %c0_i32, %c0_i32_0 : i32, i32
  }
  func.func @transform_1(%arg0: i32) -> (i32, i32) {
    %c0_i32 = arith.constant 0 : i32
    %c0_i32_0 = arith.constant 0 : i32
    %c0_i32_1 = arith.constant 0 : i32
    return %c0_i32, %c0_i32_0 : i32, i32
  }
  func.func @transform_2(%arg0: i32) -> (i32, i32) {
    %c0_i32 = arith.constant 0 : i32
    %c0_i32_0 = arith.constant 0 : i32
    %c0_i32_1 = arith.constant 0 : i32
    return %c0_i32, %c0_i32_0 : i32, i32
  }
  func.func @transform_3(%arg0: i32) -> (i32, i32) {
    %c0_i32 = arith.constant 0 : i32
    %c0_i32_0 = arith.constant 0 : i32
    %c0_i32_1 = arith.constant 0 : i32
    return %c0_i32, %c0_i32_0 : i32, i32
  }
  func.func @transform_4(%arg0: i32) -> (i32, i32) {
    %c0_i32 = arith.constant 0 : i32
    %c0_i32_0 = arith.constant 0 : i32
    %c0_i32_1 = arith.constant 0 : i32
    return %c0_i32, %c0_i32_0 : i32, i32
  }
  func.func @transform_5(%arg0: i32) -> (i32, i32) {
    %c0_i32 = arith.constant 0 : i32
    %c0_i32_0 = arith.constant 0 : i32
    %c0_i32_1 = arith.constant 0 : i32
    return %c0_i32, %c0_i32_0 : i32, i32
  }
  func.func @transform_6(%arg0: i32) -> (i32, i32) {
    %c0_i32 = arith.constant 0 : i32
    %c0_i32_0 = arith.constant 0 : i32
    %c0_i32_1 = arith.constant 0 : i32
    return %c0_i32, %c0_i32_0 : i32, i32
  }
  func.func @transform_7(%arg0: i32) -> (i32, i32) {
    %c0_i32 = arith.constant 0 : i32
    %c0_i32_0 = arith.constant 0 : i32
    %c0_i32_1 = arith.constant 0 : i32
    return %c0_i32, %c0_i32_0 : i32, i32
  }
  func.func @transform_8(%arg0: i32) -> (i32, i32) {
    %c0_i32 = arith.constant 0 : i32
    %c0_i32_0 = arith.constant 0 : i32
    %c0_i32_1 = arith.constant 0 : i32
    return %c0_i32, %c0_i32_0 : i32, i32
  }
  func.func @transform_9(%arg0: i32) -> (i32, i32) {
    %c0_i32 = arith.constant 0 : i32
    %c0_i32_0 = arith.constant 0 : i32
    %c0_i32_1 = arith.constant 0 : i32
    return %c0_i32, %c0_i32_0 : i32, i32
  }
}

module attributes {stable_mosaic.version = 11 : i64} {
  func.func @_conv_bn_relu_final_kernel(%arg0: i32, %arg1: memref<72x512xbf16, #tpu.memory_space<vmem>>, %arg2: memref<8x72xbf16, #tpu.memory_space<vmem>>, %arg3: memref<8x1xf32, #tpu.memory_space<vmem>>, %arg4: memref<8x1xf32, #tpu.memory_space<vmem>>, %arg5: memref<8x1xf32, #tpu.memory_space<vmem>>, %arg6: memref<3x8xf32, #tpu.memory_space<vmem>>, %arg7: memref<3x1xf32, #tpu.memory_space<vmem>>, %arg8: memref<3x512xf32, #tpu.memory_space<vmem>>) attributes {dimension_semantics = [#tpu.dimension_semantics<arbitrary>], iteration_bounds = array<i64: 1>, scalar_prefetch = 0 : i64, scratch_operands = 0 : i64, tpu.core_type = #tpu.core_type<tc>, window_params = [{pipeline_mode = #tpu.pipeline_mode<synchronous>, transform_indices = @transform_0, window_bounds = array<i64: 72, 512>}, {pipeline_mode = #tpu.pipeline_mode<synchronous>, transform_indices = @transform_1, window_bounds = array<i64: 8, 72>}, {pipeline_mode = #tpu.pipeline_mode<synchronous>, transform_indices = @transform_2, window_bounds = array<i64: 8, 1>}, {pipeline_mode = #tpu.pipeline_mode<synchronous>, transform_indices = @transform_3, window_bounds = array<i64: 8, 1>}, {pipeline_mode = #tpu.pipeline_mode<synchronous>, transform_indices = @transform_4, window_bounds = array<i64: 8, 1>}, {pipeline_mode = #tpu.pipeline_mode<synchronous>, transform_indices = @transform_5, window_bounds = array<i64: 3, 8>}, {pipeline_mode = #tpu.pipeline_mode<synchronous>, transform_indices = @transform_6, window_bounds = array<i64: 3, 1>}, {pipeline_mode = #tpu.pipeline_mode<synchronous>, transform_indices = @transform_7, window_bounds = array<i64: 3, 512>}]} {
    %c0 = arith.constant 0 : index
    %c0_0 = arith.constant 0 : index
    %0 = vector.load %arg2[%c0, %c0_0] : memref<8x72xbf16, #tpu.memory_space<vmem>>, vector<8x72xbf16>
    %c0_1 = arith.constant 0 : index
    %c0_2 = arith.constant 0 : index
    %1 = vector.load %arg1[%c0_1, %c0_2] : memref<72x512xbf16, #tpu.memory_space<vmem>>, vector<72x512xbf16>
    %cst = arith.constant dense<0.000000e+00> : vector<8x512xf32>
    %2 = tpu.matmul %0, %1, %cst {dimension_numbers = #tpu.dot_dimension_numbers<[1], [0], [0], [1], [0, 0, 1, 1], [], []>} : vector<8x72xbf16>, vector<72x512xbf16>, vector<8x512xf32> -> vector<8x512xf32>
    %c0_3 = arith.constant 0 : index
    %c0_4 = arith.constant 0 : index
    %3 = vector.load %arg3[%c0_3, %c0_4] : memref<8x1xf32, #tpu.memory_space<vmem>>, vector<8x1xf32>
    %4 = vector.broadcast %3 : vector<8x1xf32> to vector<8x512xf32>
    %5 = arith.addf %2, %4 : vector<8x512xf32>
    %c0_5 = arith.constant 0 : index
    %c0_6 = arith.constant 0 : index
    %6 = vector.load %arg4[%c0_5, %c0_6] : memref<8x1xf32, #tpu.memory_space<vmem>>, vector<8x1xf32>
    %c0_7 = arith.constant 0 : index
    %c0_8 = arith.constant 0 : index
    %7 = vector.load %arg5[%c0_7, %c0_8] : memref<8x1xf32, #tpu.memory_space<vmem>>, vector<8x1xf32>
    %cst_9 = arith.constant dense<0.000000e+00> : vector<8xf32>
    %8 = vector.multi_reduction <add>, %5, %cst_9 [1] : vector<8x512xf32> to vector<8xf32>
    %9 = vector.shape_cast %8 : vector<8xf32> to vector<8x1xf32>
    %cst_10 = arith.constant 0.001953125 : f32
    %10 = vector.broadcast %cst_10 : f32 to vector<8x1xf32>
    %11 = arith.mulf %9, %10 : vector<8x1xf32>
    %12 = arith.mulf %5, %5 : vector<8x512xf32>
    %cst_11 = arith.constant dense<0.000000e+00> : vector<8xf32>
    %13 = vector.multi_reduction <add>, %12, %cst_11 [1] : vector<8x512xf32> to vector<8xf32>
    %14 = vector.shape_cast %13 : vector<8xf32> to vector<8x1xf32>
    %cst_12 = arith.constant 0.001953125 : f32
    %15 = vector.broadcast %cst_12 : f32 to vector<8x1xf32>
    %16 = arith.mulf %14, %15 : vector<8x1xf32>
    %17 = arith.mulf %11, %11 : vector<8x1xf32>
    %18 = arith.subf %16, %17 : vector<8x1xf32>
    %19 = vector.broadcast %11 : vector<8x1xf32> to vector<8x512xf32>
    %20 = arith.subf %5, %19 : vector<8x512xf32>
    %cst_13 = arith.constant 9.99999974E-6 : f32
    %21 = vector.broadcast %cst_13 : f32 to vector<8x1xf32>
    %22 = arith.addf %18, %21 : vector<8x1xf32>
    %23 = math.rsqrt %22 : vector<8x1xf32>
    %24 = vector.broadcast %23 : vector<8x1xf32> to vector<8x512xf32>
    %25 = arith.mulf %20, %24 : vector<8x512xf32>
    %26 = vector.broadcast %6 : vector<8x1xf32> to vector<8x512xf32>
    %27 = arith.mulf %25, %26 : vector<8x512xf32>
    %28 = vector.broadcast %7 : vector<8x1xf32> to vector<8x512xf32>
    %29 = arith.addf %27, %28 : vector<8x512xf32>
    %cst_14 = arith.constant 0.000000e+00 : f32
    %30 = vector.broadcast %cst_14 : f32 to vector<8x512xf32>
    %31 = arith.maximumf %29, %30 : vector<8x512xf32>
    %c0_15 = arith.constant 0 : index
    %c0_16 = arith.constant 0 : index
    %32 = vector.load %arg6[%c0_15, %c0_16] : memref<3x8xf32, #tpu.memory_space<vmem>>, vector<3x8xf32>
    %cst_17 = arith.constant dense<0.000000e+00> : vector<3x512xf32>
    %33 = tpu.matmul %32, %31, %cst_17 {dimension_numbers = #tpu.dot_dimension_numbers<[1], [0], [0], [1], [0, 0, 1, 1], [], []>} : vector<3x8xf32>, vector<8x512xf32>, vector<3x512xf32> -> vector<3x512xf32>
    %c0_18 = arith.constant 0 : index
    %c0_19 = arith.constant 0 : index
    %34 = vector.load %arg7[%c0_18, %c0_19] : memref<3x1xf32, #tpu.memory_space<vmem>>, vector<3x1xf32>
    %35 = vector.broadcast %34 : vector<3x1xf32> to vector<3x512xf32>
    %36 = arith.addf %33, %35 : vector<3x512xf32>
    %c0_20 = arith.constant 0 : index
    %c0_21 = arith.constant 0 : index
    %37 = vector.load %arg8[%c0_20, %c0_21] : memref<3x512xf32, #tpu.memory_space<vmem>>, vector<3x512xf32>
    tpu.vector_store %arg8[%c0_20, %c0_21], %36 {strides = array<i32>} : memref<3x512xf32, #tpu.memory_space<vmem>>, vector<3x512xf32>,
    return
  }
  func.func @transform_0(%arg0: i32) -> (i32, i32) {
    %c0_i32 = arith.constant 0 : i32
    %c0_i32_0 = arith.constant 0 : i32
    %c0_i32_1 = arith.constant 0 : i32
    return %c0_i32, %c0_i32_0 : i32, i32
  }
  func.func @transform_1(%arg0: i32) -> (i32, i32) {
    %c0_i32 = arith.constant 0 : i32
    %c0_i32_0 = arith.constant 0 : i32
    %c0_i32_1 = arith.constant 0 : i32
    return %c0_i32, %c0_i32_0 : i32, i32
  }
  func.func @transform_2(%arg0: i32) -> (i32, i32) {
    %c0_i32 = arith.constant 0 : i32
    %c0_i32_0 = arith.constant 0 : i32
    %c0_i32_1 = arith.constant 0 : i32
    return %c0_i32, %c0_i32_0 : i32, i32
  }
  func.func @transform_3(%arg0: i32) -> (i32, i32) {
    %c0_i32 = arith.constant 0 : i32
    %c0_i32_0 = arith.constant 0 : i32
    %c0_i32_1 = arith.constant 0 : i32
    return %c0_i32, %c0_i32_0 : i32, i32
  }
  func.func @transform_4(%arg0: i32) -> (i32, i32) {
    %c0_i32 = arith.constant 0 : i32
    %c0_i32_0 = arith.constant 0 : i32
    %c0_i32_1 = arith.constant 0 : i32
    return %c0_i32, %c0_i32_0 : i32, i32
  }
  func.func @transform_5(%arg0: i32) -> (i32, i32) {
    %c0_i32 = arith.constant 0 : i32
    %c0_i32_0 = arith.constant 0 : i32
    %c0_i32_1 = arith.constant 0 : i32
    return %c0_i32, %c0_i32_0 : i32, i32
  }
  func.func @transform_6(%arg0: i32) -> (i32, i32) {
    %c0_i32 = arith.constant 0 : i32
    %c0_i32_0 = arith.constant 0 : i32
    %c0_i32_1 = arith.constant 0 : i32
    return %c0_i32, %c0_i32_0 : i32, i32
  }
  func.func @transform_7(%arg0: i32) -> (i32, i32) {
    %c0_i32 = arith.constant 0 : i32
    %c0_i32_0 = arith.constant 0 : i32
    %c0_i32_1 = arith.constant 0 : i32
    return %c0_i32, %c0_i32_0 : i32, i32
  }
}

</mosaic_0001>

<bundles_post_ra>
// kernel: diffusion_forward.32
= control target key start
LH: loop header
LB: loop body
LE: loop exit
PB: predicated region body
PF: predicated region fallthrough
CT: control target
= control target key end

     0   :  { %vm88_vm0 = vcmask 1044480   ;;  %vm89_vm1 = vcmask 1045504   ;;  %v589_v1 = vmov 65535   ;;  %v590_v3 = vmov 0   ;;  %s710_s0 = inlined_call_operand.vmem [shape: bf16[27,512], index: 0, kind: input, shape index: {}]   ;;  %s711_s7 = inlined_call_operand.vmem [shape: f32[32,2], index: 7, kind: input, shape index: {}]   ;;  %s712_s6 = inlined_call_operand.vmem [shape: f32[8,1], index: 6, kind: input, shape index: {}]   ;;  %s713_s1 = inlined_call_operand.vmem [shape: bf16[8,27], index: 1, kind: input, shape index: {}]   ;;  %s714_s2 = inlined_call_operand.vmem [shape: f32[8,1], index: 2, kind: input, shape index: {}]   ;;  %s715_s3 = inlined_call_operand.vmem [shape: f32[8,1], index: 3, kind: input, shape index: {}]   ;;  %s716_s5 = inlined_call_operand.vmem [shape: f32[8,32], index: 5, kind: input, shape index: {}]   ;;  %s717_s8 = inlined_call_operand.vmem [shape: f32[2,512], index: 8, kind: input, shape index: {}]   ;;  %s718_s4 = inlined_call_operand.vmem [shape: f32[8,1], index: 4, kind: input, shape index: {}]   ;;  %s719_s9 = inlined_call_operand.vmem [shape: bf16[8,512], index: 9, kind: output, shape index: {}]  }
   0x1   :  { %v574_v0 = vld [vmem:[%s710_s0 + $0x4] ss:$16 sps:$4 sm:$0xff]   ;;  %v90_v2 = vsel %vm88_vm0, 4294967295, %v589_v1  ;;  %136 = vmatprep.mubr.bf16.mxu0 %v590_v3  ;;  %177 = vmatprep.mubr.bf16.mxu1 %v590_v3  ;;  %v576_v4 = vld [vmem:[%s710_s0] ss:$16 sps:$4 sm:$0xff]   ;;  %v188_v13 = vld [vmem:[%s711_s7 + $0x8] sm:$0xff]  ;;  %v277_v31 = vlaneseq }
   0x2   :  { %572 = vset.pattern.permute.xlu0 %v590_v3  ;;  %573 = vset.pattern.permute.xlu1 %v590_v3  ;;  %v577_v5 = vld [vmem:[%s710_s0 + $0xc] ss:$16 sps:$4 sm:$0xff]   ;;  %v91_v6 = vsel %vm89_vm1, %v90_v2, 0  ;;  %v579_v7 = vld [vmem:[%s710_s0 + $0x24] ss:$16 sps:$4 sm:$0x3f]  }
   0x3   :  { %104 = vmatprep.subr.bf16.mxu0 %v574_v0  ;;  %v581_v8 = vld [vmem:[%s710_s0 + $0x8] ss:$16 sps:$4 sm:$0xff]   ;;  %145 = vmatprep.subr.bf16.mxu1 %v577_v5  ;;  %v582_v9 = vld [vmem:[%s710_s0 + $0x20] ss:$16 sps:$4 sm:$0x3f]   ;;  %v96_v10 = vand.u32 %v579_v7, %v91_v6  ;;  %vm84_vm2 = vcmask 220160  }
   0x4   :  { %105 = vmatpush1.bf16.msra.mxu0 %v576_v4  ;;  %146 = vmatpush1.bf16.msra.mxu1 %v581_v8  ;;  %v583_v11 = vld [vmem:[%s710_s0 + $0x2c] ss:$16 sps:$4 sm:$0x3f]   ;;  %v187_v12 = vld [vmem:[%s711_s7] sm:$0xff]  ;;  %v93_v14 = vand.u32 %v582_v9, %v91_v6  ;;  %v591_v21 = vmov 0.0|0.0   ;;  %v189_v22 = vld [vmem:[%s711_s7 + $0x10] sm:$0xff] }
   0x5   :  { %v585_v15 = vld [vmem:[%s710_s0 + $0x28] ss:$16 sps:$4 sm:$0x3f]   ;;  %106 = vmatprep.subr.bf16.mxu0 %v96_v10  ;;  %v102_v16 = vand.u32 %v583_v11, %v91_v6  ;;  %v191_v17 = vld [vmem:[%s712_s6] sm:$0xff]  ;;  %v561_v20 = vpack.c.bf16 %v188_v13, %v187_v12  ;;  %vm592_vm3 = vmmov 0   ;;  %v593_v26 = vmov 0.0  }
   0x6   :  { %v33_v18 = vld [vmem:[%s713_s1] sm:$0xf]  ;;  %v99_v19 = vand.u32 %v585_v15, %v91_v6  ;;  %194 = vperm.xlu0 %572, %v191_v17   ;;  %v190_v23 = vld [vmem:[%s711_s7 + $0x18] sm:$0xff]  ;;  %vm197_vm4 = vcmask 261120   ;;  %v594_v29 = vmov 1983009808  }
   0x7   :  { %147 = vmatprep.subr.bf16.mxu1 %v102_v16  ;;  %v42_v24 = vld [vmem:[%s714_s2] sm:$0xff]  ;;  %v564_v25 = vpack.c.bf16 %v190_v23, %v189_v22  ;;  %v275_v30 = vunpack.c.l.s4 %v594_v29  ;;  %v278_v33 = vshrl.u32 %v277_v31, 7  ;;  %vm294_vm5 = vcmask 1041408  }
   0x8   :  { %107 = vmatpush1.bf16.msra.mxu0 %v93_v14  ;;  %148 = vmatpush1.bf16.msra.mxu1 %v99_v19  ;;  %v445_v27 = vld [vmem:[%s715_s3] sm:$0xff]  ;;  %vm290_vm6 = vcmask 15360  }
   0x9   :  { %560 = vmatprep.subr.bf16.mxu0 %v591_v21  ;;  %v186_v28 = vld [vmem:[%s716_s5] sm:$0xff]  ;;  %v276_v32 = vunpack.c.0.s8 %v275_v30 }
   0xa   :  { %45 = vperm.xlu0 %572, %v42_v24   ;;  %v271_v34 = vld [vmem:[%s717_s8] sm:$0xff] }
   0xb   :  { %531 = vmatmul.mubr.msk.bf16.vlgmr.msra.gmra.mrb[0].mxu0 %vm84_vm2, %v33_v18  ;;  %532 = vmatmul.mubr.msk.bf16.vlgmr.msra.gmra.mrb[0].mxu1 %vm84_vm2, %v33_v18  ;;  %v279_v35 = vsub.s32 %v276_v32, %v278_v33  ;;  %v273_v36 = vcombine.high %v271_v34, %v271_v34  ;;  %v446_v4 = vld [vmem:[%s718_s4] sm:$0xff] }
   0xc   :  { %562 = vmatpush3.bf16.msra.mxu0 %v561_v20  ;;  %557 = vmatprep.mubr.msk.f32.mxu0 %vm592_vm3, %v593_v26 }
   0xd   :  { %563 = vmatprep.subr.bf16.mxu0 %v591_v21  ;;  %367 = vmatprep.mubr.f32.mxu1 %v593_v26  ;;  %v280_v37 = vrot.slane %v271_v34, %v279_v35  ;;  %v287_v38 = vrot.slane %v273_v36, %v279_v35 }
   0xe   :  { %477 = vperm.xlu0 %572, %v445_v27  }
   0xf   :  { %v288_v39 = vcombine.high %v280_v37, %v280_v37  ;;  %v289_v40 = vcombine.high %v287_v38, %v287_v38 }
  0x10   :  { %565 = vmatpush3.bf16.msra.mxu0 %v564_v25 }
  0x11   :  { %534 = vmatprep.subr.msk.mxu1 %vm294_vm5, %v288_v39  ;;  %537 = vmatprep.subr.msk.mxu0 %vm294_vm5, %v289_v40 }
  0x12   :  { %535 = vmatpush1.msk.msra.mxu1 %vm294_vm5, %v280_v37 }
  0x13   :  { %558 = vmatmul.mubr.msk.f32.vlgmr.msra.gmra.mrb[4].mxu0 %vm197_vm4, %v186_v28 }
  0x14   :  { %438 = vmatprep.mubr.f32.mxu0 %v593_v26  ;;  %538 = vmatpush1.msk.msra.mxu0 %vm294_vm5, %v287_v38 }
  0x85   :  { %v195_v41 = vpop.permute.xlu0 %194 }
  0x89   :  { %v46_v42 = vpop.permute.xlu0 %45 }
  0x8d   :  { %v478_v21 = vpop.permute.xlu0 %477 }
  0xde   :  { %v138_v43 = vpop.f32.mrb[0].mxu0  ;;  %v179_v48 = vpop.f32.mrb[0].mxu1 }
  0xdf   :  { %v139_v44 = vadd.f32 %v138_v43, %v46_v42  ;;  %v140_v45 = vpop.f32.mrb[1].mxu0  ;;  %v180_v50 = vadd.f32 %v179_v48, %v46_v42  ;;  %v181_v51 = vpop.f32.mrb[1].mxu1 }
  0xe0   :  { %v141_v46 = vadd.f32 %v140_v45, %v46_v42  ;;  %v142_v47 = vpop.f32.mrb[2].mxu0  ;;  %v182_v54 = vadd.f32 %v181_v51, %v46_v42  ;;  %v183_v56 = vpop.f32.mrb[2].mxu1 }
  0xe1   :  { %v143_v49 = vpop.f32.mrb[3].mxu0  ;;  %v453_v52 = vmul.f32 %v139_v44, %v139_v44  ;;  %v455_v57 = vmul.f32 %v180_v50, %v180_v50  ;;  %v184_v58 = vpop.f32.mrb[3].mxu1 }
  0xe2   :  { %v454_v53 = vmul.f32 %v141_v46, %v141_v46  ;;  %v447_v55 = vadd.f32 %v141_v46, %v139_v44  ;;  %v456_v63 = vmul.f32 %v182_v54, %v182_v54 }
  0xe4   :  { %v448_v59 = vadd.f32 %v447_v55, %v180_v50  ;;  %v457_v60 = vadd.f32 %v454_v53, %v453_v52 }
  0xe6   :  { %v267_v61 = vpop.f32.mrb[4].mxu0  ;;  %v449_v62 = vadd.f32 %v448_v59, %v182_v54  ;;  %v458_v0 = vadd.f32 %v457_v60, %v455_v57 }
  0xe7   :  { %v268_v1 = vadd.f32 %v267_v61, %v195_v41  ;;  %v559_v2 = vpop.f32.mrb[5].mxu0 }
  0xe8   :  { %450 = vadd.xlane.f32.xlu1 %v449_v62  ;;  %v459_v3 = vadd.f32 %v458_v0, %v456_v63 }
  0xe9   :  { %536 = vmatmul.mubr.msk.f32.vlgmr.msra.gmra.mrb[4].mxu1 %vm290_vm6, %v268_v1  ;;  %539 = vmatmul.mubr.msk.f32.vlgmr.msra.gmra.mrb[6].mxu0 %vm290_vm6, %v268_v1 }
  0xec   :  { %460 = vadd.xlane.f32.xlu1 %v459_v3 }
  0xfd   :  { %486 = vperm.xlu1 %573, %v446_v4  }
 0x175   :  { %v451_v5 = vpop.xlane.xlu1 %450 }
 0x176   :  { %v452_v7 = vmul.f32 0.001953125, %v451_v5 }
 0x178   :  { %v463_v9 = vmul.f32 %v452_v7, %v452_v7  ;;  %v465_v13 = vsub.f32 %v139_v44, %v452_v7  ;;  %v467_v14 = vsub.f32 %v180_v50, %v452_v7  ;;  %v466_v15 = vsub.f32 %v141_v46, %v452_v7 }
 0x179   :  { %v461_v6 = vpop.xlane.xlu1 %460  ;;  %v468_v16 = vsub.f32 %v182_v54, %v452_v7 }
 0x17a   :  { %v462_v8 = vmul.f32 0.001953125, %v461_v6 }
 0x17c   :  { %v464_v10 = vsub.f32 %v462_v8, %v463_v9 }
 0x17d   :  { %v487_v24 = vpop.permute.xlu1 %486 }
 0x17e   :  { %v469_v11 = vadd.f32 1e-05, %v464_v10 }
 0x180   :  { %587 = vrsqrt.f32 %v469_v11 }
 0x18a   :  { %v588_v12 = vpop.eup %587 }
 0x18b   :  { %v471_v17 = vmul.f32 %v588_v12, %v465_v13  ;;  %v473_v18 = vmul.f32 %v588_v12, %v467_v14  ;;  %v472_v19 = vmul.f32 %v588_v12, %v466_v15  ;;  %v474_v20 = vmul.f32 %v588_v12, %v468_v16 }
 0x18d   :  { %v480_v22 = vmul.f32 %v478_v21, %v471_v17  ;;  %v482_v23 = vmul.f32 %v478_v21, %v473_v18  ;;  %v481_v25 = vmul.f32 %v478_v21, %v472_v19  ;;  %v483_v26 = vmul.f32 %v478_v21, %v474_v20 }
 0x18f   :  { %v489_v27 = vadd.f32 %v487_v24, %v480_v22  ;;  %v491_v28 = vadd.f32 %v487_v24, %v482_v23  ;;  %v490_v31 = vadd.f32 %v487_v24, %v481_v25  ;;  %v492_v32 = vadd.f32 %v487_v24, %v483_v26 }
 0x1bc   :  { %v369_v29 = vpop.f32.mrb[4].mxu1  ;;  %v440_v30 = vpop.f32.mrb[6].mxu0 }
 0x1bd   :  { %v493_v33 = vadd.f32 %v489_v27, %v369_v29  ;;  %v495_v34 = vadd.f32 %v491_v28, %v440_v30  ;;  %v371_v35 = vpop.f32.mrb[5].mxu1  ;;  %v442_v36 = vpop.f32.mrb[7].mxu0 }
 0x1be   :  { %v494_v37 = vadd.f32 %v490_v31, %v371_v35  ;;  %v496_v38 = vadd.f32 %v492_v32, %v442_v36 }
 0x1bf   :  { %v497_v39 = vmax.f32 %v493_v33, 0.0  ;;  %v499_v40 = vmax.f32 %v495_v34, 0.0 }
 0x1c0   :  { %v498_v41 = vmax.f32 %v494_v37, 0.0  ;;  %v500_v42 = vmax.f32 %v496_v38, 0.0 }
 0x1c2   :  { %v542_v43 = vpack.c.bf16 %v498_v41, %v497_v39  ;;  %v543_v44 = vpack.c.bf16 %v500_v42, %v499_v40 }
 0x1c4   :  { %517 = vst [vmem:[%s719_s9] sm:$0xff] %v542_v43  ;;  %518 = vst [vmem:[%s719_s9 + $0x8] sm:$0xff] %v543_v44 }

// kernel: diffusion_forward.33
= control target key start
LH: loop header
LB: loop body
LE: loop exit
PB: predicated region body
PF: predicated region fallthrough
CT: control target
= control target key end

     0   :  { %v370_v1 = vmov 0   ;;  %vm140_vm0 = vcmask 1043456   ;;  %vm136_vm1 = vcmask 588800   ;;  %s473_s0 = inlined_call_operand.vmem [shape: bf16[72,512], index: 0, kind: input, shape index: {}]   ;;  %s474_s2 = inlined_call_operand.vmem [shape: f32[8,1], index: 2, kind: input, shape index: {}]   ;;  %s475_s3 = inlined_call_operand.vmem [shape: f32[8,1], index: 3, kind: input, shape index: {}]   ;;  %s476_s1 = inlined_call_operand.vmem [shape: bf16[8,72], index: 1, kind: input, shape index: {}]   ;;  %s477_s4 = inlined_call_operand.vmem [shape: f32[8,1], index: 4, kind: input, shape index: {}]   ;;  %s478_s5 = inlined_call_operand.vmem [shape: bf16[8,512], index: 5, kind: output, shape index: {}]  }
   0x1   :  { %v340_v0 = vld [vmem:[%s473_s0 + $0x4] ss:$16 sps:$4 sm:$0xff]   ;;  %185 = vmatprep.mubr.bf16.mxu0 %v370_v1  ;;  %226 = vmatprep.mubr.bf16.mxu1 %v370_v1  ;;  %v342_v2 = vld [vmem:[%s473_s0 + $0xc] ss:$16 sps:$4 sm:$0xff]   ;;  %v344_v3 = vld [vmem:[%s473_s0] ss:$16 sps:$4 sm:$0xff]  }
   0x2   :  { %338 = vset.pattern.permute.xlu0 %v370_v1  ;;  %339 = vset.pattern.permute.xlu1 %v370_v1  ;;  %v345_v4 = vld [vmem:[%s473_s0 + $0x8] ss:$16 sps:$4 sm:$0xff]   ;;  %v346_v5 = vld [vmem:[%s473_s0 + $0x24] ss:$16 sps:$4 sm:$0xff]   ;;  %v348_v6 = vld [vmem:[%s473_s0 + $0x2c] ss:$16 sps:$4 sm:$0xff]  }
   0x3   :  { %153 = vmatprep.subr.bf16.mxu0 %v340_v0  ;;  %194 = vmatprep.subr.bf16.mxu1 %v342_v2  ;;  %v350_v7 = vld [vmem:[%s473_s0 + $0x20] ss:$16 sps:$4 sm:$0xff]   ;;  %v351_v8 = vld [vmem:[%s473_s0 + $0x28] ss:$16 sps:$4 sm:$0xff]   ;;  %v352_v9 = vld [vmem:[%s473_s0 + $0x44] ss:$16 sps:$4 sm:$0xff]  }
   0x4   :  { %154 = vmatpush1.bf16.msra.mxu0 %v344_v3  ;;  %195 = vmatpush1.bf16.msra.mxu1 %v345_v4  ;;  %v354_v10 = vld [vmem:[%s473_s0 + $0x4c] ss:$16 sps:$4 sm:$0xff]   ;;  %v356_v11 = vld [vmem:[%s473_s0 + $0x40] ss:$16 sps:$4 sm:$0xff]   ;;  %v357_v12 = vld [vmem:[%s473_s0 + $0x48] ss:$16 sps:$4 sm:$0xff]  }
   0x5   :  { %155 = vmatprep.subr.bf16.mxu0 %v346_v5  ;;  %196 = vmatprep.subr.bf16.mxu1 %v348_v6  ;;  %v358_v13 = vld [vmem:[%s473_s0 + $0x64] ss:$16 sps:$4 sm:$0xff]   ;;  %v360_v14 = vld [vmem:[%s473_s0 + $0x6c] ss:$16 sps:$4 sm:$0xff]   ;;  %v362_v18 = vld [vmem:[%s473_s0 + $0x60] ss:$16 sps:$4 sm:$0xff]  }
   0x6   :  { %v38_v15 = vld [vmem:[%s473_s0 + $0x80] sm:$0xff]  ;;  %v39_v16 = vld [vmem:[%s473_s0 + $0x88] sm:$0xff] }
   0x7   :  { %v40_v17 = vld [vmem:[%s474_s2] sm:$0xff]  ;;  %v363_v19 = vld [vmem:[%s473_s0 + $0x68] ss:$16 sps:$4 sm:$0xff]   ;;  %v326_v20 = vcombine.high %v38_v15, %v38_v15  ;;  %v328_v22 = vcombine.high %v39_v16, %v39_v16  ;;  %v325_v23 = vcombine.low %v38_v15, %v38_v15  ;;  %v327_v24 = vcombine.low %v39_v16, %v39_v16 }
   0x8   :  { %156 = vmatpush1.bf16.msra.mxu0 %v350_v7  ;;  %197 = vmatpush1.bf16.msra.mxu1 %v351_v8  ;;  %v235_v21 = vld [vmem:[%s475_s3] sm:$0xff] }
   0x9   :  { %157 = vmatprep.subr.bf16.mxu0 %v352_v9  ;;  %198 = vmatprep.subr.bf16.mxu1 %v354_v10  ;;  %v142_v25 = vsel %vm140_vm0, %v325_v23, 0  ;;  %v148_v26 = vsel %vm140_vm0, %v327_v24, 0  ;;  %v21_v27 = vld [vmem:[%s476_s1] sm:$0xf] }
   0xa   :  { %43 = vperm.xlu0 %338, %v40_v17   ;;  %267 = vperm.xlu1 %339, %v235_v21   ;;  %v236_v51 = vld [vmem:[%s477_s4] sm:$0xff] }
   0xc   :  { %158 = vmatpush1.bf16.msra.mxu0 %v356_v11  ;;  %199 = vmatpush1.bf16.msra.mxu1 %v357_v12 }
   0xd   :  { %159 = vmatprep.subr.bf16.mxu0 %v358_v13  ;;  %200 = vmatprep.subr.bf16.mxu1 %v360_v14 }
  0x10   :  { %160 = vmatpush1.bf16.msra.mxu0 %v362_v18  ;;  %201 = vmatpush1.bf16.msra.mxu1 %v363_v19 }
  0x11   :  { %329 = vmatprep.subr.msk.bf16.mxu0 %vm140_vm0, %v326_v20  ;;  %331 = vmatprep.subr.msk.bf16.mxu1 %vm140_vm0, %v328_v22 }
  0x14   :  { %162 = vmatpush1.bf16.msra.mxu0 %v142_v25  ;;  %203 = vmatpush1.bf16.msra.mxu1 %v148_v26 }
  0x17   :  { %330 = vmatmul.mubr.msk.bf16.vlgmr.msra.gmra.mrb[0].mxu0 %vm136_vm1, %v21_v27  ;;  %332 = vmatmul.mubr.msk.bf16.vlgmr.msra.gmra.mrb[0].mxu1 %vm136_vm1, %v21_v27 }
  0x89   :  { %v44_v28 = vpop.permute.xlu0 %43  ;;  %v268_v52 = vpop.permute.xlu1 %267 }
  0xea   :  { %v187_v29 = vpop.f32.mrb[0].mxu0  ;;  %v228_v30 = vpop.f32.mrb[0].mxu1 }
  0xeb   :  { %v188_v31 = vadd.f32 %v187_v29, %v44_v28  ;;  %v189_v32 = vpop.f32.mrb[1].mxu0  ;;  %v230_v33 = vpop.f32.mrb[1].mxu1  ;;  %v229_v34 = vadd.f32 %v228_v30, %v44_v28 }
  0xec   :  { %v190_v35 = vadd.f32 %v189_v32, %v44_v28  ;;  %v191_v36 = vpop.f32.mrb[2].mxu0  ;;  %v232_v37 = vpop.f32.mrb[2].mxu1  ;;  %v231_v43 = vadd.f32 %v230_v33, %v44_v28 }
  0xed   :  { %v243_v38 = vmul.f32 %v188_v31, %v188_v31  ;;  %v192_v39 = vpop.f32.mrb[3].mxu0  ;;  %v233_v40 = vpop.f32.mrb[3].mxu1  ;;  %v245_v44 = vmul.f32 %v229_v34, %v229_v34 }
  0xee   :  { %v237_v41 = vadd.f32 %v190_v35, %v188_v31  ;;  %v244_v42 = vmul.f32 %v190_v35, %v190_v35  ;;  %v246_v48 = vmul.f32 %v231_v43, %v231_v43 }
  0xf0   :  { %v238_v45 = vadd.f32 %v237_v41, %v229_v34  ;;  %v247_v46 = vadd.f32 %v244_v42, %v243_v38 }
  0xf2   :  { %v239_v47 = vadd.f32 %v238_v45, %v231_v43  ;;  %v248_v49 = vadd.f32 %v247_v46, %v245_v44 }
  0xf4   :  { %240 = vadd.xlane.f32.xlu0 %v239_v47  ;;  %v249_v50 = vadd.f32 %v248_v49, %v246_v48 }
  0xf6   :  { %250 = vadd.xlane.f32.xlu1 %v249_v50 }
 0x107   :  { %276 = vperm.xlu1 %339, %v236_v51  }
 0x181   :  { %v241_v53 = vpop.xlane.xlu0 %240 }
 0x182   :  { %v242_v54 = vmul.f32 0.001953125, %v241_v53 }
 0x183   :  { %v251_v55 = vpop.xlane.xlu1 %250 }
 0x184   :  { %v252_v56 = vmul.f32 0.001953125, %v251_v55  ;;  %v253_v57 = vmul.f32 %v242_v54, %v242_v54  ;;  %v255_v60 = vsub.f32 %v188_v31, %v242_v54  ;;  %v256_v61 = vsub.f32 %v190_v35, %v242_v54 }
 0x185   :  { %v257_v62 = vsub.f32 %v229_v34, %v242_v54  ;;  %v258_v63 = vsub.f32 %v231_v43, %v242_v54 }
 0x186   :  { %v254_v58 = vsub.f32 %v252_v56, %v253_v57 }
 0x187   :  { %v277_v9 = vpop.permute.xlu1 %276 }
 0x188   :  { %v259_v59 = vadd.f32 1e-05, %v254_v58 }
 0x18a   :  { %368 = vrsqrt.f32 %v259_v59 }
 0x194   :  { %v369_v0 = vpop.eup %368 }
 0x195   :  { %v261_v1 = vmul.f32 %v369_v0, %v255_v60  ;;  %v262_v2 = vmul.f32 %v369_v0, %v256_v61  ;;  %v263_v3 = vmul.f32 %v369_v0, %v257_v62  ;;  %v264_v4 = vmul.f32 %v369_v0, %v258_v63 }
 0x197   :  { %v270_v5 = vmul.f32 %v268_v52, %v261_v1  ;;  %v271_v6 = vmul.f32 %v268_v52, %v262_v2  ;;  %v272_v7 = vmul.f32 %v268_v52, %v263_v3  ;;  %v273_v8 = vmul.f32 %v268_v52, %v264_v4 }
 0x199   :  { %v279_v10 = vadd.f32 %v277_v9, %v270_v5  ;;  %v280_v11 = vadd.f32 %v277_v9, %v271_v6  ;;  %v281_v12 = vadd.f32 %v277_v9, %v272_v7  ;;  %v282_v13 = vadd.f32 %v277_v9, %v273_v8 }
 0x19b   :  { %v283_v14 = vmax.f32 %v279_v10, 0.0  ;;  %v284_v15 = vmax.f32 %v280_v11, 0.0  ;;  %v285_v16 = vmax.f32 %v281_v12, 0.0  ;;  %v286_v17 = vmax.f32 %v282_v13, 0.0 }
 0x19d   :  { %v335_v18 = vpack.c.bf16 %v284_v15, %v283_v14  ;;  %v336_v19 = vpack.c.bf16 %v286_v17, %v285_v16 }
 0x19f   :  { %303 = vst [vmem:[%s478_s5] sm:$0xff] %v335_v18  ;;  %304 = vst [vmem:[%s478_s5 + $0x8] sm:$0xff] %v336_v19 }

// kernel: diffusion_forward.34
= control target key start
LH: loop header
LB: loop body
LE: loop exit
PB: predicated region body
PF: predicated region fallthrough
CT: control target
= control target key end

     0   :  { %v485_v0 = vmov 0.0   ;;  %vm486_vm0 = vmmov 0   ;;  %vm155_vm1 = vcmask 261120   ;;  %v487_v7 = vmov 0   ;;  %s606_s0 = inlined_call_operand.vmem [shape: bf16[72,128], index: 0, kind: input, shape index: {}]   ;;  %s607_s7 = inlined_call_operand.vmem [shape: f32[32,2], index: 7, kind: input, shape index: {}]   ;;  %s608_s5 = inlined_call_operand.vmem [shape: f32[16,32], index: 5, kind: input, shape index: {}]   ;;  %s609_s6 = inlined_call_operand.vmem [shape: f32[16,1], index: 6, kind: input, shape index: {}]   ;;  %s610_s1 = inlined_call_operand.vmem [shape: bf16[16,72], index: 1, kind: input, shape index: {}]   ;;  %s611_s2 = inlined_call_operand.vmem [shape: f32[16,1], index: 2, kind: input, shape index: {}]   ;;  %s612_s3 = inlined_call_operand.vmem [shape: f32[16,1], index: 3, kind: input, shape index: {}]   ;;  %s613_s8 = inlined_call_operand.vmem [shape: f32[2,128], index: 8, kind: input, shape index: {}]   ;;  %s614_s4 = inlined_call_operand.vmem [shape: f32[16,1], index: 4, kind: input, shape index: {}]   ;;  %s615_s9 = inlined_call_operand.vmem [shape: bf16[16,128], index: 9, kind: output, shape index: {}]  }
   0x1   :  { %432 = vmatprep.subr.bf16.mxu0 %v485_v0  ;;  %v475_v1 = vld [vmem:[%s606_s0] sm:$0xff]   ;;  %442 = vmatprep.mubr.msk.bf16.mxu0 %vm486_vm0, %v485_v0  ;;  %v140_v3 = vld [vmem:[%s607_s7 + $0x8] sm:$0xff]  ;;  %v141_v6 = vld [vmem:[%s607_s7 + $0x10] sm:$0xff]  ;;  %vm92_vm2 = vcmask 1043456   ;;  %vm88_vm3 = vcmask 588800   ;;  %vm245_vm4 = vcmask 1041408  }
   0x2   :  { %v139_v2 = vld [vmem:[%s607_s7] sm:$0xff]  ;;  %433 = vmatpush3.bf16.msra.mxu0 %v475_v1  ;;  %v476_v5 = vld [vmem:[%s606_s0 + $0x8] sm:$0xff]   ;;  %473 = vset.pattern.permute.xlu0 %v487_v7  ;;  %v142_v8 = vld [vmem:[%s607_s7 + $0x18] sm:$0xff]  ;;  %vm238_vm5 = vcmask 15360  }
   0x3   :  { %v462_v4 = vpack.c.bf16 %v140_v3, %v139_v2  ;;  %434 = vmatprep.subr.bf16.mxu0 %v485_v0  ;;  %v137_v9 = vld [vmem:[%s608_s5] sm:$0xff]  ;;  %474 = vset.pattern.permute.xlu1 %v487_v7  ;;  %v466_v10 = vpack.c.bf16 %v142_v8, %v141_v6  ;;  %v477_v11 = vld [vmem:[%s606_s0 + $0x10] sm:$0xff]   ;;  %v138_v14 = vld [vmem:[%s608_s5 + $0x8] sm:$0xff] }
   0x4   :  { %454 = vmatprep.mubr.msk.f32.mxu1 %vm155_vm1, %v137_v9  ;;  %v143_v12 = vld [vmem:[%s609_s6] sm:$0xff]  ;;  %v144_v15 = vld [vmem:[%s609_s6 + $0x8] sm:$0xff]  ;;  %v478_v16 = vld [vmem:[%s606_s0 + $0x18] sm:$0xff]  }
   0x5   :  { %463 = vmatprep.subr.bf16.mxu1 %v462_v4  ;;  %147 = vperm.xlu0 %473, %v143_v12   ;;  %v44_v13 = vld [vmem:[%s611_s2] sm:$0xff]  ;;  %v45_v17 = vld [vmem:[%s611_s2 + $0x8] sm:$0xff] }
   0x6   :  { %465 = vmatpush3.bf16.msra.mxu1 %v462_v4  ;;  %435 = vmatpush3.bf16.msra.mxu0 %v476_v5  ;;  %v479_v18 = vld [vmem:[%s606_s0 + $0x20] ss:$0 sps:$4 sm:$0xff]   ;;  %v327_v40 = vld [vmem:[%s614_s4 + $0x8] sm:$0xff] }
   0x7   :  { %467 = vmatprep.subr.bf16.mxu1 %v466_v10  ;;  %436 = vmatprep.subr.bf16.mxu0 %v485_v0  ;;  %v324_v19 = vld [vmem:[%s612_s3] sm:$0xff]  ;;  %v94_v20 = vsel %vm92_vm2, %v479_v18, 0  ;;  %v325_v41 = vld [vmem:[%s612_s3 + $0x8] sm:$0xff] }
   0x8   :  { %48 = vperm.xlu1 %474, %v44_v13   ;;  %v480_v21 = vld [vmem:[%s610_s1] sm:$0xff]  }
   0x9   :  { %152 = vperm.xlu0 %473, %v144_v15   ;;  %v237_v22 = vld [vmem:[%s613_s8] sm:$0x3] }
   0xa   :  { %469 = vmatpush3.bf16.msra.mxu1 %v466_v10  ;;  %437 = vmatpush3.bf16.msra.mxu0 %v477_v11  ;;  %v326_v39 = vld [vmem:[%s614_s4] sm:$0xff] }
   0xb   :  { %438 = vmatprep.subr.bf16.mxu0 %v485_v0  ;;  %457 = vmatprep.subr.msk.mxu1 %vm245_vm4, %v237_v22 }
   0xc   :  { %53 = vperm.xlu1 %474, %v45_v17  }
   0xd   :  { %455 = vmatmul.mubr.msk.f32.vlgmr.msra.gmra.mrb[0].mxu1 %vm155_vm1, %v138_v14 }
   0xe   :  { %439 = vmatpush3.bf16.msra.mxu0 %v478_v16  ;;  %458 = vmatpush3.msk.msra.mxu1 %vm245_vm4, %v237_v22 }
   0xf   :  { %440 = vmatprep.subr.bf16.mxu0 %v485_v0 }
  0x10   :  { %356 = vperm.xlu1 %474, %v324_v19  }
  0x12   :  { %441 = vmatpush3.bf16.msra.mxu0 %v94_v20 }
  0x15   :  { %443 = vmatmul.mubr.msk.bf16.vlgmr.msra.gmra.mrb[0].mxu0 %vm88_vm3, %v480_v21 }
  0x84   :  { %v148_v23 = vpop.permute.xlu0 %147 }
  0x87   :  { %v49_v29 = vpop.permute.xlu1 %48 }
  0x88   :  { %v153_v26 = vpop.permute.xlu0 %152 }
  0x8b   :  { %v54_v31 = vpop.permute.xlu1 %53 }
  0x8f   :  { %v357_v43 = vpop.permute.xlu1 %356 }
  0xe0   :  { %v456_v24 = vpop.f32.mrb[0].mxu1 }
  0xe1   :  { %v228_v25 = vpop.f32.mrb[1].mxu1  ;;  %v234_v28 = vadd.f32 %v456_v24, %v153_v26 }
  0xe2   :  { %v229_v27 = vadd.f32 %v228_v25, %v148_v23 }
  0xe4   :  { %459 = vmatprep.mubr.msk.f32.mxu1 %vm238_vm5, %v229_v27 }
  0xe5   :  { %460 = vmatmul.mubr.msk.f32.vlgmr.msra.gmra.mrb[2].mxu1 %vm238_vm5, %v234_v28 }
  0xe8   :  { %v130_v30 = vpop.f32.mrb[0].mxu0 }
  0xe9   :  { %v131_v32 = vadd.f32 %v130_v30, %v49_v29  ;;  %v444_v33 = vpop.f32.mrb[1].mxu0 }
  0xea   :  { %v133_v34 = vpop.f32.mrb[2].mxu0 }
  0xeb   :  { %v134_v35 = vadd.f32 %v133_v34, %v54_v31  ;;  %328 = vadd.xlane.f32.xlu0 %v131_v32  ;;  %v334_v36 = vmul.f32 %v131_v32, %v131_v32  ;;  %v445_v37 = vpop.f32.mrb[3].mxu0 }
  0xed   :  { %330 = vadd.xlane.f32.xlu1 %v134_v35  ;;  %v335_v38 = vmul.f32 %v134_v35, %v134_v35 }
  0xef   :  { %336 = vadd.xlane.f32.xlu0 %v334_v36 }
  0xf3   :  { %338 = vadd.xlane.f32.xlu0 %v335_v38 }
  0xfe   :  { %368 = vperm.xlu1 %474, %v326_v39  }
 0x102   :  { %373 = vperm.xlu1 %474, %v327_v40  }
 0x109   :  { %361 = vperm.xlu0 %473, %v325_v41  }
 0x178   :  { %v329_v42 = vpop.xlane.xlu0 %328 }
 0x179   :  { %v332_v48 = vmul.f32 0.0078125, %v329_v42 }
 0x17a   :  { %v331_v45 = vpop.xlane.xlu1 %330 }
 0x17b   :  { %v333_v47 = vmul.f32 0.0078125, %v331_v45  ;;  %v342_v51 = vmul.f32 %v332_v48, %v332_v48  ;;  %v346_v60 = vsub.f32 %v131_v32, %v332_v48 }
 0x17c   :  { %v337_v44 = vpop.xlane.xlu0 %336 }
 0x17d   :  { %v343_v49 = vmul.f32 %v333_v47, %v333_v47  ;;  %v340_v52 = vmul.f32 0.0078125, %v337_v44  ;;  %v347_v59 = vsub.f32 %v134_v35, %v333_v47 }
 0x17e   :  { %v369_v63 = vpop.permute.xlu1 %368 }
 0x17f   :  { %v344_v54 = vsub.f32 %v340_v52, %v342_v51 }
 0x180   :  { %v339_v46 = vpop.xlane.xlu0 %338 }
 0x181   :  { %v341_v50 = vmul.f32 0.0078125, %v339_v46  ;;  %v348_v56 = vadd.f32 1e-05, %v344_v54 }
 0x182   :  { %v374_v3 = vpop.permute.xlu1 %373 }
 0x183   :  { %v345_v53 = vsub.f32 %v341_v50, %v343_v49 }
 0x185   :  { %v349_v55 = vadd.f32 1e-05, %v345_v53 }
 0x187   :  { %481 = vrsqrt.f32 %v349_v55 }
 0x188   :  { %483 = vrsqrt.f32 %v348_v56  ;;  %v362_v0 = vpop.permute.xlu0 %361 }
 0x191   :  { %v482_v57 = vpop.eup %481 }
 0x192   :  { %v484_v58 = vpop.eup %483  ;;  %v353_v61 = vmul.f32 %v482_v57, %v347_v59 }
 0x193   :  { %v352_v62 = vmul.f32 %v484_v58, %v346_v60 }
 0x194   :  { %v365_v1 = vmul.f32 %v362_v0, %v353_v61 }
 0x195   :  { %v364_v2 = vmul.f32 %v357_v43, %v352_v62 }
 0x196   :  { %v377_v4 = vadd.f32 %v374_v3, %v365_v1 }
 0x197   :  { %v376_v5 = vadd.f32 %v369_v63, %v364_v2 }
 0x1b8   :  { %v461_v6 = vpop.f32.mrb[2].mxu1 }
 0x1b9   :  { %v379_v7 = vadd.f32 %v461_v6, %v377_v4  ;;  %v315_v8 = vpop.f32.mrb[3].mxu1 }
 0x1ba   :  { %v378_v9 = vadd.f32 %v376_v5, %v315_v8 }
 0x1bb   :  { %v381_v10 = vmax.f32 %v379_v7, 0.0 }
 0x1bc   :  { %v380_v11 = vmax.f32 %v378_v9, 0.0 }
 0x1be   :  { %v415_v12 = vpack.c.bf16 %v381_v10, %v380_v11 }
 0x1c0   :  { %416 = vst [vmem:[%s615_s9] sm:$0xff] %v415_v12  }

// kernel: diffusion_forward.35
= control target key start
LH: loop header
LB: loop body
LE: loop exit
PB: predicated region body
PF: predicated region fallthrough
CT: control target
= control target key end

     0   :  { %v271_v0 = vmov 0   ;;  %vm116_vm0 = vcmask 130048   ;;  %s356_s0 = inlined_call_operand.vmem [shape: bf16[144,128], index: 0, kind: input, shape index: {}]   ;;  %s357_s1 = inlined_call_operand.vmem [shape: bf16[16,144], index: 1, kind: input, shape index: {}]   ;;  %s358_s2 = inlined_call_operand.vmem [shape: f32[16,1], index: 2, kind: input, shape index: {}]   ;;  %s359_s3 = inlined_call_operand.vmem [shape: f32[16,1], index: 3, kind: input, shape index: {}]   ;;  %s360_s4 = inlined_call_operand.vmem [shape: f32[16,1], index: 4, kind: input, shape index: {}]   ;;  %s361_s5 = inlined_call_operand.vmem [shape: bf16[16,128], index: 5, kind: output, shape index: {}]  }
   0x1   :  { %120 = vmatprep.subr.bf16.mxu0 %v271_v0  ;;  %v255_v1 = vld [vmem:[%s356_s0] sm:$0xff]   ;;  %253 = vset.pattern.permute.xlu0 %v271_v0  ;;  %v256_v2 = vld [vmem:[%s356_s0 + $0x8] sm:$0xff]   ;;  %v257_v3 = vld [vmem:[%s356_s0 + $0x10] sm:$0xff]  }
   0x2   :  { %254 = vset.pattern.permute.xlu1 %v271_v0  ;;  %121 = vmatpush1.bf16.msra.mxu0 %v255_v1  ;;  %v258_v4 = vld [vmem:[%s356_s0 + $0x18] sm:$0xff]   ;;  %v266_v5 = vld [vmem:[%s357_s1 + $0x4] ss:$8 sps:$4 sm:$0xff]   ;;  %v261_v10 = vld [vmem:[%s356_s0 + $0x30] sm:$0xff]  }
   0x3   :  { %122 = vmatprep.subr.bf16.mxu0 %v271_v0  ;;  %v41_v6 = vld [vmem:[%s358_s2] sm:$0xff]  ;;  %242 = vmatprep.mubr.msk.bf16.mxu0 %vm116_vm0, %v266_v5  ;;  %v42_v7 = vld [vmem:[%s358_s2 + $0x8] sm:$0xff]  ;;  %v262_v11 = vld [vmem:[%s356_s0 + $0x38] sm:$0xff]  }
   0x4   :  { %45 = vperm.xlu0 %253, %v41_v6   ;;  %v259_v8 = vld [vmem:[%s356_s0 + $0x20] sm:$0xff]   ;;  %v260_v9 = vld [vmem:[%s356_s0 + $0x28] sm:$0xff]  }
   0x5   :  { %v263_v12 = vld [vmem:[%s356_s0 + $0x40] sm:$0xff]   ;;  %v162_v24 = vld [vmem:[%s359_s3 + $0x8] sm:$0xff] }
   0x6   :  { %123 = vmatpush1.bf16.msra.mxu0 %v256_v2  ;;  %v264_v13 = vld [vmem:[%s357_s1] ss:$8 sps:$4 sm:$0xff]  }
   0x7   :  { %124 = vmatprep.subr.bf16.mxu0 %v271_v0  ;;  %v161_v23 = vld [vmem:[%s359_s3] sm:$0xff]  ;;  %v164_v27 = vld [vmem:[%s360_s4 + $0x8] sm:$0xff] }
   0x8   :  { %50 = vperm.xlu0 %253, %v42_v7   ;;  %v163_v25 = vld [vmem:[%s360_s4] sm:$0xff] }
   0xa   :  { %125 = vmatpush1.bf16.msra.mxu0 %v257_v3 }
   0xb   :  { %126 = vmatprep.subr.bf16.mxu0 %v271_v0 }
   0xe   :  { %127 = vmatpush1.bf16.msra.mxu0 %v258_v4 }
   0xf   :  { %128 = vmatprep.subr.bf16.mxu0 %v271_v0 }
  0x12   :  { %129 = vmatpush1.bf16.msra.mxu0 %v259_v8 }
  0x13   :  { %130 = vmatprep.subr.bf16.mxu0 %v271_v0 }
  0x16   :  { %131 = vmatpush1.bf16.msra.mxu0 %v260_v9 }
  0x17   :  { %132 = vmatprep.subr.bf16.mxu0 %v271_v0 }
  0x1a   :  { %133 = vmatpush1.bf16.msra.mxu0 %v261_v10 }
  0x1b   :  { %134 = vmatprep.subr.bf16.mxu0 %v271_v0 }
  0x1e   :  { %135 = vmatpush1.bf16.msra.mxu0 %v262_v11 }
  0x1f   :  { %136 = vmatprep.subr.bf16.mxu0 %v271_v0 }
  0x22   :  { %137 = vmatpush1.bf16.msra.mxu0 %v263_v12 }
  0x25   :  { %153 = vmatmul.mubr.bf16.vlgmr.msra.gmra.mrb[0].mxu0 %v264_v13 }
  0x83   :  { %v46_v14 = vpop.permute.xlu0 %45 }
  0x87   :  { %v51_v21 = vpop.permute.xlu0 %50 }
  0xf8   :  { %v154_v15 = vpop.f32.mrb[0].mxu0 }
  0xf9   :  { %v155_v16 = vadd.f32 %v154_v15, %v46_v14  ;;  %v156_v17 = vpop.f32.mrb[1].mxu0 }
  0xfa   :  { %v157_v18 = vpop.f32.mrb[2].mxu0 }
  0xfb   :  { %v159_v19 = vpop.f32.mrb[3].mxu0  ;;  %165 = vadd.xlane.f32.xlu1 %v155_v16  ;;  %v171_v20 = vmul.f32 %v155_v16, %v155_v16  ;;  %v158_v22 = vadd.f32 %v157_v18, %v51_v21 }
  0xfd   :  { %173 = vadd.xlane.f32.xlu0 %v171_v20  ;;  %v172_v26 = vmul.f32 %v158_v22, %v158_v22 }
  0xff   :  { %167 = vadd.xlane.f32.xlu1 %v158_v22 }
 0x110   :  { %193 = vperm.xlu1 %254, %v161_v23  }
 0x114   :  { %198 = vperm.xlu1 %254, %v162_v24  }
 0x118   :  { %205 = vperm.xlu1 %254, %v163_v25  }
 0x13c   :  { %175 = vadd.xlane.f32.xlu1 %v172_v26 }
 0x14d   :  { %210 = vperm.xlu1 %254, %v164_v27  }
 0x188   :  { %v166_v28 = vpop.xlane.xlu1 %165 }
 0x189   :  { %v169_v30 = vmul.f32 0.0078125, %v166_v28 }
 0x18a   :  { %v174_v31 = vpop.xlane.xlu0 %173 }
 0x18b   :  { %v179_v33 = vmul.f32 %v169_v30, %v169_v30  ;;  %v177_v34 = vmul.f32 0.0078125, %v174_v31  ;;  %v183_v46 = vsub.f32 %v155_v16, %v169_v30 }
 0x18c   :  { %v168_v29 = vpop.xlane.xlu1 %167 }
 0x18d   :  { %v181_v36 = vsub.f32 %v177_v34, %v179_v33  ;;  %v170_v39 = vmul.f32 0.0078125, %v168_v29 }
 0x18f   :  { %v185_v37 = vadd.f32 1e-05, %v181_v36  ;;  %v180_v41 = vmul.f32 %v170_v39, %v170_v39  ;;  %v184_v48 = vsub.f32 %v158_v22, %v170_v39 }
 0x190   :  { %v194_v32 = vpop.permute.xlu1 %193 }
 0x191   :  { %267 = vrsqrt.f32 %v185_v37 }
 0x194   :  { %v199_v35 = vpop.permute.xlu1 %198 }
 0x198   :  { %v206_v38 = vpop.permute.xlu1 %205 }
 0x19b   :  { %v268_v45 = vpop.eup %267 }
 0x19c   :  { %v189_v47 = vmul.f32 %v268_v45, %v183_v46 }
 0x19e   :  { %v201_v49 = vmul.f32 %v194_v32, %v189_v47 }
 0x1a0   :  { %v213_v52 = vadd.f32 %v206_v38, %v201_v49 }
 0x1a2   :  { %v215_v56 = vmax.f32 %v213_v52, 0.0 }
 0x1c9   :  { %v176_v40 = vpop.xlane.xlu1 %175 }
 0x1ca   :  { %v178_v42 = vmul.f32 0.0078125, %v176_v40 }
 0x1cc   :  { %v182_v43 = vsub.f32 %v178_v42, %v180_v41 }
 0x1cd   :  { %v211_v54 = vpop.permute.xlu1 %210 }
 0x1ce   :  { %v186_v44 = vadd.f32 1e-05, %v182_v43 }
 0x1d0   :  { %269 = vrsqrt.f32 %v186_v44 }
 0x1da   :  { %v270_v50 = vpop.eup %269 }
 0x1db   :  { %v190_v51 = vmul.f32 %v270_v50, %v184_v48 }
 0x1dd   :  { %v202_v53 = vmul.f32 %v199_v35, %v190_v51 }
 0x1df   :  { %v214_v55 = vadd.f32 %v211_v54, %v202_v53 }
 0x1e1   :  { %v216_v57 = vmax.f32 %v214_v55, 0.0 }
 0x1e3   :  { %v250_v58 = vpack.c.bf16 %v216_v57, %v215_v56 }
 0x1e5   :  { %251 = vst [vmem:[%s361_s5] sm:$0xff] %v250_v58  }

// kernel: diffusion_forward.36
= control target key start
LH: loop header
LB: loop body
LE: loop exit
PB: predicated region body
PF: predicated region fallthrough
CT: control target
= control target key end

     0   :  { %v690_v0 = vmov 0   ;;  %vm239_vm0 = vcmask 261120   ;;  %vm151_vm1 = vcmask 130048   ;;  %vm351_vm2 = vcmask 1041408   ;;  %s916_s0 = inlined_call_operand.vmem [shape: bf16[144,32], index: 0, kind: input, shape index: {}]   ;;  %s917_s7 = inlined_call_operand.vmem [shape: f32[32,2], index: 7, kind: input, shape index: {}]   ;;  %s918_s5 = inlined_call_operand.vmem [shape: f32[32,32], index: 5, kind: input, shape index: {}]   ;;  %s919_s1 = inlined_call_operand.vmem [shape: bf16[32,144], index: 1, kind: input, shape index: {}]   ;;  %s920_s6 = inlined_call_operand.vmem [shape: f32[32,1], index: 6, kind: input, shape index: {}]   ;;  %s921_s2 = inlined_call_operand.vmem [shape: f32[32,1], index: 2, kind: input, shape index: {}]   ;;  %s922_s3 = inlined_call_operand.vmem [shape: f32[32,1], index: 3, kind: input, shape index: {}]   ;;  %s923_s4 = inlined_call_operand.vmem [shape: f32[32,1], index: 4, kind: input, shape index: {}]   ;;  %s924_s8 = inlined_call_operand.vmem [shape: f32[2,32], index: 8, kind: input, shape index: {}]   ;;  %s925_s9 = inlined_call_operand.vmem [shape: bf16[32,32], index: 9, kind: output, shape index: {}]  }
   0x1   :  { %158 = vmatprep.subr.bf16.mxu0 %v690_v0  ;;  %v667_v1 = vld [vmem:[%s916_s0] sm:$0xff]   ;;  %666 = vset.pattern.permute.xlu1 %v690_v0  ;;  %v212_v3 = vld [vmem:[%s917_s7 + $0x8] sm:$0xff]  ;;  %v213_v6 = vld [vmem:[%s917_s7 + $0x10] sm:$0xff]  ;;  %vm338_vm3 = vcmask 15360   ;;  %vm580_vm4 = vcmask 257024  }
   0x2   :  { %v211_v2 = vld [vmem:[%s917_s7] sm:$0xff]  ;;  %665 = vset.pattern.permute.xlu0 %v690_v0  ;;  %159 = vmatpush1.bf16.msra.mxu0 %v667_v1  ;;  %v668_v5 = vld [vmem:[%s916_s0 + $0x8] sm:$0xff]   ;;  %v214_v7 = vld [vmem:[%s917_s7 + $0x18] sm:$0xff] }
   0x3   :  { %v656_v4 = vpack.c.bf16 %v212_v3, %v211_v2  ;;  %160 = vmatprep.subr.bf16.mxu0 %v690_v0  ;;  %v207_v8 = vld [vmem:[%s918_s5] sm:$0xff]  ;;  %v660_v9 = vpack.c.bf16 %v214_v7, %v213_v6  ;;  %v669_v10 = vld [vmem:[%s916_s0 + $0x10] sm:$0xff]   ;;  %v208_v11 = vld [vmem:[%s918_s5 + $0x8] sm:$0xff] }
   0x4   :  { %642 = vmatprep.mubr.msk.f32.mxu1 %vm239_vm0, %v207_v8  ;;  %v209_v12 = vld [vmem:[%s918_s5 + $0x10] sm:$0xff]  ;;  %v670_v13 = vld [vmem:[%s916_s0 + $0x18] sm:$0xff]   ;;  %v678_v14 = vld [vmem:[%s919_s1 + $0x4] ss:$8 sps:$4 sm:$0xff]  }
   0x5   :  { %657 = vmatprep.subr.bf16.mxu1 %v656_v4  ;;  %v210_v15 = vld [vmem:[%s918_s5 + $0x18] sm:$0xff]  ;;  %v671_v16 = vld [vmem:[%s916_s0 + $0x20] sm:$0xff]   ;;  %602 = vmatprep.mubr.msk.bf16.mxu0 %vm151_vm1, %v678_v14  ;;  %v217_v17 = vld [vmem:[%s920_s6 + $0x10] sm:$0xff] }
   0x6   :  { %659 = vmatpush3.bf16.msra.mxu1 %v656_v4  ;;  %161 = vmatpush1.bf16.msra.mxu0 %v668_v5  ;;  %v215_v18 = vld [vmem:[%s920_s6] sm:$0xff]  ;;  %v218_v19 = vld [vmem:[%s920_s6 + $0x18] sm:$0xff]  ;;  %v216_v20 = vld [vmem:[%s920_s6 + $0x8] sm:$0xff] }
   0x7   :  { %661 = vmatprep.subr.bf16.mxu1 %v660_v9  ;;  %162 = vmatprep.subr.bf16.mxu0 %v690_v0  ;;  %v672_v21 = vld [vmem:[%s916_s0 + $0x28] sm:$0xff]   ;;  %v55_v23 = vld [vmem:[%s921_s2] sm:$0xff]  ;;  %v673_v24 = vld [vmem:[%s916_s0 + $0x30] sm:$0xff]  }
   0x8   :  { %231 = vperm.xlu1 %666, %v217_v17   ;;  %221 = vperm.xlu0 %665, %v215_v18   ;;  %v56_v22 = vld [vmem:[%s921_s2 + $0x8] sm:$0xff]  ;;  %v58_v25 = vld [vmem:[%s921_s2 + $0x18] sm:$0xff]  ;;  %v57_v26 = vld [vmem:[%s921_s2 + $0x10] sm:$0xff] }
   0x9   :  { %v674_v27 = vld [vmem:[%s916_s0 + $0x38] sm:$0xff]   ;;  %v440_v28 = vld [vmem:[%s922_s3] sm:$0xff]  ;;  %v441_v29 = vld [vmem:[%s922_s3 + $0x8] sm:$0xff] }
   0xa   :  { %663 = vmatpush3.bf16.msra.mxu1 %v660_v9  ;;  %163 = vmatpush1.bf16.msra.mxu0 %v669_v10  ;;  %v675_v30 = vld [vmem:[%s916_s0 + $0x40] sm:$0xff]   ;;  %v442_v31 = vld [vmem:[%s922_s3 + $0x10] sm:$0xff]  ;;  %v443_v36 = vld [vmem:[%s922_s3 + $0x18] sm:$0xff] }
   0xb   :  { %164 = vmatprep.subr.bf16.mxu0 %v690_v0  ;;  %v676_v32 = vld [vmem:[%s919_s1] ss:$8 sps:$4 sm:$0xff]   ;;  %v679_v34 = vld [vmem:[%s919_s1 + $0x14] ss:$8 sps:$4 sm:$0xff]   ;;  %v681_v38 = vld [vmem:[%s919_s1 + $0x10] ss:$8 sps:$4 sm:$0xff]  }
   0xc   :  { %236 = vperm.xlu1 %666, %v218_v19   ;;  %226 = vperm.xlu0 %665, %v216_v20   ;;  %v444_v33 = vld [vmem:[%s923_s4] sm:$0xff]  ;;  %v445_v37 = vld [vmem:[%s923_s4 + $0x8] sm:$0xff] }
   0xd   :  { %643 = vmatmul.mubr.msk.f32.vlgmr.msra.gmra.mrb[0].mxu1 %vm239_vm0, %v208_v11  ;;  %v337_v35 = vld [vmem:[%s924_s8] sm:$0x3] }
   0xe   :  { %645 = vmatprep.mubr.msk.f32.mxu1 %vm239_vm0, %v209_v12  ;;  %165 = vmatpush1.bf16.msra.mxu0 %v670_v13 }
   0xf   :  { %166 = vmatprep.subr.bf16.mxu0 %v690_v0  ;;  %648 = vmatprep.subr.msk.mxu1 %vm351_vm2, %v337_v35 }
  0x10   :  { %66 = vperm.xlu1 %666, %v56_v22   ;;  %61 = vperm.xlu0 %665, %v55_v23  }
  0x11   :  { %646 = vmatmul.mubr.msk.f32.gmra.mrb[2].mxu1 %vm239_vm0, %v210_v15  ;;  %v447_v15 = vld [vmem:[%s923_s4 + $0x18] sm:$0xff] }
  0x12   :  { %167 = vmatpush1.bf16.msra.mxu0 %v671_v16  ;;  %649 = vmatpush3.msk.msra.mxu1 %vm351_vm2, %v337_v35  ;;  %v446_v16 = vld [vmem:[%s923_s4 + $0x10] sm:$0xff] }
  0x13   :  { %168 = vmatprep.subr.bf16.mxu0 %v690_v0 }
  0x14   :  { %76 = vperm.xlu1 %666, %v58_v25   ;;  %71 = vperm.xlu0 %665, %v57_v26  }
  0x16   :  { %169 = vmatpush1.bf16.msra.mxu0 %v672_v21 }
  0x17   :  { %170 = vmatprep.subr.bf16.mxu0 %v690_v0 }
  0x18   :  { %510 = vperm.xlu1 %666, %v440_v28   ;;  %515 = vperm.xlu0 %665, %v441_v29  }
  0x1a   :  { %171 = vmatpush1.bf16.msra.mxu0 %v673_v24 }
  0x1b   :  { %172 = vmatprep.subr.bf16.mxu0 %v690_v0 }
  0x1c   :  { %520 = vperm.xlu1 %666, %v442_v31   ;;  %534 = vperm.xlu0 %665, %v444_v33  }
  0x1e   :  { %173 = vmatpush1.bf16.msra.mxu0 %v674_v27 }
  0x1f   :  { %174 = vmatprep.subr.bf16.mxu0 %v690_v0 }
  0x20   :  { %525 = vperm.xlu1 %666, %v443_v36  }
  0x22   :  { %175 = vmatpush1.bf16.msra.mxu0 %v675_v30 }
  0x24   :  { %539 = vperm.xlu1 %666, %v445_v37  }
  0x25   :  { %191 = vmatmul.mubr.bf16.vlgmr.msra.gmra.mrb[0].mxu0 %v676_v32 }
  0x26   :  { %603 = vmatprep.mubr.msk.bf16.mxu0 %vm151_vm1, %v679_v34 }
  0x2d   :  { %199 = vmatmul.mubr.bf16.gmra.mrb[4].mxu0 %v681_v38 }
  0x87   :  { %v222_v39 = vpop.permute.xlu0 %221  ;;  %v232_v40 = vpop.permute.xlu1 %231 }
  0x8b   :  { %v227_v43 = vpop.permute.xlu0 %226  ;;  %v237_v48 = vpop.permute.xlu1 %236 }
  0x8f   :  { %v62_v51 = vpop.permute.xlu0 %61  ;;  %v67_v55 = vpop.permute.xlu1 %66 }
  0x93   :  { %v72_v0 = vpop.permute.xlu0 %71  ;;  %v77_v5 = vpop.permute.xlu1 %76 }
  0x97   :  { %v511_v17 = vpop.permute.xlu1 %510  ;;  %v516_v19 = vpop.permute.xlu0 %515 }
  0x9b   :  { %v521_v18 = vpop.permute.xlu1 %520  ;;  %v535_v21 = vpop.permute.xlu0 %534 }
  0x9f   :  { %v526_v20 = vpop.permute.xlu1 %525 }
  0xa3   :  { %v540_v22 = vpop.permute.xlu1 %539 }
  0xe0   :  { %v644_v41 = vpop.f32.mrb[0].mxu1 }
  0xe1   :  { %v318_v42 = vpop.f32.mrb[1].mxu1  ;;  %v324_v45 = vadd.f32 %v644_v41, %v227_v43 }
  0xe2   :  { %v319_v44 = vadd.f32 %v318_v42, %v222_v39 }
  0xe4   :  { %v647_v46 = vpop.f32.mrb[2].mxu1  ;;  %650 = vmatprep.mubr.msk.f32.mxu1 %vm338_vm3, %v319_v44 }
  0xe5   :  { %v328_v47 = vpop.f32.mrb[3].mxu1  ;;  %651 = vmatmul.mubr.msk.f32.vlgmr.msra.gmra.mrb[4].mxu1 %vm338_vm3, %v324_v45  ;;  %v334_v50 = vadd.f32 %v647_v46, %v237_v48 }
  0xe6   :  { %v329_v49 = vadd.f32 %v328_v47, %v232_v40 }
  0xe8   :  { %653 = vmatprep.mubr.msk.f32.mxu1 %vm338_vm3, %v329_v49 }
  0xe9   :  { %654 = vmatmul.mubr.msk.f32.gmra.mrb[6].mxu1 %vm338_vm3, %v334_v50 }
  0xf8   :  { %v192_v52 = vpop.f32.mrb[0].mxu0 }
  0xf9   :  { %v866_v53 = vadd.f32 %v192_v52, %v62_v51  ;;  %v194_v54 = vpop.f32.mrb[1].mxu0 }
  0xfa   :  { %v195_v56 = vpop.f32.mrb[2].mxu0 }
  0xfb   :  { %v868_v57 = vadd.f32 %v195_v56, %v67_v55  ;;  %v448_v58 = vsel %vm239_vm0, %v866_v53, 0.0  ;;  %v197_v59 = vpop.f32.mrb[3].mxu0  ;;  %v464_v62 = vmul.f32 %v866_v53, %v866_v53 }
  0xfc   :  { %449 = vadd.xlane.f32.xlu0 %v448_v58 }
  0xfd   :  { %v451_v60 = vsel %vm239_vm0, %v868_v57, 0.0  ;;  %v465_v61 = vmul.f32 %v868_v57, %v868_v57  ;;  %v468_v4 = vsel %vm239_vm0, %v464_v62, 0.0 }
  0xfe   :  { %452 = vadd.xlane.f32.xlu1 %v451_v60 }
  0xff   :  { %v471_v63 = vsel %vm239_vm0, %v465_v61, 0.0 }
 0x100   :  { %v200_v1 = vpop.f32.mrb[4].mxu0  ;;  %472 = vadd.xlane.f32.xlu0 %v471_v63 }
 0x101   :  { %v879_v2 = vadd.f32 %v200_v1, %v72_v0  ;;  %v202_v3 = vpop.f32.mrb[5].mxu0 }
 0x102   :  { %v203_v6 = vpop.f32.mrb[6].mxu0  ;;  %469 = vadd.xlane.f32.xlu1 %v468_v4 }
 0x103   :  { %v882_v7 = vadd.f32 %v203_v6, %v77_v5  ;;  %v454_v8 = vsel %vm239_vm0, %v879_v2, 0.0  ;;  %v466_v9 = vmul.f32 %v879_v2, %v879_v2  ;;  %v205_v10 = vpop.f32.mrb[7].mxu0 }
 0x104   :  { %455 = vadd.xlane.f32.xlu0 %v454_v8 }
 0x105   :  { %v474_v11 = vsel %vm239_vm0, %v466_v9, 0.0  ;;  %v457_v12 = vsel %vm239_vm0, %v882_v7, 0.0  ;;  %v467_v13 = vmul.f32 %v882_v7, %v882_v7 }
 0x106   :  { %475 = vadd.xlane.f32.xlu1 %v474_v11 }
 0x107   :  { %v477_v14 = vsel %vm239_vm0, %v467_v13, 0.0 }
 0x108   :  { %458 = vadd.xlane.f32.xlu0 %v457_v12 }
 0x10c   :  { %478 = vadd.xlane.f32.xlu0 %v477_v14 }
 0x117   :  { %549 = vperm.xlu1 %666, %v447_v15  }
 0x122   :  { %544 = vperm.xlu0 %665, %v446_v16  }
 0x189   :  { %v450_v23 = vpop.xlane.xlu0 %449 }
 0x18a   :  { %v460_v29 = vmul.f32 0.03125, %v450_v23 }
 0x18b   :  { %v453_v24 = vpop.xlane.xlu1 %452 }
 0x18c   :  { %v461_v26 = vmul.f32 0.03125, %v453_v24  ;;  %v484_v37 = vmul.f32 %v460_v29, %v460_v29  ;;  %v492_v55 = vsub.f32 %v866_v53, %v460_v29 }
 0x18d   :  { %v473_v25 = vpop.xlane.xlu0 %472 }
 0x18e   :  { %v485_v30 = vmul.f32 %v461_v26, %v461_v26  ;;  %v481_v31 = vmul.f32 0.03125, %v473_v25  ;;  %v493_v54 = vsub.f32 %v868_v57, %v461_v26 }
 0x18f   :  { %v470_v27 = vpop.xlane.xlu1 %469 }
 0x190   :  { %v480_v33 = vmul.f32 0.03125, %v470_v27  ;;  %v489_v38 = vsub.f32 %v481_v31, %v485_v30 }
 0x191   :  { %v456_v28 = vpop.xlane.xlu0 %455 }
 0x192   :  { %v462_v34 = vmul.f32 0.03125, %v456_v28  ;;  %v488_v40 = vsub.f32 %v480_v33, %v484_v37  ;;  %v497_v45 = vadd.f32 1e-05, %v489_v38 }
 0x193   :  { %v476_v35 = vpop.xlane.xlu1 %475 }
 0x194   :  { %v486_v41 = vmul.f32 %v462_v34, %v462_v34  ;;  %v482_v42 = vmul.f32 0.03125, %v476_v35  ;;  %v496_v47 = vadd.f32 1e-05, %v488_v40  ;;  %682 = vrsqrt.f32 %v497_v45 }
 0x195   :  { %v459_v32 = vpop.xlane.xlu0 %458  ;;  %v494_v62 = vsub.f32 %v879_v2, %v462_v34 }
 0x196   :  { %v463_v36 = vmul.f32 0.03125, %v459_v32  ;;  %v490_v48 = vsub.f32 %v482_v42, %v486_v41  ;;  %684 = vrsqrt.f32 %v496_v47 }
 0x197   :  { %v550_v53 = vpop.permute.xlu1 %549 }
 0x198   :  { %v487_v44 = vmul.f32 %v463_v36, %v463_v36  ;;  %v498_v50 = vadd.f32 1e-05, %v490_v48  ;;  %v495_v61 = vsub.f32 %v882_v7, %v463_v36 }
 0x199   :  { %v479_v39 = vpop.xlane.xlu0 %478 }
 0x19a   :  { %v483_v43 = vmul.f32 0.03125, %v479_v39 }
 0x19c   :  { %v491_v46 = vsub.f32 %v483_v43, %v487_v44 }
 0x19e   :  { %v499_v49 = vadd.f32 1e-05, %v491_v46  ;;  %v683_v51 = vpop.eup %682 }
 0x19f   :  { %v505_v56 = vmul.f32 %v683_v51, %v493_v54 }
 0x1a0   :  { %686 = vrsqrt.f32 %v499_v49  ;;  %v685_v52 = vpop.eup %684 }
 0x1a1   :  { %688 = vrsqrt.f32 %v498_v50  ;;  %v504_v59 = vmul.f32 %v685_v52, %v492_v55  ;;  %v529_v63 = vmul.f32 %v516_v19, %v505_v56  ;;  %v545_v12 = vpop.permute.xlu0 %544 }
 0x1a3   :  { %v528_v3 = vmul.f32 %v511_v17, %v504_v59  ;;  %v553_v4 = vadd.f32 %v540_v22, %v529_v63 }
 0x1a5   :  { %v552_v9 = vadd.f32 %v535_v21, %v528_v3 }
 0x1aa   :  { %v687_v58 = vpop.eup %686 }
 0x1ab   :  { %v689_v60 = vpop.eup %688  ;;  %v507_v0 = vmul.f32 %v687_v58, %v495_v61 }
 0x1ac   :  { %v506_v1 = vmul.f32 %v689_v60, %v494_v62 }
 0x1ad   :  { %v531_v5 = vmul.f32 %v526_v20, %v507_v0 }
 0x1ae   :  { %v530_v6 = vmul.f32 %v521_v18, %v506_v1 }
 0x1af   :  { %v555_v14 = vadd.f32 %v550_v53, %v531_v5 }
 0x1b0   :  { %v554_v15 = vadd.f32 %v545_v12, %v530_v6 }
 0x1b8   :  { %v652_v8 = vpop.f32.mrb[4].mxu1 }
 0x1b9   :  { %v557_v57 = vadd.f32 %v652_v8, %v553_v4  ;;  %v421_v10 = vpop.f32.mrb[5].mxu1 }
 0x1ba   :  { %v556_v11 = vadd.f32 %v552_v9, %v421_v10 }
 0x1bb   :  { %v561_v13 = vmax.f32 %v557_v57, 0.0 }
 0x1bc   :  { %v560_v7 = vmax.f32 %v556_v11, 0.0  ;;  %v655_v2 = vpop.f32.mrb[6].mxu1 }
 0x1bd   :  { %v618_v16 = vpack.c.bf16 %v561_v13, %v561_v13  ;;  %v559_v19 = vadd.f32 %v655_v2, %v555_v14  ;;  %v431_v23 = vpop.f32.mrb[7].mxu1 }
 0x1be   :  { %v617_v17 = vpack.c.bf16 %v560_v7, %v560_v7  ;;  %v558_v22 = vadd.f32 %v554_v15, %v431_v23 }
 0x1bf   :  { %582 = vst.msk [vmem:[%s925_s9 + $0x4] sm:$0xf] %vm580_vm4, %v618_v16  ;;  %v563_v18 = vmax.f32 %v559_v19, 0.0 }
 0x1c0   :  { %581 = vst.msk [vmem:[%s925_s9] sm:$0xf] %vm580_vm4, %v617_v17  ;;  %v562_v20 = vmax.f32 %v558_v22, 0.0 }
 0x1c1   :  { %v620_v21 = vpack.c.bf16 %v563_v18, %v563_v18 }
 0x1c2   :  { %v619_v24 = vpack.c.bf16 %v562_v20, %v562_v20 }
 0x1c3   :  { %584 = vst.msk [vmem:[%s925_s9 + $0xc] sm:$0xf] %vm580_vm4, %v620_v21 }
 0x1c4   :  { %583 = vst.msk [vmem:[%s925_s9 + $0x8] sm:$0xf] %vm580_vm4, %v619_v24 }

// kernel: diffusion_forward.38
= control target key start
LH: loop header
LB: loop body
LE: loop exit
PB: predicated region body
PF: predicated region fallthrough
CT: control target
= control target key end

     0   :  { %v287_v1 = vmov 0   ;;  %vm107_vm0 = vcmask 261120   ;;  %vm217_vm1 = vcmask 257024   ;;  %s386_s1 = inlined_call_operand.vmem [shape: bf16[32,32], index: 1, kind: input, shape index: {}]   ;;  %s387_s0 = inlined_call_operand.vmem [shape: bf16[64,32], index: 0, kind: input, shape index: {}]   ;;  %s388_s2 = inlined_call_operand.vmem [shape: f32[64,1], index: 2, kind: input, shape index: {}]   ;;  %s389_s3 = inlined_call_operand.vmem [shape: bf16[64,32], index: 3, kind: output, shape index: {}]  }
   0x1   :  { %v281_v0 = vld [vmem:[%s386_s1] sm:$0xff]   ;;  %280 = vset.pattern.permute.xlu1 %v287_v1  ;;  %279 = vset.pattern.permute.xlu0 %v287_v1  ;;  %v282_v2 = vld [vmem:[%s386_s1 + $0x8] sm:$0xff]   ;;  %v284_v4 = vld [vmem:[%s387_s0 + $0x10] sm:$0xff]  }
   0x2   :  { %262 = vmatprep.subr.bf16.mxu0 %v281_v0  ;;  %274 = vmatprep.subr.bf16.mxu1 %v281_v0  ;;  %v283_v3 = vld [vmem:[%s387_s0] sm:$0xff]   ;;  %v285_v5 = vld [vmem:[%s387_s0 + $0x8] sm:$0xff]   ;;  %v286_v6 = vld [vmem:[%s387_s0 + $0x18] sm:$0xff]  }
   0x3   :  { %263 = vmatpush3.bf16.msra.mxu0 %v281_v0  ;;  %276 = vmatpush3.bf16.msra.mxu1 %v281_v0  ;;  %v29_v7 = vld [vmem:[%s388_s2 + $0x10] sm:$0xff]  ;;  %v27_v8 = vld [vmem:[%s388_s2] sm:$0xff]  ;;  %v30_v9 = vld [vmem:[%s388_s2 + $0x18] sm:$0xff] }
   0x4   :  { %264 = vmatprep.subr.bf16.mxu0 %v282_v2  ;;  %275 = vmatprep.subr.bf16.mxu1 %v282_v2  ;;  %v28_v10 = vld [vmem:[%s388_s2 + $0x8] sm:$0xff]  ;;  %v31_v12 = vld [vmem:[%s388_s2 + $0x20] sm:$0xff]  ;;  %v34_v13 = vld [vmem:[%s388_s2 + $0x38] sm:$0xff] }
   0x5   :  { %266 = vmatprep.mubr.msk.bf16.mxu0 %vm107_vm0, %v283_v3  ;;  %270 = vmatprep.mubr.msk.bf16.mxu1 %vm107_vm0, %v284_v4  ;;  %v32_v11 = vld [vmem:[%s388_s2 + $0x28] sm:$0xff]  ;;  %v33_v14 = vld [vmem:[%s388_s2 + $0x30] sm:$0xff] }
   0x6   :  { %47 = vperm.xlu1 %280, %v29_v7   ;;  %37 = vperm.xlu0 %279, %v27_v8  }
   0x7   :  { %265 = vmatpush3.bf16.msra.mxu0 %v282_v2  ;;  %277 = vmatpush3.bf16.msra.mxu1 %v282_v2 }
   0xa   :  { %267 = vmatmul.mubr.msk.bf16.vlgmr.msra.gmra.mrb[0].mxu0 %vm107_vm0, %v285_v5  ;;  %271 = vmatmul.mubr.msk.bf16.vlgmr.msra.gmra.mrb[0].mxu1 %vm107_vm0, %v286_v6 }
   0xb   :  { %52 = vperm.xlu1 %280, %v30_v9   ;;  %42 = vperm.xlu0 %279, %v28_v10  }
   0xf   :  { %62 = vperm.xlu1 %280, %v32_v11   ;;  %57 = vperm.xlu0 %279, %v31_v12  }
  0x13   :  { %72 = vperm.xlu1 %280, %v34_v13   ;;  %67 = vperm.xlu0 %279, %v33_v14  }
  0x85   :  { %v48_v15 = vpop.permute.xlu1 %47  ;;  %v38_v16 = vpop.permute.xlu0 %37 }
  0x8a   :  { %v53_v17 = vpop.permute.xlu1 %52  ;;  %v43_v18 = vpop.permute.xlu0 %42 }
  0x8e   :  { %v63_v19 = vpop.permute.xlu1 %62  ;;  %v58_v20 = vpop.permute.xlu0 %57 }
  0x92   :  { %v73_v21 = vpop.permute.xlu1 %72  ;;  %v68_v22 = vpop.permute.xlu0 %67 }
  0xdd   :  { %v268_v23 = vpop.f32.mrb[0].mxu0  ;;  %v272_v24 = vpop.f32.mrb[0].mxu1 }
  0xde   :  { %v163_v25 = vadd.f32 %v268_v23, %v48_v15  ;;  %v179_v26 = vadd.f32 %v272_v24, %v68_v22  ;;  %v154_v27 = vpop.f32.mrb[1].mxu0  ;;  %v170_v28 = vpop.f32.mrb[1].mxu1 }
  0xdf   :  { %v155_v29 = vadd.f32 %v154_v27, %v38_v16  ;;  %v171_v30 = vadd.f32 %v170_v28, %v58_v20  ;;  %v269_v31 = vpop.f32.mrb[2].mxu0  ;;  %v273_v32 = vpop.f32.mrb[2].mxu1 }
  0xe0   :  { %v250_v33 = vpack.c.bf16 %v163_v25, %v163_v25  ;;  %v254_v34 = vpack.c.bf16 %v179_v26, %v179_v26  ;;  %v166_v35 = vadd.f32 %v269_v31, %v53_v17  ;;  %v182_v36 = vadd.f32 %v273_v32, %v73_v21  ;;  %v157_v37 = vpop.f32.mrb[3].mxu0  ;;  %v173_v38 = vpop.f32.mrb[3].mxu1 }
  0xe1   :  { %v248_v39 = vpack.c.bf16 %v155_v29, %v155_v29  ;;  %v252_v40 = vpack.c.bf16 %v171_v30, %v171_v30  ;;  %v158_v41 = vadd.f32 %v157_v37, %v43_v18  ;;  %v174_v42 = vadd.f32 %v173_v38, %v63_v19 }
  0xe2   :  { %220 = vst.msk [vmem:[%s389_s3 + $0x8] sm:$0xf] %vm217_vm1, %v250_v33  ;;  %224 = vst.msk [vmem:[%s389_s3 + $0x18] sm:$0xf] %vm217_vm1, %v254_v34  ;;  %v251_v43 = vpack.c.bf16 %v166_v35, %v166_v35  ;;  %v255_v44 = vpack.c.bf16 %v182_v36, %v182_v36 }
  0xe3   :  { %218 = vst.msk [vmem:[%s389_s3] sm:$0xf] %vm217_vm1, %v248_v39  ;;  %222 = vst.msk [vmem:[%s389_s3 + $0x10] sm:$0xf] %vm217_vm1, %v252_v40  ;;  %v249_v45 = vpack.c.bf16 %v158_v41, %v158_v41  ;;  %v253_v46 = vpack.c.bf16 %v174_v42, %v174_v42 }
  0xe4   :  { %221 = vst.msk [vmem:[%s389_s3 + $0xc] sm:$0xf] %vm217_vm1, %v251_v43  ;;  %225 = vst.msk [vmem:[%s389_s3 + $0x1c] sm:$0xf] %vm217_vm1, %v255_v44 }
  0xe5   :  { %219 = vst.msk [vmem:[%s389_s3 + $0x4] sm:$0xf] %vm217_vm1, %v249_v45  ;;  %223 = vst.msk [vmem:[%s389_s3 + $0x14] sm:$0xf] %vm217_vm1, %v253_v46 }

// kernel: diffusion_forward.37
= control target key start
LH: loop header
LB: loop body
LE: loop exit
PB: predicated region body
PF: predicated region fallthrough
CT: control target
= control target key end

     0   :  { %v588_v1 = vmov 0   ;;  %vm227_vm0 = vcmask 261120   ;;  %vm468_vm1 = vcmask 257024   ;;  %s780_s0 = inlined_call_operand.vmem [shape: bf16[288,32], index: 0, kind: input, shape index: {}]   ;;  %s781_s1 = inlined_call_operand.vmem [shape: bf16[32,288], index: 1, kind: input, shape index: {}]   ;;  %s782_s2 = inlined_call_operand.vmem [shape: f32[32,1], index: 2, kind: input, shape index: {}]   ;;  %s783_s3 = inlined_call_operand.vmem [shape: f32[32,1], index: 3, kind: input, shape index: {}]   ;;  %s784_s4 = inlined_call_operand.vmem [shape: f32[32,1], index: 4, kind: input, shape index: {}]   ;;  %s785_s5 = inlined_call_operand.vmem [shape: bf16[32,32], index: 5, kind: output, shape index: {}]  }
   0x1   :  { %v554_v0 = vld [vmem:[%s780_s0 + $0x40] sm:$0xff]   ;;  %552 = vset.pattern.permute.xlu0 %v588_v1  ;;  %553 = vset.pattern.permute.xlu1 %v588_v1  ;;  %v556_v3 = vld [vmem:[%s780_s0 + $0x48] sm:$0xff]   ;;  %v558_v5 = vld [vmem:[%s780_s0 + $0x50] sm:$0xff]  }
   0x2   :  { %v555_v2 = vld [vmem:[%s780_s0] sm:$0xff]   ;;  %511 = vmatprep.subr.bf16.mxu0 %v554_v0  ;;  %v557_v4 = vld [vmem:[%s780_s0 + $0x8] sm:$0xff]   ;;  %v559_v6 = vld [vmem:[%s780_s0 + $0x10] sm:$0xff]  }
   0x3   :  { %512 = vmatpush3.bf16.msra.mxu0 %v555_v2  ;;  %v560_v7 = vld [vmem:[%s780_s0 + $0x58] sm:$0xff]   ;;  %v562_v9 = vld [vmem:[%s780_s0 + $0x60] sm:$0xff]   ;;  %v564_v12 = vld [vmem:[%s780_s0 + $0x68] sm:$0xff]  }
   0x4   :  { %513 = vmatprep.subr.bf16.mxu0 %v556_v3  ;;  %v561_v8 = vld [vmem:[%s780_s0 + $0x18] sm:$0xff]   ;;  %v568_v10 = vld [vmem:[%s780_s0 + $0x80] sm:$0xff]   ;;  %v565_v13 = vld [vmem:[%s780_s0 + $0x28] sm:$0xff]  }
   0x5   :  { %v563_v11 = vld [vmem:[%s780_s0 + $0x20] sm:$0xff]   ;;  %543 = vmatprep.subr.bf16.mxu1 %v568_v10  ;;  %v571_v14 = vld [vmem:[%s780_s0 + $0x88] sm:$0xff]   ;;  %v566_v15 = vld [vmem:[%s780_s0 + $0x70] sm:$0xff]  }
   0x6   :  { %544 = vmatpush3.bf16.msra.mxu1 %v568_v10  ;;  %v574_v16 = vld [vmem:[%s781_s1 + $0x4] ss:$12 sps:$4 sm:$0xff]   ;;  %v575_v17 = vld [vmem:[%s781_s1 + $0x8] ss:$12 sps:$4 sm:$0xff]   ;;  %v576_v18 = vld [vmem:[%s781_s1 + $0x20] ss:$12 sps:$4 sm:$0xff]  }
   0x7   :  { %514 = vmatpush3.bf16.msra.mxu0 %v557_v4  ;;  %545 = vmatprep.subr.bf16.mxu1 %v571_v14  ;;  %v65_v19 = vld [vmem:[%s782_s2] sm:$0xff]  ;;  %v567_v20 = vld [vmem:[%s780_s0 + $0x30] sm:$0xff]   ;;  %v569_v22 = vld [vmem:[%s780_s0 + $0x78] sm:$0xff]  }
   0x8   :  { %515 = vmatprep.subr.bf16.mxu0 %v558_v5  ;;  %266 = vmatprep.mubr.bf16.mxu0 %v574_v16  ;;  %v67_v21 = vld [vmem:[%s782_s2 + $0x10] sm:$0xff]  ;;  %v66_v23 = vld [vmem:[%s782_s2 + $0x8] sm:$0xff]  ;;  %v68_v24 = vld [vmem:[%s782_s2 + $0x18] sm:$0xff] }
   0x9   :  { %547 = vmatprep.mubr.msk.bf16.mxu1 %vm227_vm0, %v575_v17  ;;  %71 = vperm.xlu0 %552, %v65_v19   ;;  %v570_v25 = vld [vmem:[%s780_s0 + $0x38] sm:$0xff]   ;;  %v333_v26 = vld [vmem:[%s783_s3 + $0x8] sm:$0xff]  ;;  %v332_v28 = vld [vmem:[%s783_s3] sm:$0xff] }
   0xa   :  { %546 = vmatpush3.bf16.msra.mxu1 %v571_v14  ;;  %81 = vperm.xlu1 %553, %v67_v21   ;;  %v572_v27 = vld [vmem:[%s781_s1] ss:$12 sps:$4 sm:$0xff]   ;;  %v577_v29 = vld [vmem:[%s781_s1 + $0x1c] ss:$12 sps:$4 sm:$0xff]   ;;  %v334_v31 = vld [vmem:[%s783_s3 + $0x10] sm:$0xff] }
   0xb   :  { %516 = vmatpush3.bf16.msra.mxu0 %v559_v6  ;;  %v336_v30 = vld [vmem:[%s784_s4] sm:$0xff]  ;;  %v335_v33 = vld [vmem:[%s783_s3 + $0x18] sm:$0xff]  ;;  %v337_v34 = vld [vmem:[%s784_s4 + $0x8] sm:$0xff] }
   0xc   :  { %517 = vmatprep.subr.bf16.mxu0 %v560_v7  ;;  %v579_v32 = vld [vmem:[%s781_s1 + $0x18] ss:$12 sps:$4 sm:$0xff]  }
   0xd   :  { %548 = vmatmul.mubr.msk.bf16.vlgmr.msra.gmra.mrb[0].mxu1 %vm227_vm0, %v576_v18  ;;  %76 = vperm.xlu0 %552, %v66_v23  }
   0xe   :  { %86 = vperm.xlu1 %553, %v68_v24  }
   0xf   :  { %518 = vmatpush3.bf16.msra.mxu0 %v561_v8 }
  0x10   :  { %519 = vmatprep.subr.bf16.mxu0 %v562_v9 }
  0x11   :  { %407 = vperm.xlu0 %552, %v333_v26  }
  0x12   :  { %402 = vperm.xlu1 %553, %v332_v28  }
  0x13   :  { %520 = vmatpush3.bf16.msra.mxu0 %v563_v11  ;;  %v339_v11 = vld [vmem:[%s784_s4 + $0x18] sm:$0xff] }
  0x14   :  { %521 = vmatprep.subr.bf16.mxu0 %v564_v12  ;;  %v338_v12 = vld [vmem:[%s784_s4 + $0x10] sm:$0xff] }
  0x15   :  { %426 = vperm.xlu0 %552, %v336_v30  }
  0x16   :  { %412 = vperm.xlu1 %553, %v334_v31  }
  0x17   :  { %522 = vmatpush3.bf16.msra.mxu0 %v565_v13 }
  0x18   :  { %523 = vmatprep.subr.bf16.mxu0 %v566_v15 }
  0x1a   :  { %417 = vperm.xlu1 %553, %v335_v33  }
  0x1b   :  { %524 = vmatpush3.bf16.msra.mxu0 %v567_v20 }
  0x1c   :  { %525 = vmatprep.subr.bf16.mxu0 %v569_v22 }
  0x1e   :  { %431 = vperm.xlu1 %553, %v337_v34  }
  0x1f   :  { %526 = vmatpush3.bf16.msra.mxu0 %v570_v25 }
  0x22   :  { %267 = vmatmul.mubr.bf16.vlgmr.msra.gmra.mrb[0].mxu0 %v572_v27 }
  0x23   :  { %274 = vmatprep.mubr.bf16.mxu0 %v577_v29 }
  0x2a   :  { %275 = vmatmul.mubr.bf16.gmra.mrb[4].mxu0 %v579_v32 }
  0x88   :  { %v72_v39 = vpop.permute.xlu0 %71 }
  0x89   :  { %v82_v50 = vpop.permute.xlu1 %81 }
  0x8c   :  { %v77_v47 = vpop.permute.xlu0 %76 }
  0x8d   :  { %v87_v0 = vpop.permute.xlu1 %86 }
  0x90   :  { %v408_v15 = vpop.permute.xlu0 %407 }
  0x91   :  { %v403_v13 = vpop.permute.xlu1 %402 }
  0x94   :  { %v427_v17 = vpop.permute.xlu0 %426 }
  0x95   :  { %v413_v14 = vpop.permute.xlu1 %412 }
  0x99   :  { %v757_v16 = vpop.permute.xlu1 %417 }
  0x9d   :  { %v432_v18 = vpop.permute.xlu1 %431 }
  0xe0   :  { %v549_v35 = vpop.f32.mrb[0].mxu1 }
  0xe1   :  { %v317_v36 = vpop.f32.mrb[1].mxu1 }
  0xe2   :  { %v550_v37 = vpop.f32.mrb[2].mxu1 }
  0xe3   :  { %v320_v38 = vpop.f32.mrb[3].mxu1 }
  0xf5   :  { %v527_v40 = vpop.f32.mrb[0].mxu0 }
  0xf6   :  { %v528_v41 = vpop.f32.mrb[1].mxu0 }
  0xf7   :  { %v529_v42 = vadd.f32 %v528_v41, %v527_v40  ;;  %v530_v43 = vpop.f32.mrb[2].mxu0 }
  0xf8   :  { %v531_v44 = vpop.f32.mrb[3].mxu0 }
  0xf9   :  { %v269_v45 = vadd.f32 %v529_v42, %v72_v39  ;;  %v532_v46 = vadd.f32 %v531_v44, %v530_v43 }
  0xfb   :  { %v723_v48 = vadd.f32 %v317_v36, %v269_v45  ;;  %v272_v49 = vadd.f32 %v532_v46, %v77_v47 }
  0xfd   :  { %v725_v51 = vadd.f32 %v320_v38, %v272_v49  ;;  %v533_v52 = vpop.f32.mrb[4].mxu0  ;;  %v340_v53 = vsel %vm227_vm0, %v723_v48, 0.0  ;;  %v356_v59 = vmul.f32 %v723_v48, %v723_v48 }
  0xfe   :  { %v534_v54 = vpop.f32.mrb[5].mxu0  ;;  %341 = vadd.xlane.f32.xlu0 %v340_v53 }
  0xff   :  { %v535_v55 = vadd.f32 %v534_v54, %v533_v52  ;;  %v536_v56 = vpop.f32.mrb[6].mxu0  ;;  %v343_v57 = vsel %vm227_vm0, %v725_v51, 0.0  ;;  %v357_v58 = vmul.f32 %v725_v51, %v725_v51  ;;  %v360_v3 = vsel %vm227_vm0, %v356_v59, 0.0 }
 0x100   :  { %v537_v60 = vpop.f32.mrb[7].mxu0  ;;  %344 = vadd.xlane.f32.xlu1 %v343_v57 }
 0x101   :  { %v277_v61 = vadd.f32 %v535_v55, %v82_v50  ;;  %v538_v62 = vadd.f32 %v537_v60, %v536_v56  ;;  %v363_v63 = vsel %vm227_vm0, %v357_v58, 0.0 }
 0x102   :  { %364 = vadd.xlane.f32.xlu0 %v363_v63 }
 0x103   :  { %v736_v1 = vadd.f32 %v549_v35, %v277_v61  ;;  %v280_v2 = vadd.f32 %v538_v62, %v87_v0 }
 0x104   :  { %361 = vadd.xlane.f32.xlu1 %v360_v3 }
 0x105   :  { %v739_v4 = vadd.f32 %v550_v37, %v280_v2  ;;  %v346_v5 = vsel %vm227_vm0, %v736_v1, 0.0  ;;  %v358_v6 = vmul.f32 %v736_v1, %v736_v1 }
 0x106   :  { %347 = vadd.xlane.f32.xlu0 %v346_v5 }
 0x107   :  { %v366_v7 = vsel %vm227_vm0, %v358_v6, 0.0  ;;  %v349_v8 = vsel %vm227_vm0, %v739_v4, 0.0  ;;  %v359_v9 = vmul.f32 %v739_v4, %v739_v4 }
 0x108   :  { %367 = vadd.xlane.f32.xlu1 %v366_v7 }
 0x109   :  { %v369_v10 = vsel %vm227_vm0, %v359_v9, 0.0 }
 0x10a   :  { %350 = vadd.xlane.f32.xlu0 %v349_v8 }
 0x10e   :  { %370 = vadd.xlane.f32.xlu0 %v369_v10 }
 0x119   :  { %441 = vperm.xlu1 %553, %v339_v11  }
 0x124   :  { %436 = vperm.xlu0 %552, %v338_v12  }
 0x18b   :  { %v342_v19 = vpop.xlane.xlu0 %341 }
 0x18c   :  { %v352_v21 = vmul.f32 0.03125, %v342_v19 }
 0x18d   :  { %v345_v20 = vpop.xlane.xlu1 %344 }
 0x18e   :  { %v353_v22 = vmul.f32 0.03125, %v345_v20  ;;  %v376_v27 = vmul.f32 %v352_v21, %v352_v21  ;;  %v384_v50 = vsub.f32 %v723_v48, %v352_v21 }
 0x18f   :  { %v365_v23 = vpop.xlane.xlu0 %364 }
 0x190   :  { %v377_v24 = vmul.f32 %v353_v22, %v353_v22  ;;  %v373_v25 = vmul.f32 0.03125, %v365_v23  ;;  %v385_v46 = vsub.f32 %v725_v51, %v353_v22 }
 0x191   :  { %v362_v26 = vpop.xlane.xlu1 %361 }
 0x192   :  { %v381_v28 = vsub.f32 %v373_v25, %v377_v24  ;;  %v372_v29 = vmul.f32 0.03125, %v362_v26 }
 0x193   :  { %v348_v30 = vpop.xlane.xlu0 %347 }
 0x194   :  { %v389_v31 = vadd.f32 1e-05, %v381_v28  ;;  %v380_v32 = vsub.f32 %v372_v29, %v376_v27  ;;  %v354_v33 = vmul.f32 0.03125, %v348_v30 }
 0x195   :  { %v368_v34 = vpop.xlane.xlu1 %367 }
 0x196   :  { %580 = vrsqrt.f32 %v389_v31  ;;  %v388_v35 = vadd.f32 1e-05, %v380_v32  ;;  %v378_v36 = vmul.f32 %v354_v33, %v354_v33  ;;  %v374_v37 = vmul.f32 0.03125, %v368_v34 }
 0x197   :  { %v351_v38 = vpop.xlane.xlu0 %350  ;;  %v386_v58 = vsub.f32 %v736_v1, %v354_v33 }
 0x198   :  { %582 = vrsqrt.f32 %v388_v35  ;;  %v355_v39 = vmul.f32 0.03125, %v351_v38  ;;  %v382_v40 = vsub.f32 %v374_v37, %v378_v36 }
 0x199   :  { %v442_v9 = vpop.permute.xlu1 %441 }
 0x19a   :  { %v390_v41 = vadd.f32 1e-05, %v382_v40  ;;  %v379_v43 = vmul.f32 %v355_v39, %v355_v39  ;;  %v387_v2 = vsub.f32 %v739_v4, %v355_v39 }
 0x19b   :  { %v371_v42 = vpop.xlane.xlu0 %370 }
 0x19c   :  { %v375_v44 = vmul.f32 0.03125, %v371_v42  ;;  %584 = vrsqrt.f32 %v390_v41 }
 0x19e   :  { %v383_v45 = vsub.f32 %v375_v44, %v379_v43 }
 0x1a0   :  { %v581_v47 = vpop.eup %580  ;;  %v391_v49 = vadd.f32 1e-05, %v383_v45 }
 0x1a1   :  { %v397_v52 = vmul.f32 %v581_v47, %v385_v46 }
 0x1a2   :  { %v583_v53 = vpop.eup %582  ;;  %586 = vrsqrt.f32 %v391_v49 }
 0x1a3   :  { %v421_v54 = vmul.f32 %v408_v15, %v397_v52  ;;  %v396_v55 = vmul.f32 %v583_v53, %v384_v50  ;;  %v437_v3 = vpop.permute.xlu0 %436 }
 0x1a5   :  { %v445_v56 = vadd.f32 %v432_v18, %v421_v54  ;;  %v420_v57 = vmul.f32 %v403_v13, %v396_v55 }
 0x1a6   :  { %v585_v59 = vpop.eup %584 }
 0x1a7   :  { %v444_v60 = vadd.f32 %v427_v17, %v420_v57  ;;  %v449_v61 = vmax.f32 %v445_v56, 0.0  ;;  %v398_v62 = vmul.f32 %v585_v59, %v386_v58 }
 0x1a9   :  { %v448_v63 = vmax.f32 %v444_v60, 0.0  ;;  %v508_v51 = vpack.c.bf16 %v449_v61, %v449_v61  ;;  %v422_v0 = vmul.f32 %v413_v14, %v398_v62 }
 0x1ab   :  { %v507_v48 = vpack.c.bf16 %v448_v63, %v448_v63  ;;  %470 = vst.msk [vmem:[%s785_s5 + $0x4] sm:$0xf] %vm468_vm1, %v508_v51  ;;  %v446_v6 = vadd.f32 %v437_v3, %v422_v0 }
 0x1ac   :  { %v587_v5 = vpop.eup %586 }
 0x1ad   :  { %v399_v1 = vmul.f32 %v587_v5, %v387_v2  ;;  %469 = vst.msk [vmem:[%s785_s5] sm:$0xf] %vm468_vm1, %v507_v48  ;;  %v450_v7 = vmax.f32 %v446_v6, 0.0 }
 0x1af   :  { %v423_v8 = vmul.f32 %v757_v16, %v399_v1  ;;  %v509_v4 = vpack.c.bf16 %v450_v7, %v450_v7 }
 0x1b1   :  { %v447_v10 = vadd.f32 %v442_v9, %v423_v8  ;;  %471 = vst.msk [vmem:[%s785_s5 + $0x8] sm:$0xf] %vm468_vm1, %v509_v4 }
 0x1b3   :  { %v451_v11 = vmax.f32 %v447_v10, 0.0 }
 0x1b5   :  { %v510_v12 = vpack.c.bf16 %v451_v11, %v451_v11 }
 0x1b7   :  { %472 = vst.msk [vmem:[%s785_s5 + $0xc] sm:$0xf] %vm468_vm1, %v510_v12 }

// kernel: diffusion_forward.41
= control target key start
LH: loop header
LB: loop body
LE: loop exit
PB: predicated region body
PF: predicated region fallthrough
CT: control target
= control target key end

     0   :  { %vm61_vm0 = vcmask 130048   ;;  %v180_v1 = vmov 0   ;;  %s230_s1 = inlined_call_operand.vmem [shape: bf16[16,128], index: 1, kind: input, shape index: {}]   ;;  %s231_s0 = inlined_call_operand.vmem [shape: bf16[32,16], index: 0, kind: input, shape index: {}]   ;;  %s232_s2 = inlined_call_operand.vmem [shape: f32[32,1], index: 2, kind: input, shape index: {}]   ;;  %s233_s3 = inlined_call_operand.vmem [shape: bf16[32,128], index: 3, kind: output, shape index: {}]  }
   0x1   :  { %v177_v0 = vld [vmem:[%s230_s1] sm:$0xff]   ;;  %176 = vset.pattern.permute.xlu1 %v180_v1  ;;  %175 = vset.pattern.permute.xlu0 %v180_v1  ;;  %v179_v3 = vld [vmem:[%s231_s0 + $0x8] sm:$0xff]   ;;  %v23_v4 = vld [vmem:[%s232_s2 + $0x10] sm:$0xff] }
   0x2   :  { %v178_v2 = vld [vmem:[%s231_s0] sm:$0xff]   ;;  %168 = vmatprep.subr.bf16.mxu0 %v177_v0  ;;  %37 = vperm.xlu1 %176, %v23_v4   ;;  %v24_v6 = vld [vmem:[%s232_s2 + $0x18] sm:$0xff]  ;;  %v22_v7 = vld [vmem:[%s232_s2 + $0x8] sm:$0xff] }
   0x3   :  { %169 = vmatpush3.bf16.msra.mxu0 %v177_v0  ;;  %170 = vmatprep.mubr.msk.bf16.mxu0 %vm61_vm0, %v178_v2  ;;  %v21_v5 = vld [vmem:[%s232_s2] sm:$0xff] }
   0x4   :  { %27 = vperm.xlu0 %175, %v21_v5  }
   0x6   :  { %171 = vmatmul.mubr.msk.bf16.vlgmr.msra.gmra.mrb[0].mxu0 %vm61_vm0, %v179_v3  ;;  %42 = vperm.xlu1 %176, %v24_v6  }
   0x8   :  { %32 = vperm.xlu0 %175, %v22_v7  }
  0x81   :  { %v38_v8 = vpop.permute.xlu1 %37 }
  0x83   :  { %v28_v9 = vpop.permute.xlu0 %27 }
  0x85   :  { %v43_v12 = vpop.permute.xlu1 %42 }
  0x87   :  { %v33_v14 = vpop.permute.xlu0 %32 }
  0xd9   :  { %v172_v10 = vpop.f32.mrb[0].mxu0 }
  0xda   :  { %v102_v11 = vpop.f32.mrb[1].mxu0  ;;  %v111_v15 = vadd.f32 %v172_v10, %v38_v8 }
  0xdb   :  { %v173_v13 = vpop.f32.mrb[2].mxu0  ;;  %v103_v18 = vadd.f32 %v102_v11, %v28_v9 }
  0xdc   :  { %v114_v16 = vadd.f32 %v173_v13, %v43_v12  ;;  %v105_v17 = vpop.f32.mrb[3].mxu0 }
  0xdd   :  { %v106_v19 = vadd.f32 %v105_v17, %v33_v14 }
  0xde   :  { %v162_v20 = vpack.c.bf16 %v114_v16, %v111_v15 }
  0xdf   :  { %v157_v21 = vpack.c.bf16 %v106_v19, %v103_v18 }
  0xe0   :  { %164 = vst [vmem:[%s233_s3 + $0x8] sm:$0xff] %v162_v20  }
  0xe1   :  { %158 = vst [vmem:[%s233_s3] sm:$0xff] %v157_v21  }

// kernel: diffusion_forward.39
= control target key start
LH: loop header
LB: loop body
LE: loop exit
PB: predicated region body
PF: predicated region fallthrough
CT: control target
= control target key end

     0   :  { %v685_v0 = vmov 0.0   ;;  %vm686_vm0 = vmmov 0   ;;  %v687_v3 = vmov 0   ;;  %vm208_vm1 = vcmask 261120   ;;  %s852_s0 = inlined_call_operand.vmem [shape: bf16[288,128], index: 0, kind: input, shape index: {}]   ;;  %s853_s1 = inlined_call_operand.vmem [shape: bf16[16,288], index: 1, kind: input, shape index: {}]   ;;  %s854_s7 = inlined_call_operand.vmem [shape: f32[32,2], index: 7, kind: input, shape index: {}]   ;;  %s855_s5 = inlined_call_operand.vmem [shape: f32[16,32], index: 5, kind: input, shape index: {}]   ;;  %s856_s6 = inlined_call_operand.vmem [shape: f32[16,1], index: 6, kind: input, shape index: {}]   ;;  %s857_s2 = inlined_call_operand.vmem [shape: f32[16,1], index: 2, kind: input, shape index: {}]   ;;  %s858_s3 = inlined_call_operand.vmem [shape: f32[16,1], index: 3, kind: input, shape index: {}]   ;;  %s859_s8 = inlined_call_operand.vmem [shape: f32[2,128], index: 8, kind: input, shape index: {}]   ;;  %s860_s4 = inlined_call_operand.vmem [shape: f32[16,1], index: 4, kind: input, shape index: {}]   ;;  %s861_s9 = inlined_call_operand.vmem [shape: bf16[16,128], index: 9, kind: output, shape index: {}]  }
   0x1   :  { %622 = vmatprep.subr.bf16.mxu1 %v685_v0  ;;  %v659_v1 = vld [vmem:[%s852_s0 + $0x40] sm:$0xff]   ;;  %626 = vmatprep.mubr.msk.bf16.mxu1 %vm686_vm0, %v685_v0  ;;  %v662_v5 = vld [vmem:[%s852_s0 + $0x48] sm:$0xff]   ;;  %v666_v12 = vld [vmem:[%s852_s0 + $0x50] sm:$0xff]   ;;  %vm401_vm2 = vcmask 1041408   ;;  %vm394_vm3 = vcmask 15360  }
   0x2   :  { %v660_v2 = vld [vmem:[%s852_s0 + $0x80] sm:$0xff]   ;;  %657 = vset.pattern.permute.xlu0 %v687_v3  ;;  %658 = vset.pattern.permute.xlu1 %v687_v3  ;;  %v663_v6 = vld [vmem:[%s852_s0 + $0x88] sm:$0xff]   ;;  %v667_v13 = vld [vmem:[%s852_s0 + $0x10] sm:$0xff]  }
   0x3   :  { %588 = vmatprep.subr.bf16.mxu0 %v659_v1  ;;  %v661_v4 = vld [vmem:[%s852_s0] sm:$0xff]   ;;  %623 = vmatpush3.bf16.msra.mxu1 %v660_v2  ;;  %v664_v7 = vld [vmem:[%s852_s0 + $0x8] sm:$0xff]   ;;  %v298_v14 = vld [vmem:[%s854_s7 + $0x10] sm:$0xff] }
   0x4   :  { %589 = vmatpush3.bf16.msra.mxu0 %v661_v4  ;;  %624 = vmatprep.subr.bf16.mxu1 %v685_v0  ;;  %v665_v8 = vld [vmem:[%s853_s1 + $0x8] ss:$12 sps:$4 sm:$0xff]   ;;  %v296_v9 = vld [vmem:[%s854_s7] sm:$0xff]  ;;  %v299_v15 = vld [vmem:[%s854_s7 + $0x18] sm:$0xff] }
   0x5   :  { %590 = vmatprep.subr.bf16.mxu0 %v662_v5  ;;  %v297_v10 = vld [vmem:[%s854_s7 + $0x8] sm:$0xff]  ;;  %v650_v16 = vpack.c.bf16 %v299_v15, %v298_v14  ;;  %v668_v17 = vld [vmem:[%s852_s0 + $0x58] sm:$0xff]   ;;  %v294_v19 = vld [vmem:[%s855_s5] sm:$0xff] }
   0x6   :  { %v646_v11 = vpack.c.bf16 %v297_v10, %v296_v9  ;;  %v669_v18 = vld [vmem:[%s852_s0 + $0x18] sm:$0xff]   ;;  %v670_v20 = vld [vmem:[%s852_s0 + $0x60] sm:$0xff]   ;;  %v295_v21 = vld [vmem:[%s855_s5 + $0x8] sm:$0xff] }
   0x7   :  { %625 = vmatpush3.bf16.msra.mxu1 %v663_v6  ;;  %v671_v22 = vld [vmem:[%s852_s0 + $0x20] sm:$0xff]   ;;  %v672_v23 = vld [vmem:[%s852_s0 + $0x68] sm:$0xff]   ;;  %v674_v25 = vld [vmem:[%s852_s0 + $0x70] sm:$0xff]  }
   0x8   :  { %591 = vmatpush3.bf16.msra.mxu0 %v664_v7  ;;  %647 = vmatprep.subr.bf16.mxu1 %v646_v11  ;;  %v673_v24 = vld [vmem:[%s852_s0 + $0x28] sm:$0xff]   ;;  %v680_v26 = vld [vmem:[%s853_s1 + $0x4] ss:$12 sps:$4 sm:$0xff]   ;;  %v676_v31 = vld [vmem:[%s852_s0 + $0x78] sm:$0xff]  }
   0x9   :  { %592 = vmatprep.subr.bf16.mxu0 %v666_v12  ;;  %v300_v27 = vld [vmem:[%s856_s6] sm:$0xff]  ;;  %v675_v29 = vld [vmem:[%s852_s0 + $0x30] sm:$0xff]   ;;  %244 = vmatprep.mubr.bf16.mxu0 %v680_v26  ;;  %v301_v30 = vld [vmem:[%s856_s6 + $0x8] sm:$0xff] }
   0xa   :  { %627 = vmatmul.mubr.msk.bf16.vlgmr.msra.gmra.mrb[0].mxu1 %vm208_vm1, %v665_v8  ;;  %304 = vperm.xlu0 %657, %v300_v27   ;;  %v73_v28 = vld [vmem:[%s857_s2] sm:$0xff]  ;;  %v74_v32 = vld [vmem:[%s857_s2 + $0x8] sm:$0xff]  ;;  %v677_v33 = vld [vmem:[%s852_s0 + $0x38] sm:$0xff]  }
   0xb   :  { %649 = vmatpush3.bf16.msra.mxu1 %v646_v11  ;;  %638 = vmatprep.mubr.msk.f32.mxu1 %vm208_vm1, %v294_v19  ;;  %v480_v34 = vld [vmem:[%s858_s3] sm:$0xff]  ;;  %v483_v62 = vld [vmem:[%s860_s4 + $0x8] sm:$0xff] }
   0xc   :  { %593 = vmatpush3.bf16.msra.mxu0 %v667_v13  ;;  %651 = vmatprep.subr.bf16.mxu1 %v650_v16  ;;  %v678_v35 = vld [vmem:[%s853_s1] ss:$12 sps:$4 sm:$0xff]  }
   0xd   :  { %594 = vmatprep.subr.bf16.mxu0 %v668_v17  ;;  %77 = vperm.xlu1 %658, %v73_v28   ;;  %v393_v36 = vld [vmem:[%s859_s8] sm:$0x3]  ;;  %v481_v63 = vld [vmem:[%s858_s3 + $0x8] sm:$0xff] }
   0xe   :  { %309 = vperm.xlu0 %657, %v301_v30   ;;  %v482_v61 = vld [vmem:[%s860_s4] sm:$0xff] }
   0xf   :  { %653 = vmatpush3.bf16.msra.mxu1 %v650_v16 }
  0x10   :  { %595 = vmatpush3.bf16.msra.mxu0 %v669_v18  ;;  %641 = vmatprep.subr.msk.mxu1 %vm401_vm2, %v393_v36 }
  0x11   :  { %596 = vmatprep.subr.bf16.mxu0 %v670_v20  ;;  %82 = vperm.xlu1 %658, %v74_v32  }
  0x12   :  { %639 = vmatmul.mubr.msk.f32.vlgmr.msra.gmra.mrb[4].mxu1 %vm208_vm1, %v295_v21 }
  0x13   :  { %642 = vmatpush3.msk.msra.mxu1 %vm401_vm2, %v393_v36 }
  0x14   :  { %597 = vmatpush3.bf16.msra.mxu0 %v671_v22 }
  0x15   :  { %598 = vmatprep.subr.bf16.mxu0 %v672_v23  ;;  %512 = vperm.xlu1 %658, %v480_v34  }
  0x18   :  { %599 = vmatpush3.bf16.msra.mxu0 %v673_v24 }
  0x19   :  { %600 = vmatprep.subr.bf16.mxu0 %v674_v25 }
  0x1c   :  { %601 = vmatpush3.bf16.msra.mxu0 %v675_v29 }
  0x1d   :  { %602 = vmatprep.subr.bf16.mxu0 %v676_v31 }
  0x20   :  { %603 = vmatpush3.bf16.msra.mxu0 %v677_v33 }
  0x23   :  { %245 = vmatmul.mubr.bf16.vlgmr.msra.gmra.mrb[0].mxu0 %v678_v35 }
  0x89   :  { %v305_v41 = vpop.permute.xlu0 %304 }
  0x8c   :  { %v78_v47 = vpop.permute.xlu1 %77 }
  0x8d   :  { %v310_v44 = vpop.permute.xlu0 %309 }
  0x90   :  { %v83_v53 = vpop.permute.xlu1 %82 }
  0x94   :  { %v513_v1 = vpop.permute.xlu1 %512 }
  0xdd   :  { %v287_v37 = vpop.f32.mrb[0].mxu1 }
  0xde   :  { %v628_v38 = vpop.f32.mrb[1].mxu1 }
  0xdf   :  { %v290_v39 = vpop.f32.mrb[2].mxu1 }
  0xe0   :  { %v629_v40 = vpop.f32.mrb[3].mxu1 }
  0xe5   :  { %v640_v42 = vpop.f32.mrb[4].mxu1 }
  0xe6   :  { %v384_v43 = vpop.f32.mrb[5].mxu1  ;;  %v390_v46 = vadd.f32 %v640_v42, %v310_v44 }
  0xe7   :  { %v385_v45 = vadd.f32 %v384_v43, %v305_v41 }
  0xe9   :  { %643 = vmatprep.mubr.msk.f32.mxu1 %vm394_vm3, %v385_v45 }
  0xea   :  { %644 = vmatmul.mubr.msk.f32.vlgmr.msra.gmra.mrb[6].mxu1 %vm394_vm3, %v390_v46 }
  0xf6   :  { %v604_v48 = vpop.f32.mrb[0].mxu0 }
  0xf7   :  { %v605_v49 = vpop.f32.mrb[1].mxu0 }
  0xf8   :  { %v606_v50 = vadd.f32 %v605_v49, %v604_v48  ;;  %v607_v51 = vpop.f32.mrb[2].mxu0 }
  0xf9   :  { %v608_v52 = vpop.f32.mrb[3].mxu0 }
  0xfa   :  { %v247_v54 = vadd.f32 %v606_v50, %v78_v47  ;;  %v609_v55 = vadd.f32 %v608_v52, %v607_v51 }
  0xfc   :  { %v250_v56 = vadd.f32 %v609_v55, %v83_v53  ;;  %v288_v57 = vadd.f32 %v287_v37, %v247_v54 }
  0xfe   :  { %v291_v58 = vadd.f32 %v290_v39, %v250_v56  ;;  %484 = vadd.xlane.f32.xlu0 %v288_v57  ;;  %v490_v59 = vmul.f32 %v288_v57, %v288_v57 }
 0x100   :  { %486 = vadd.xlane.f32.xlu1 %v291_v58  ;;  %v491_v60 = vmul.f32 %v291_v58, %v291_v58 }
 0x102   :  { %492 = vadd.xlane.f32.xlu0 %v490_v59 }
 0x106   :  { %494 = vadd.xlane.f32.xlu0 %v491_v60 }
 0x111   :  { %524 = vperm.xlu1 %658, %v482_v61  }
 0x115   :  { %529 = vperm.xlu1 %658, %v483_v62  }
 0x11c   :  { %517 = vperm.xlu0 %657, %v481_v63  }
 0x18b   :  { %v485_v0 = vpop.xlane.xlu0 %484 }
 0x18c   :  { %v488_v6 = vmul.f32 0.0078125, %v485_v0 }
 0x18d   :  { %v487_v3 = vpop.xlane.xlu1 %486 }
 0x18e   :  { %v489_v5 = vmul.f32 0.0078125, %v487_v3  ;;  %v498_v10 = vmul.f32 %v488_v6, %v488_v6  ;;  %v502_v18 = vsub.f32 %v288_v57, %v488_v6 }
 0x18f   :  { %v493_v2 = vpop.xlane.xlu0 %492 }
 0x190   :  { %v496_v8 = vmul.f32 0.0078125, %v493_v2  ;;  %v499_v9 = vmul.f32 %v489_v5, %v489_v5  ;;  %v503_v17 = vsub.f32 %v291_v58, %v489_v5 }
 0x191   :  { %v525_v20 = vpop.permute.xlu1 %524 }
 0x192   :  { %v500_v12 = vsub.f32 %v496_v8, %v498_v10 }
 0x193   :  { %v495_v4 = vpop.xlane.xlu0 %494 }
 0x194   :  { %v497_v7 = vmul.f32 0.0078125, %v495_v4  ;;  %v504_v14 = vadd.f32 1e-05, %v500_v12 }
 0x195   :  { %v530_v25 = vpop.permute.xlu1 %529 }
 0x196   :  { %v501_v11 = vsub.f32 %v497_v7, %v499_v9 }
 0x198   :  { %v505_v13 = vadd.f32 1e-05, %v501_v11 }
 0x19a   :  { %681 = vrsqrt.f32 %v505_v13 }
 0x19b   :  { %683 = vrsqrt.f32 %v504_v14  ;;  %v518_v22 = vpop.permute.xlu0 %517 }
 0x1a4   :  { %v682_v15 = vpop.eup %681 }
 0x1a5   :  { %v684_v16 = vpop.eup %683  ;;  %v509_v19 = vmul.f32 %v682_v15, %v503_v17 }
 0x1a6   :  { %v508_v21 = vmul.f32 %v684_v16, %v502_v18 }
 0x1a7   :  { %v521_v23 = vmul.f32 %v518_v22, %v509_v19 }
 0x1a8   :  { %v520_v24 = vmul.f32 %v513_v1, %v508_v21 }
 0x1a9   :  { %v533_v26 = vadd.f32 %v530_v25, %v521_v23 }
 0x1aa   :  { %v532_v27 = vadd.f32 %v525_v20, %v520_v24 }
 0x1bd   :  { %v645_v28 = vpop.f32.mrb[6].mxu1 }
 0x1be   :  { %v535_v29 = vadd.f32 %v645_v28, %v533_v26  ;;  %v471_v30 = vpop.f32.mrb[7].mxu1 }
 0x1bf   :  { %v534_v31 = vadd.f32 %v532_v27, %v471_v30 }
 0x1c0   :  { %v537_v32 = vmax.f32 %v535_v29, 0.0 }
 0x1c1   :  { %v536_v33 = vmax.f32 %v534_v31, 0.0 }
 0x1c3   :  { %v586_v34 = vpack.c.bf16 %v537_v32, %v536_v33 }
 0x1c5   :  { %587 = vst [vmem:[%s861_s9] sm:$0xff] %v586_v34  }

// kernel: diffusion_forward.43
= control target key start
LH: loop header
LB: loop body
LE: loop exit
PB: predicated region body
PF: predicated region fallthrough
CT: control target
= control target key end

     0   :  { %v520_v1 = vmov 0   ;;  %vm146_vm0 = vcmask 1043456   ;;  %vm142_vm1 = vcmask 588800   ;;  %v521_v53 = vmov 0.0   ;;  %s640_s0 = inlined_call_operand.vmem [shape: bf16[72,512], index: 0, kind: input, shape index: {}]   ;;  %s641_s2 = inlined_call_operand.vmem [shape: f32[8,1], index: 2, kind: input, shape index: {}]   ;;  %s642_s3 = inlined_call_operand.vmem [shape: f32[8,1], index: 3, kind: input, shape index: {}]   ;;  %s643_s1 = inlined_call_operand.vmem [shape: bf16[8,72], index: 1, kind: input, shape index: {}]   ;;  %s644_s4 = inlined_call_operand.vmem [shape: f32[8,1], index: 4, kind: input, shape index: {}]   ;;  %s645_s6 = inlined_call_operand.vmem [shape: f32[3,1], index: 6, kind: input, shape index: {}]   ;;  %s646_s5 = inlined_call_operand.vmem [shape: f32[3,8], index: 5, kind: input, shape index: {}]   ;;  %s647_s7 = inlined_call_operand.vmem [shape: f32[3,512], index: 7, kind: output, shape index: {}]  }
   0x1   :  { %v490_v0 = vld [vmem:[%s640_s0 + $0x4] ss:$16 sps:$4 sm:$0xff]   ;;  %191 = vmatprep.mubr.bf16.mxu0 %v520_v1  ;;  %232 = vmatprep.mubr.bf16.mxu1 %v520_v1  ;;  %v492_v2 = vld [vmem:[%s640_s0 + $0xc] ss:$16 sps:$4 sm:$0xff]   ;;  %v494_v3 = vld [vmem:[%s640_s0] ss:$16 sps:$4 sm:$0xff]  }
   0x2   :  { %488 = vset.pattern.permute.xlu0 %v520_v1  ;;  %489 = vset.pattern.permute.xlu1 %v520_v1  ;;  %v495_v4 = vld [vmem:[%s640_s0 + $0x8] ss:$16 sps:$4 sm:$0xff]   ;;  %v496_v5 = vld [vmem:[%s640_s0 + $0x24] ss:$16 sps:$4 sm:$0xff]   ;;  %v498_v6 = vld [vmem:[%s640_s0 + $0x2c] ss:$16 sps:$4 sm:$0xff]  }
   0x3   :  { %159 = vmatprep.subr.bf16.mxu0 %v490_v0  ;;  %200 = vmatprep.subr.bf16.mxu1 %v492_v2  ;;  %v500_v7 = vld [vmem:[%s640_s0 + $0x20] ss:$16 sps:$4 sm:$0xff]   ;;  %v501_v8 = vld [vmem:[%s640_s0 + $0x28] ss:$16 sps:$4 sm:$0xff]   ;;  %v502_v9 = vld [vmem:[%s640_s0 + $0x44] ss:$16 sps:$4 sm:$0xff]  }
   0x4   :  { %160 = vmatpush1.bf16.msra.mxu0 %v494_v3  ;;  %201 = vmatpush1.bf16.msra.mxu1 %v495_v4  ;;  %v504_v10 = vld [vmem:[%s640_s0 + $0x4c] ss:$16 sps:$4 sm:$0xff]   ;;  %v506_v11 = vld [vmem:[%s640_s0 + $0x40] ss:$16 sps:$4 sm:$0xff]   ;;  %v507_v12 = vld [vmem:[%s640_s0 + $0x48] ss:$16 sps:$4 sm:$0xff]  }
   0x5   :  { %161 = vmatprep.subr.bf16.mxu0 %v496_v5  ;;  %202 = vmatprep.subr.bf16.mxu1 %v498_v6  ;;  %v508_v13 = vld [vmem:[%s640_s0 + $0x64] ss:$16 sps:$4 sm:$0xff]   ;;  %v510_v14 = vld [vmem:[%s640_s0 + $0x6c] ss:$16 sps:$4 sm:$0xff]   ;;  %v512_v18 = vld [vmem:[%s640_s0 + $0x60] ss:$16 sps:$4 sm:$0xff]  }
   0x6   :  { %v44_v15 = vld [vmem:[%s640_s0 + $0x80] sm:$0xff]  ;;  %v45_v16 = vld [vmem:[%s640_s0 + $0x88] sm:$0xff]  ;;  %vm300_vm2 = vcmask 64512  }
   0x7   :  { %v46_v17 = vld [vmem:[%s641_s2] sm:$0xff]  ;;  %v513_v19 = vld [vmem:[%s640_s0 + $0x68] ss:$16 sps:$4 sm:$0xff]   ;;  %v477_v20 = vcombine.high %v44_v15, %v44_v15  ;;  %v479_v22 = vcombine.high %v45_v16, %v45_v16  ;;  %v476_v23 = vcombine.low %v44_v15, %v44_v15  ;;  %v478_v24 = vcombine.low %v45_v16, %v45_v16 }
   0x8   :  { %162 = vmatpush1.bf16.msra.mxu0 %v500_v7  ;;  %203 = vmatpush1.bf16.msra.mxu1 %v501_v8  ;;  %v241_v21 = vld [vmem:[%s642_s3] sm:$0xff] }
   0x9   :  { %163 = vmatprep.subr.bf16.mxu0 %v502_v9  ;;  %204 = vmatprep.subr.bf16.mxu1 %v504_v10  ;;  %v148_v25 = vsel %vm146_vm0, %v476_v23, 0  ;;  %v154_v26 = vsel %vm146_vm0, %v478_v24, 0  ;;  %v27_v27 = vld [vmem:[%s643_s1] sm:$0xf] }
   0xa   :  { %49 = vperm.xlu0 %488, %v46_v17   ;;  %273 = vperm.xlu1 %489, %v241_v21   ;;  %v242_v51 = vld [vmem:[%s644_s4] sm:$0xff] }
   0xb   :  { %v294_v52 = vld [vmem:[%s645_s6] sm:$0x7] }
   0xc   :  { %164 = vmatpush1.bf16.msra.mxu0 %v506_v11  ;;  %205 = vmatpush1.bf16.msra.mxu1 %v507_v12 }
   0xd   :  { %165 = vmatprep.subr.bf16.mxu0 %v508_v13  ;;  %206 = vmatprep.subr.bf16.mxu1 %v510_v14 }
  0x10   :  { %166 = vmatpush1.bf16.msra.mxu0 %v512_v18  ;;  %207 = vmatpush1.bf16.msra.mxu1 %v513_v19 }
  0x11   :  { %480 = vmatprep.subr.msk.bf16.mxu0 %vm146_vm0, %v477_v20  ;;  %482 = vmatprep.subr.msk.bf16.mxu1 %vm146_vm0, %v479_v22  ;;  %v293_v20 = vld [vmem:[%s646_s5] sm:$0x7] }
  0x14   :  { %168 = vmatpush1.bf16.msra.mxu0 %v148_v25  ;;  %209 = vmatpush1.bf16.msra.mxu1 %v154_v26 }
  0x17   :  { %481 = vmatmul.mubr.msk.bf16.vlgmr.msra.gmra.mrb[0].mxu0 %vm142_vm1, %v27_v27  ;;  %483 = vmatmul.mubr.msk.bf16.vlgmr.msra.gmra.mrb[0].mxu1 %vm142_vm1, %v27_v27 }
  0x18   :  { %368 = vmatprep.mubr.f32.mxu0 %v521_v53  ;;  %439 = vmatprep.mubr.f32.mxu1 %v521_v53 }
  0x89   :  { %v50_v28 = vpop.permute.xlu0 %49  ;;  %v274_v54 = vpop.permute.xlu1 %273 }
  0xea   :  { %v193_v29 = vpop.f32.mrb[0].mxu0  ;;  %v234_v30 = vpop.f32.mrb[0].mxu1 }
  0xeb   :  { %v194_v31 = vadd.f32 %v193_v29, %v50_v28  ;;  %v195_v32 = vpop.f32.mrb[1].mxu0  ;;  %v236_v33 = vpop.f32.mrb[1].mxu1  ;;  %v235_v34 = vadd.f32 %v234_v30, %v50_v28 }
  0xec   :  { %v196_v35 = vadd.f32 %v195_v32, %v50_v28  ;;  %v197_v36 = vpop.f32.mrb[2].mxu0  ;;  %v238_v37 = vpop.f32.mrb[2].mxu1  ;;  %v237_v43 = vadd.f32 %v236_v33, %v50_v28 }
  0xed   :  { %v249_v38 = vmul.f32 %v194_v31, %v194_v31  ;;  %v198_v39 = vpop.f32.mrb[3].mxu0  ;;  %v239_v40 = vpop.f32.mrb[3].mxu1  ;;  %v251_v44 = vmul.f32 %v235_v34, %v235_v34 }
  0xee   :  { %v243_v41 = vadd.f32 %v196_v35, %v194_v31  ;;  %v250_v42 = vmul.f32 %v196_v35, %v196_v35  ;;  %v252_v48 = vmul.f32 %v237_v43, %v237_v43 }
  0xf0   :  { %v244_v45 = vadd.f32 %v243_v41, %v235_v34  ;;  %v253_v46 = vadd.f32 %v250_v42, %v249_v38 }
  0xf2   :  { %v245_v47 = vadd.f32 %v244_v45, %v237_v43  ;;  %v254_v49 = vadd.f32 %v253_v46, %v251_v44 }
  0xf4   :  { %246 = vadd.xlane.f32.xlu0 %v245_v47  ;;  %v255_v50 = vadd.f32 %v254_v49, %v252_v48 }
  0xf6   :  { %256 = vadd.xlane.f32.xlu1 %v255_v50 }
 0x107   :  { %282 = vperm.xlu1 %489, %v242_v51  }
 0x10b   :  { %297 = vperm.xlu1 %489, %v294_v52  }
 0x181   :  { %v247_v55 = vpop.xlane.xlu0 %246 }
 0x182   :  { %v248_v56 = vmul.f32 0.001953125, %v247_v55 }
 0x183   :  { %v257_v57 = vpop.xlane.xlu1 %256 }
 0x184   :  { %v258_v58 = vmul.f32 0.001953125, %v257_v57  ;;  %v259_v59 = vmul.f32 %v248_v56, %v248_v56  ;;  %v261_v62 = vsub.f32 %v194_v31, %v248_v56  ;;  %v263_v63 = vsub.f32 %v235_v34, %v248_v56 }
 0x185   :  { %v262_v0 = vsub.f32 %v196_v35, %v248_v56  ;;  %v264_v1 = vsub.f32 %v237_v43, %v248_v56 }
 0x186   :  { %v260_v60 = vsub.f32 %v258_v58, %v259_v59 }
 0x187   :  { %v283_v11 = vpop.permute.xlu1 %282 }
 0x188   :  { %v265_v61 = vadd.f32 1e-05, %v260_v60 }
 0x18a   :  { %518 = vrsqrt.f32 %v265_v61 }
 0x18b   :  { %v298_v21 = vpop.permute.xlu1 %297 }
 0x194   :  { %v519_v2 = vpop.eup %518 }
 0x195   :  { %v267_v3 = vmul.f32 %v519_v2, %v261_v62  ;;  %v269_v4 = vmul.f32 %v519_v2, %v263_v63  ;;  %v268_v5 = vmul.f32 %v519_v2, %v262_v0  ;;  %v270_v6 = vmul.f32 %v519_v2, %v264_v1 }
 0x197   :  { %v276_v7 = vmul.f32 %v274_v54, %v267_v3  ;;  %v278_v8 = vmul.f32 %v274_v54, %v269_v4  ;;  %v277_v9 = vmul.f32 %v274_v54, %v268_v5  ;;  %v279_v10 = vmul.f32 %v274_v54, %v270_v6 }
 0x199   :  { %v285_v12 = vadd.f32 %v283_v11, %v276_v7  ;;  %v287_v13 = vadd.f32 %v283_v11, %v278_v8  ;;  %v286_v14 = vadd.f32 %v283_v11, %v277_v9  ;;  %v288_v15 = vadd.f32 %v283_v11, %v279_v10 }
 0x19b   :  { %v289_v16 = vmax.f32 %v285_v12, 0.0  ;;  %v291_v17 = vmax.f32 %v287_v13, 0.0  ;;  %v290_v18 = vmax.f32 %v286_v14, 0.0  ;;  %v292_v19 = vmax.f32 %v288_v15, 0.0 }
 0x19d   :  { %304 = vmatprep.subr.mxu0 %v290_v18  ;;  %375 = vmatprep.subr.mxu1 %v292_v19 }
 0x19e   :  { %305 = vmatpush1.msra.mxu0 %v289_v16  ;;  %376 = vmatpush1.msra.mxu1 %v291_v17 }
 0x19f   :  { %484 = vmatmul.mubr.msk.f32.vlgmr.msra.gmra.mrb[4].mxu0 %vm300_vm2, %v293_v20  ;;  %485 = vmatmul.mubr.msk.f32.vlgmr.msra.gmra.mrb[4].mxu1 %vm300_vm2, %v293_v20 }
 0x272   :  { %v370_v22 = vpop.f32.mrb[4].mxu0  ;;  %v441_v23 = vpop.f32.mrb[4].mxu1 }
 0x273   :  { %v371_v24 = vadd.f32 %v370_v22, %v298_v21  ;;  %v442_v25 = vadd.f32 %v441_v23, %v298_v21  ;;  %v372_v26 = vpop.f32.mrb[5].mxu0  ;;  %v443_v27 = vpop.f32.mrb[5].mxu1 }
 0x274   :  { %v373_v28 = vadd.f32 %v372_v26, %v298_v21  ;;  %v444_v29 = vadd.f32 %v443_v27, %v298_v21 }
 0x276   :  { %v450_v30 = vcombine.low %v371_v24, %v373_v28  ;;  %v451_v31 = vcombine.low %v442_v25, %v444_v29 }
 0x278   :  { %454 = vst [vmem:[%s647_s7] sm:$0x77] %v450_v30  ;;  %455 = vst [vmem:[%s647_s7 + $0x8] sm:$0x77] %v451_v31 }

// kernel: diffusion_forward.42
= control target key start
LH: loop header
LB: loop body
LE: loop exit
PB: predicated region body
PF: predicated region fallthrough
CT: control target
= control target key end

     0   :  { %v824_v2 = vmov 0   ;;  %vm262_vm0 = vcmask 130048   ;;  %v825_v46 = vmov 0.0|0.0   ;;  %vm826_vm1 = vmmov 0   ;;  %s1026_s0 = inlined_call_operand.vmem [shape: bf16[144,512], index: 0, kind: input, shape index: {}]   ;;  %s1027_s1 = inlined_call_operand.vmem [shape: bf16[8,144], index: 1, kind: input, shape index: {}]   ;;  %s1028_s6 = inlined_call_operand.vmem [shape: f32[8,1], index: 6, kind: input, shape index: {}]   ;;  %s1029_s2 = inlined_call_operand.vmem [shape: f32[8,1], index: 2, kind: input, shape index: {}]   ;;  %s1030_s7 = inlined_call_operand.vmem [shape: f32[32,2], index: 7, kind: input, shape index: {}]   ;;  %s1031_s3 = inlined_call_operand.vmem [shape: f32[8,1], index: 3, kind: input, shape index: {}]   ;;  %s1032_s5 = inlined_call_operand.vmem [shape: f32[8,32], index: 5, kind: input, shape index: {}]   ;;  %s1033_s8 = inlined_call_operand.vmem [shape: f32[2,512], index: 8, kind: input, shape index: {}]   ;;  %s1034_s4 = inlined_call_operand.vmem [shape: f32[8,1], index: 4, kind: input, shape index: {}]   ;;  %s1035_s9 = inlined_call_operand.vmem [shape: bf16[8,512], index: 9, kind: output, shape index: {}]  }
   0x1   :  { %v765_v0 = vld [vmem:[%s1026_s0 + $0x4] ss:$16 sps:$4 sm:$0xff]   ;;  %v767_v1 = vld [vmem:[%s1026_s0] ss:$16 sps:$4 sm:$0xff]   ;;  %763 = vset.pattern.permute.xlu0 %v824_v2  ;;  %764 = vset.pattern.permute.xlu1 %v824_v2  ;;  %v768_v3 = vld [vmem:[%s1026_s0 + $0xc] ss:$16 sps:$4 sm:$0xff]   ;;  %v439_v54 = vlaneseq }
   0x2   :  { %266 = vmatprep.subr.bf16.mxu0 %v765_v0  ;;  %v770_v4 = vld [vmem:[%s1026_s0 + $0x24] ss:$16 sps:$4 sm:$0xff]   ;;  %v772_v5 = vld [vmem:[%s1026_s0 + $0x8] ss:$16 sps:$4 sm:$0xff]   ;;  %v773_v6 = vld [vmem:[%s1026_s0 + $0x20] ss:$16 sps:$4 sm:$0xff]   ;;  %307 = vmatprep.subr.bf16.mxu1 %v768_v3 }
   0x3   :  { %267 = vmatpush1.bf16.msra.mxu0 %v767_v1  ;;  %v774_v7 = vld [vmem:[%s1026_s0 + $0x2c] ss:$16 sps:$4 sm:$0xff]   ;;  %308 = vmatpush1.bf16.msra.mxu1 %v772_v5  ;;  %v776_v8 = vld [vmem:[%s1026_s0 + $0x44] ss:$16 sps:$4 sm:$0xff]   ;;  %v778_v9 = vld [vmem:[%s1026_s0 + $0x28] ss:$16 sps:$4 sm:$0xff]  }
   0x4   :  { %268 = vmatprep.subr.bf16.mxu0 %v770_v4  ;;  %309 = vmatprep.subr.bf16.mxu1 %v774_v7  ;;  %v779_v10 = vld [vmem:[%s1026_s0 + $0x40] ss:$16 sps:$4 sm:$0xff]   ;;  %v780_v11 = vld [vmem:[%s1026_s0 + $0x4c] ss:$16 sps:$4 sm:$0xff]   ;;  %v782_v12 = vld [vmem:[%s1026_s0 + $0x64] ss:$16 sps:$4 sm:$0xff]  }
   0x5   :  { %v784_v13 = vld [vmem:[%s1026_s0 + $0x48] ss:$16 sps:$4 sm:$0xff]   ;;  %v786_v14 = vld [vmem:[%s1026_s0 + $0x6c] ss:$16 sps:$4 sm:$0xff]   ;;  %v785_v15 = vld [vmem:[%s1026_s0 + $0x60] ss:$16 sps:$4 sm:$0xff]  }
   0x6   :  { %v788_v16 = vld [vmem:[%s1026_s0 + $0x84] ss:$16 sps:$4 sm:$0xff]   ;;  %v790_v17 = vld [vmem:[%s1026_s0 + $0x68] ss:$16 sps:$4 sm:$0xff]   ;;  %v792_v18 = vld [vmem:[%s1026_s0 + $0x8c] ss:$16 sps:$4 sm:$0xff]  }
   0x7   :  { %269 = vmatpush1.bf16.msra.mxu0 %v773_v6  ;;  %310 = vmatpush1.bf16.msra.mxu1 %v778_v9  ;;  %v791_v19 = vld [vmem:[%s1026_s0 + $0x80] ss:$16 sps:$4 sm:$0xff]   ;;  %v794_v20 = vld [vmem:[%s1026_s0 + $0xa4] ss:$16 sps:$4 sm:$0xff]   ;;  %v796_v21 = vld [vmem:[%s1026_s0 + $0x88] ss:$16 sps:$4 sm:$0xff]  }
   0x8   :  { %270 = vmatprep.subr.bf16.mxu0 %v776_v8  ;;  %311 = vmatprep.subr.bf16.mxu1 %v780_v11  ;;  %v798_v22 = vld [vmem:[%s1026_s0 + $0xac] ss:$16 sps:$4 sm:$0xff]   ;;  %v797_v23 = vld [vmem:[%s1026_s0 + $0xa0] ss:$16 sps:$4 sm:$0xff]   ;;  %v800_v24 = vld [vmem:[%s1026_s0 + $0xc4] ss:$16 sps:$4 sm:$0xff]  }
   0x9   :  { %v802_v25 = vld [vmem:[%s1026_s0 + $0xa8] ss:$16 sps:$4 sm:$0xff]   ;;  %v804_v26 = vld [vmem:[%s1026_s0 + $0xcc] ss:$16 sps:$4 sm:$0xff]   ;;  %v33_v27 = vld [vmem:[%s1027_s1] sm:$0xff]  ;;  %v827_v50 = vmov 0.0  }
   0xa   :  { %v803_v28 = vld [vmem:[%s1026_s0 + $0xc0] ss:$16 sps:$4 sm:$0xff]   ;;  %v686_v29 = vcombine.high %v33_v27, %v33_v27  ;;  %v806_v30 = vld [vmem:[%s1026_s0 + $0xe4] ss:$16 sps:$4 sm:$0xff]   ;;  %v808_v31 = vld [vmem:[%s1026_s0 + $0xc8] ss:$16 sps:$4 sm:$0xff]   ;;  %v685_v44 = vcombine.low %v33_v27, %v33_v27 }
   0xb   :  { %271 = vmatpush1.bf16.msra.mxu0 %v779_v10  ;;  %312 = vmatpush1.bf16.msra.mxu1 %v784_v13  ;;  %v810_v32 = vld [vmem:[%s1026_s0 + $0xec] ss:$16 sps:$4 sm:$0xff]   ;;  %v353_v33 = vld [vmem:[%s1028_s6] sm:$0xff]  ;;  %v814_v37 = vld [vmem:[%s1026_s0 + $0xe8] ss:$16 sps:$4 sm:$0xff]   ;;  %vm359_vm2 = vcmask 261120  }
   0xc   :  { %272 = vmatprep.subr.bf16.mxu0 %v782_v12  ;;  %313 = vmatprep.subr.bf16.mxu1 %v786_v14  ;;  %v809_v34 = vld [vmem:[%s1026_s0 + $0xe0] ss:$16 sps:$4 sm:$0xff]   ;;  %v812_v35 = vld [vmem:[%s1026_s0 + $0x104] ss:$16 sps:$4 sm:$0xff]   ;;  %v818_v38 = vld [vmem:[%s1026_s0 + $0x10c] ss:$16 sps:$4 sm:$0xff]  }
   0xd   :  { %723 = vmatprep.mubr.msk.bf16.mxu0 %vm262_vm0, %v686_v29  ;;  %724 = vmatprep.mubr.msk.bf16.mxu1 %vm262_vm0, %v686_v29  ;;  %v70_v36 = vld [vmem:[%s1029_s2] sm:$0xff]  ;;  %v350_v41 = vld [vmem:[%s1030_s7 + $0x8] sm:$0xff]  ;;  %v351_v47 = vld [vmem:[%s1030_s7 + $0x10] sm:$0xff]  ;;  %v828_v52 = vmov 1983009808   ;;  %v440_v56 = vshrl.u32 %v439_v54, 7 }
   0xe   :  { %356 = vperm.xlu0 %763, %v353_v33   ;;  %v815_v39 = vld [vmem:[%s1026_s0 + $0x100] ss:$16 sps:$4 sm:$0xff]   ;;  %v820_v43 = vld [vmem:[%s1026_s0 + $0x108] ss:$16 sps:$4 sm:$0xff]   ;;  %v437_v53 = vunpack.c.l.s4 %v828_v52  ;;  %vm456_vm3 = vcmask 1041408   ;;  %vm452_vm4 = vcmask 15360  }
   0xf   :  { %273 = vmatpush1.bf16.msra.mxu0 %v785_v15  ;;  %314 = vmatpush1.bf16.msra.mxu1 %v790_v17  ;;  %v349_v40 = vld [vmem:[%s1030_s7] sm:$0xff]  ;;  %v352_v48 = vld [vmem:[%s1030_s7 + $0x18] sm:$0xff] }
  0x10   :  { %274 = vmatprep.subr.bf16.mxu0 %v788_v16  ;;  %315 = vmatprep.subr.bf16.mxu1 %v792_v18  ;;  %v607_v42 = vld [vmem:[%s1031_s3] sm:$0xff]  ;;  %v753_v45 = vpack.c.bf16 %v350_v41, %v349_v40  ;;  %v756_v49 = vpack.c.bf16 %v352_v48, %v351_v47  ;;  %v438_v55 = vunpack.c.0.s8 %v437_v53 }
  0x11   :  { %v348_v51 = vld [vmem:[%s1032_s5] sm:$0xff] }
  0x12   :  { %73 = vperm.xlu0 %763, %v70_v36   ;;  %v433_v57 = vld [vmem:[%s1033_s8] sm:$0xff]  ;;  %v441_v58 = vsub.s32 %v438_v55, %v440_v56 }
  0x13   :  { %275 = vmatpush1.bf16.msra.mxu0 %v791_v19  ;;  %316 = vmatpush1.bf16.msra.mxu1 %v796_v21  ;;  %v435_v59 = vcombine.high %v433_v57, %v433_v57  ;;  %v608_v27 = vld [vmem:[%s1034_s4] sm:$0xff] }
  0x14   :  { %276 = vmatprep.subr.bf16.mxu0 %v794_v20  ;;  %317 = vmatprep.subr.bf16.mxu1 %v798_v22  ;;  %v442_v60 = vrot.slane %v433_v57, %v441_v58 }
  0x15   :  { %v449_v61 = vrot.slane %v435_v59, %v441_v58 }
  0x16   :  { %639 = vperm.xlu0 %763, %v607_v42   ;;  %v450_v62 = vcombine.high %v442_v60, %v442_v60 }
  0x17   :  { %277 = vmatpush1.bf16.msra.mxu0 %v797_v23  ;;  %318 = vmatpush1.bf16.msra.mxu1 %v802_v25  ;;  %v451_v63 = vcombine.high %v449_v61, %v449_v61 }
  0x18   :  { %278 = vmatprep.subr.bf16.mxu0 %v800_v24  ;;  %319 = vmatprep.subr.bf16.mxu1 %v804_v26 }
  0x1b   :  { %279 = vmatpush1.bf16.msra.mxu0 %v803_v28  ;;  %320 = vmatpush1.bf16.msra.mxu1 %v808_v31 }
  0x1c   :  { %280 = vmatprep.subr.bf16.mxu0 %v806_v30  ;;  %321 = vmatprep.subr.bf16.mxu1 %v810_v32 }
  0x1f   :  { %281 = vmatpush1.bf16.msra.mxu0 %v809_v34  ;;  %322 = vmatpush1.bf16.msra.mxu1 %v814_v37 }
  0x20   :  { %282 = vmatprep.subr.bf16.mxu0 %v812_v35  ;;  %323 = vmatprep.subr.bf16.mxu1 %v818_v38 }
  0x23   :  { %283 = vmatpush1.bf16.msra.mxu0 %v815_v39  ;;  %324 = vmatpush1.bf16.msra.mxu1 %v820_v43 }
  0x24   :  { %752 = vmatprep.subr.bf16.mxu0 %v825_v46  ;;  %726 = vmatprep.subr.msk.mxu1 %vm456_vm3, %v450_v62 }
  0x26   :  { %299 = vmatmul.mubr.bf16.vlgmr.msra.gmra.mrb[0].mxu0 %v685_v44  ;;  %340 = vmatmul.mubr.bf16.vlgmr.msra.gmra.mrb[0].mxu1 %v685_v44 }
  0x27   :  { %754 = vmatpush3.bf16.msra.mxu0 %v753_v45  ;;  %749 = vmatprep.mubr.msk.f32.mxu0 %vm826_vm1, %v827_v50 }
  0x28   :  { %755 = vmatprep.subr.bf16.mxu0 %v825_v46  ;;  %529 = vmatprep.mubr.f32.mxu1 %v827_v50 }
  0x29   :  { %727 = vmatpush1.msk.msra.mxu1 %vm456_vm3, %v442_v60 }
  0x2b   :  { %757 = vmatpush3.bf16.msra.mxu0 %v756_v49 }
  0x2c   :  { %729 = vmatprep.subr.msk.mxu0 %vm456_vm3, %v451_v63 }
  0x2e   :  { %750 = vmatmul.mubr.msk.f32.vlgmr.msra.gmra.mrb[4].mxu0 %vm359_vm2, %v348_v51 }
  0x2f   :  { %600 = vmatprep.mubr.f32.mxu0 %v827_v50  ;;  %730 = vmatpush1.msk.msra.mxu0 %vm456_vm3, %v449_v61 }
  0x8d   :  { %v357_v0 = vpop.permute.xlu0 %356 }
  0x91   :  { %v74_v1 = vpop.permute.xlu0 %73 }
  0x95   :  { %v640_v44 = vpop.permute.xlu0 %639 }
  0xf9   :  { %v300_v2 = vpop.f32.mrb[0].mxu0  ;;  %v341_v7 = vpop.f32.mrb[0].mxu1 }
  0xfa   :  { %v301_v3 = vadd.f32 %v300_v2, %v74_v1  ;;  %v302_v4 = vpop.f32.mrb[1].mxu0  ;;  %v342_v9 = vadd.f32 %v341_v7, %v74_v1  ;;  %v343_v10 = vpop.f32.mrb[1].mxu1 }
  0xfb   :  { %v303_v5 = vadd.f32 %v302_v4, %v74_v1  ;;  %v304_v6 = vpop.f32.mrb[2].mxu0  ;;  %v344_v13 = vadd.f32 %v343_v10, %v74_v1  ;;  %v345_v15 = vpop.f32.mrb[2].mxu1 }
  0xfc   :  { %v305_v8 = vpop.f32.mrb[3].mxu0  ;;  %v615_v11 = vmul.f32 %v301_v3, %v301_v3  ;;  %v617_v16 = vmul.f32 %v342_v9, %v342_v9  ;;  %v346_v17 = vpop.f32.mrb[3].mxu1 }
  0xfd   :  { %v616_v12 = vmul.f32 %v303_v5, %v303_v5  ;;  %v609_v14 = vadd.f32 %v303_v5, %v301_v3  ;;  %v618_v22 = vmul.f32 %v344_v13, %v344_v13 }
  0xff   :  { %v610_v18 = vadd.f32 %v609_v14, %v342_v9  ;;  %v619_v19 = vadd.f32 %v616_v12, %v615_v11 }
 0x101   :  { %v429_v20 = vpop.f32.mrb[4].mxu0  ;;  %v611_v21 = vadd.f32 %v610_v18, %v344_v13  ;;  %v620_v23 = vadd.f32 %v619_v19, %v617_v16 }
 0x102   :  { %v430_v24 = vadd.f32 %v429_v20, %v357_v0  ;;  %v751_v25 = vpop.f32.mrb[5].mxu0 }
 0x103   :  { %612 = vadd.xlane.f32.xlu1 %v611_v21  ;;  %v621_v26 = vadd.f32 %v620_v23, %v618_v22 }
 0x104   :  { %728 = vmatmul.mubr.msk.f32.vlgmr.msra.gmra.mrb[4].mxu1 %vm452_vm4, %v430_v24  ;;  %731 = vmatmul.mubr.msk.f32.vlgmr.msra.gmra.mrb[6].mxu0 %vm452_vm4, %v430_v24 }
 0x107   :  { %622 = vadd.xlane.f32.xlu1 %v621_v26 }
 0x118   :  { %648 = vperm.xlu1 %764, %v608_v27  }
 0x190   :  { %v613_v28 = vpop.xlane.xlu1 %612 }
 0x191   :  { %v614_v30 = vmul.f32 0.001953125, %v613_v28 }
 0x193   :  { %v625_v32 = vmul.f32 %v614_v30, %v614_v30  ;;  %v627_v36 = vsub.f32 %v301_v3, %v614_v30  ;;  %v629_v37 = vsub.f32 %v342_v9, %v614_v30  ;;  %v628_v38 = vsub.f32 %v303_v5, %v614_v30 }
 0x194   :  { %v623_v29 = vpop.xlane.xlu1 %622  ;;  %v630_v39 = vsub.f32 %v344_v13, %v614_v30 }
 0x195   :  { %v624_v31 = vmul.f32 0.001953125, %v623_v29 }
 0x197   :  { %v626_v33 = vsub.f32 %v624_v31, %v625_v32 }
 0x198   :  { %v649_v47 = vpop.permute.xlu1 %648 }
 0x199   :  { %v631_v34 = vadd.f32 1e-05, %v626_v33 }
 0x19b   :  { %822 = vrsqrt.f32 %v631_v34 }
 0x1a5   :  { %v823_v35 = vpop.eup %822 }
 0x1a6   :  { %v633_v40 = vmul.f32 %v823_v35, %v627_v36  ;;  %v635_v41 = vmul.f32 %v823_v35, %v629_v37  ;;  %v634_v42 = vmul.f32 %v823_v35, %v628_v38  ;;  %v636_v43 = vmul.f32 %v823_v35, %v630_v39 }
 0x1a8   :  { %v642_v45 = vmul.f32 %v640_v44, %v633_v40  ;;  %v644_v46 = vmul.f32 %v640_v44, %v635_v41  ;;  %v643_v48 = vmul.f32 %v640_v44, %v634_v42  ;;  %v645_v49 = vmul.f32 %v640_v44, %v636_v43 }
 0x1aa   :  { %v651_v50 = vadd.f32 %v649_v47, %v642_v45  ;;  %v653_v51 = vadd.f32 %v649_v47, %v644_v46  ;;  %v652_v54 = vadd.f32 %v649_v47, %v643_v48  ;;  %v654_v55 = vadd.f32 %v649_v47, %v645_v49 }
 0x1d7   :  { %v531_v52 = vpop.f32.mrb[4].mxu1  ;;  %v602_v53 = vpop.f32.mrb[6].mxu0 }
 0x1d8   :  { %v655_v56 = vadd.f32 %v651_v50, %v531_v52  ;;  %v657_v57 = vadd.f32 %v653_v51, %v602_v53  ;;  %v533_v58 = vpop.f32.mrb[5].mxu1  ;;  %v604_v59 = vpop.f32.mrb[7].mxu0 }
 0x1d9   :  { %v656_v60 = vadd.f32 %v652_v54, %v533_v58  ;;  %v658_v61 = vadd.f32 %v654_v55, %v604_v59 }
 0x1da   :  { %v659_v62 = vmax.f32 %v655_v56, 0.0  ;;  %v661_v63 = vmax.f32 %v657_v57, 0.0 }
 0x1db   :  { %v660_v0 = vmax.f32 %v656_v60, 0.0  ;;  %v662_v1 = vmax.f32 %v658_v61, 0.0 }
 0x1dd   :  { %v734_v2 = vpack.c.bf16 %v660_v0, %v659_v62  ;;  %v735_v3 = vpack.c.bf16 %v662_v1, %v661_v63 }
 0x1df   :  { %679 = vst [vmem:[%s1035_s9] sm:$0xff] %v734_v2  ;;  %680 = vst [vmem:[%s1035_s9 + $0x8] sm:$0xff] %v735_v3 }

</bundles_post_ra>
